<compile_context>
chip_gen: v7x
topology: tpu7x:2x2x1
jax: 0.10.0
libtpu: 0.0.40
codegen_flags: <defaults>
</compile_context>

<pallas_src>
import functools

import jax
import jax.numpy as jnp
from jax.experimental import pallas as pl
from jax.experimental.pallas import tpu as pltpu

EPS = 1e-5


def _pick_batch_tile(n, cap=32):
    """Largest divisor of n (<= cap) that still leaves a grid of >= 2 steps,
    so v7x can shard batch tiles across its two TensorCores."""
    if n <= 1:
        return 1
    best = 1
    for b in range(1, min(cap, n) + 1):
        if n % b == 0 and n // b >= 2:
            best = b
    return best


def _dwconv(x, mask_ref, wdw_ref, bdw_ref, H, W, d):
    """Depthwise 3x3 dilated conv of a (B, Cin, H*W) slab.

    x:        (B, Cin, HW) f32 value (channels on sublanes, h*W+w on lanes)
    mask_ref: (9, HW)  per-tap edge-validity mask (1.0 inside image, 0.0 outside)
    wdw_ref:  (Cin, 9) depthwise weights, column k = kh*3+kw
    bdw_ref:  (Cin, 1) depthwise bias
    Each tap is a static lane rotation of the slab (pltpu.roll -> XLU) masked at
    the image edges; interior positions never wrap, so roll + mask is exact.
    """
    HW = H * W
    acc = None
    for kh in range(3):
        for kw in range(3):
            k = kh * 3 + kw
            off = (kh - 1) * d * W + (kw - 1) * d
            w_k = wdw_ref[:, k:k + 1]                       # (Cin, 1) per-channel weight
            if off == 0:                                    # center tap: no shift, no mask
                term = x * w_k
            else:
                tap = pltpu.roll(x, (-off) % HW, axis=2)    # tap[p] = x[p + off]
                term = tap * mask_ref[k:k + 1, :] * w_k     # zero out-of-image taps
            acc = term if acc is None else acc + term
    return acc + bdw_ref[...]                               # (B, Cin, HW)


def _chan_sums(y):
    """(B, C, HW) -> (C, 1) per-channel sum over batch tile and spatial."""
    t = jnp.sum(y, axis=2, keepdims=True)                   # lane reduce -> (B, C, 1)
    return jnp.sum(t, axis=0)                               # -> (C, 1)


# ---------------- pass 1: BN1 batch statistics of the depthwise output ----------------
def _dw_stats_kernel(H, W, d, x_ref, mask_ref, wdw_ref, bdw_ref, st_ref):
    y = _dwconv(x_ref[...], mask_ref, wdw_ref, bdw_ref, H, W, d)
    st_ref[:, 0:1] = _chan_sums(y)
    st_ref[:, 1:2] = _chan_sums(y * y)


# ---------------- pass 2: BN2 batch statistics of the 1x1-conv output -----------------
def _pw_stats_kernel(H, W, d, x_ref, mask_ref, wdw_ref, bdw_ref, w1_ref, b1_ref, st_ref):
    # BN1 is pre-folded into wdw/bdw here.
    u = jnp.maximum(_dwconv(x_ref[...], mask_ref, wdw_ref, bdw_ref, H, W, d), 0.0)
    w1 = w1_ref[...]
    b1 = b1_ref[...]
    B = u.shape[0]
    Cout = w1.shape[0]
    s = jnp.zeros((Cout, 1), jnp.float32)
    ss = jnp.zeros((Cout, 1), jnp.float32)
    for b in range(B):                                       # (Cout,Cin)@(Cin,HW) per image
        z = jnp.dot(w1, u[b], preferred_element_type=jnp.float32) + b1
        s = s + jnp.sum(z, axis=1, keepdims=True)
        ss = ss + jnp.sum(z * z, axis=1, keepdims=True)
    st_ref[:, 0:1] = s
    st_ref[:, 1:2] = ss


# ---------------- pass 3: final output (already NCHW, lane-dense stores) --------------
def _output_kernel(H, W, d, x_ref, mask_ref, wdw_ref, bdw_ref, w1_ref, b1_ref, out_ref):
    # BN1 folded into wdw/bdw, BN2 folded into w1/b1 -> kernel is taps + ReLU + matmul + ReLU.
    u = jnp.maximum(_dwconv(x_ref[...], mask_ref, wdw_ref, bdw_ref, H, W, d), 0.0)
    w1 = w1_ref[...]
    b1 = b1_ref[...]
    for b in range(u.shape[0]):
        z = jnp.dot(w1, u[b], preferred_element_type=jnp.float32) + b1
        out_ref[b] = jnp.maximum(z, 0.0)


def _bn_affine(st, cnt, gamma, beta):
    """Combine per-tile (sum, sum^2) partials into train-mode BN scale/shift."""
    s = st[:, :, 0].sum(axis=0)
    ss = st[:, :, 1].sum(axis=0)
    mean = s / cnt
    var = ss / cnt - mean * mean                             # one-pass biased variance
    scale = gamma.reshape(-1).astype(jnp.float32) * jax.lax.rsqrt(var + EPS)
    shift = beta.reshape(-1).astype(jnp.float32) - mean * scale
    return scale, shift


@functools.partial(jax.jit, static_argnums=(2,))
def dilated_ir_block(x_nchw, params, dilation):
    """Pallas implementation of DilatedIRBlock.forward.  Input/output are NCHW."""
    N, Cin, H, W = x_nchw.shape
    Cout = params["w_pw"].shape[0]
    d = int(dilation)
    HW = H * W
    B = _pick_batch_tile(N)
    G = N // B

    # NCHW kept end to end: (N,C,H,W) -> (N,C,H*W) is a free contiguous reshape.
    x = x_nchw.reshape(N, Cin, HW).astype(jnp.float32)

    wdw = params["w_dw"].reshape(Cin, 9).astype(jnp.float32)   # column = kh*3+kw
    bdw = params["b_dw"].reshape(Cin, 1).astype(jnp.float32)
    w1 = params["w_pw"].reshape(Cout, Cin).astype(jnp.float32)
    b1 = params["b_pw"].reshape(Cout, 1).astype(jnp.float32)

    # Per-tap edge-validity masks (handles both h and w image borders of the
    # dilated 3x3 with zero padding) -- built once, tiny (9, HW).
    pos = jnp.arange(HW, dtype=jnp.int32)
    hh, ww = pos // W, pos % W
    mask_rows = []
    for kh in range(3):
        for kw in range(3):
            dh, dw = (kh - 1) * d, (kw - 1) * d
            ok = (hh + dh >= 0) & (hh + dh < H) & (ww + dw >= 0) & (ww + dw < W)
            mask_rows.append(ok.astype(jnp.float32))
    masks = jnp.stack(mask_rows, axis=0)                       # (9, HW)

    cparams = pltpu.CompilerParams(dimension_semantics=("parallel",))

    x_spec = pl.BlockSpec((B, Cin, HW), lambda n: (n, 0, 0))   # B images per grid step

    def _full(a):                                              # small array, resident each step
        nd = a.ndim
        return pl.BlockSpec(a.shape, lambda n, _nd=nd: (0,) * _nd)

    cnt = float(N * H * W)

    # -------- pass 1: per-tile (sum, sum^2) of depthwise output -> BN1 stats --------
    st1 = pl.pallas_call(
        functools.partial(_dw_stats_kernel, H, W, d),
        grid=(G,),
        in_specs=[x_spec, _full(masks), _full(wdw), _full(bdw)],
        out_specs=pl.BlockSpec((None, Cin, 2), lambda n: (n, 0, 0)),
        out_shape=jax.ShapeDtypeStruct((G, Cin, 2), jnp.float32),
        compiler_params=cparams,
    )(x, masks, wdw, bdw)
    scale1, shift1 = _bn_affine(st1, cnt, params["g1"], params["be1"])

    # Fold BN1 into the depthwise conv (parameter-side math, removes in-kernel affine).
    wdw1 = wdw * scale1[:, None]
    bdw1 = (bdw[:, 0] * scale1 + shift1)[:, None]

    # -------- pass 2: per-tile (sum, sum^2) of 1x1-conv output -> BN2 stats ---------
    st2 = pl.pallas_call(
        functools.partial(_pw_stats_kernel, H, W, d),
        grid=(G,),
        in_specs=[x_spec, _full(masks), _full(wdw1), _full(bdw1), _full(w1), _full(b1)],
        out_specs=pl.BlockSpec((None, Cout, 2), lambda n: (n, 0, 0)),
        out_shape=jax.ShapeDtypeStruct((G, Cout, 2), jnp.float32),
        compiler_params=cparams,
    )(x, masks, wdw1, bdw1, w1, b1)
    scale2, shift2 = _bn_affine(st2, cnt, params["g2"], params["be2"])

    # Fold BN2 into the pointwise conv.
    w1f = w1 * scale2[:, None]
    b1f = (b1[:, 0] * scale2 + shift2)[:, None]

    # -------- pass 3: full fused block -> (N, Cout, H*W) written lane-dense ----------
    out = pl.pallas_call(
        functools.partial(_output_kernel, H, W, d),
        grid=(G,),
        in_specs=[x_spec, _full(masks), _full(wdw1), _full(bdw1), _full(w1f), _full(b1f)],
        out_specs=pl.BlockSpec((B, Cout, HW), lambda n: (n, 0, 0)),
        out_shape=jax.ShapeDtypeStruct((N, Cout, HW), jnp.float32),
        compiler_params=cparams,
    )(x, masks, wdw1, bdw1, w1f, b1f)

    return out.reshape(N, Cout, H, W)                          # free split: already NCHW


def reference(x_nchw, params, dilation):
    """Pure-JAX reference matching the PyTorch module (train-mode BN)."""
    d = int(dilation)
    Cin = x_nchw.shape[1]
    Cout = params["w_pw"].shape[0]

    y = jax.lax.conv_general_dilated(
        x_nchw, params["w_dw"], window_strides=(1, 1),
        padding=((d, d), (d, d)), rhs_dilation=(d, d),
        dimension_numbers=("NCHW", "OIHW", "NCHW"), feature_group_count=Cin)
    y = y + params["b_dw"].reshape(1, Cin, 1, 1)
    m = y.mean(axis=(0, 2, 3), keepdims=True)
    v = y.var(axis=(0, 2, 3), keepdims=True)
    y = (y - m) / jnp.sqrt(v + EPS) * params["g1"].reshape(1, Cin, 1, 1) \
        + params["be1"].reshape(1, Cin, 1, 1)
    y = jnp.maximum(y, 0.0)

    z = jax.lax.conv_general_dilated(
        y, params["w_pw"], window_strides=(1, 1), padding="VALID",
        dimension_numbers=("NCHW", "OIHW", "NCHW"))
    z = z + params["b_pw"].reshape(1, Cout, 1, 1)
    m2 = z.mean(axis=(0, 2, 3), keepdims=True)
    v2 = z.var(axis=(0, 2, 3), keepdims=True)
    z = (z - m2) / jnp.sqrt(v2 + EPS) * params["g2"].reshape(1, Cout, 1, 1) \
        + params["be2"].reshape(1, Cout, 1, 1)
    return jnp.maximum(z, 0.0)


if __name__ == "__main__":
    # DilatedIRBlock(in_channels=8, out_channels=16, dilation=2) on 16x16 images.
    N, Cin, Cout, HW_, dilation = 8, 8, 16, 16, 2

    key = jax.random.PRNGKey(0)
    ks = jax.random.split(key, 10)
    params = {
        "w_dw": 0.2 * jax.random.normal(ks[0], (Cin, 1, 3, 3), jnp.float32),
        "b_dw": 0.1 * jax.random.normal(ks[1], (Cin,), jnp.float32),
        "g1":   1.0 + 0.1 * jax.random.normal(ks[2], (Cin,), jnp.float32),
        "be1":  0.1 * jax.random.normal(ks[3], (Cin,), jnp.float32),
        "w_pw": 0.2 * jax.random.normal(ks[4], (Cout, Cin, 1, 1), jnp.float32),
        "b_pw": 0.1 * jax.random.normal(ks[5], (Cout,), jnp.float32),
        "g2":   1.0 + 0.1 * jax.random.normal(ks[6], (Cout,), jnp.float32),
        "be2":  0.1 * jax.random.normal(ks[7], (Cout,), jnp.float32),
    }
    x = jax.random.normal(ks[8], (N, Cin, HW_, HW_), jnp.float32)

    out = jax.block_until_ready(dilated_ir_block(x, params, dilation))
    ref = jax.block_until_ready(reference(x, params, dilation))

    assert out.shape == (N, Cout, HW_, HW_), out.shape
    max_err = float(jnp.abs(out - ref).max())
    assert jnp.allclose(out, ref, rtol=1e-3, atol=1e-3), max_err

    print("KERNEL_OK")
</pallas_src>

<mosaic_0001>
module attributes {stable_mosaic.version = 11 : i64} {
  func.func @_pw_stats_kernel(%arg0: i32, %arg1: memref<4x8x256xf32, #tpu.memory_space<vmem>>, %arg2: memref<9x256xf32, #tpu.memory_space<vmem>>, %arg3: memref<8x9xf32, #tpu.memory_space<vmem>>, %arg4: memref<8x1xf32, #tpu.memory_space<vmem>>, %arg5: memref<16x8xf32, #tpu.memory_space<vmem>>, %arg6: memref<16x1xf32, #tpu.memory_space<vmem>>, %arg7: memref<1x16x2xf32, #tpu.memory_space<vmem>>) attributes {dimension_semantics = [#tpu.dimension_semantics<parallel>], iteration_bounds = array<i64: 2>, scalar_prefetch = 0 : i64, scratch_operands = 0 : i64, tpu.core_type = #tpu.core_type<tc>, window_params = [{transform_indices = @transform_0, window_bounds = array<i64: 4, 8, 256>}, {pipeline_mode = #tpu.pipeline_mode<synchronous>, transform_indices = @transform_1, window_bounds = array<i64: 9, 256>}, {pipeline_mode = #tpu.pipeline_mode<synchronous>, transform_indices = @transform_2, window_bounds = array<i64: 8, 9>}, {pipeline_mode = #tpu.pipeline_mode<synchronous>, transform_indices = @transform_3, window_bounds = array<i64: 8, 1>}, {pipeline_mode = #tpu.pipeline_mode<synchronous>, transform_indices = @transform_4, window_bounds = array<i64: 16, 8>}, {pipeline_mode = #tpu.pipeline_mode<synchronous>, transform_indices = @transform_5, window_bounds = array<i64: 16, 1>}, {transform_indices = @transform_6, window_bounds = array<i64: 1, 16, 2>}]} {
    %c0 = arith.constant 0 : index
    %c0_0 = arith.constant 0 : index
    %c0_1 = arith.constant 0 : index
    %0 = vector.load %arg1[%c0, %c0_0, %c0_1] : memref<4x8x256xf32, #tpu.memory_space<vmem>>, vector<4x8x256xf32>
    %c0_2 = arith.constant 0 : index
    %c0_3 = arith.constant 0 : index
    %1 = vector.load %arg3[%c0_2, %c0_3] : memref<8x9xf32, #tpu.memory_space<vmem>>, vector<8x1xf32>
    %c34_i32 = arith.constant 34 : i32
    %2 = tpu.dynamic_rotate %0 by %c34_i32 dim 2 : vector<4x8x256xf32>, i32 -> vector<4x8x256xf32>
    %c0_4 = arith.constant 0 : index
    %c0_5 = arith.constant 0 : index
    %3 = vector.load %arg2[%c0_4, %c0_5] : memref<9x256xf32, #tpu.memory_space<vmem>>, vector<1x256xf32>
    %4 = vector.shape_cast %3 : vector<1x256xf32> to vector<1x1x256xf32>
    %5 = vector.broadcast %4 : vector<1x1x256xf32> to vector<4x8x256xf32>
    %6 = arith.mulf %2, %5 : vector<4x8x256xf32>
    %7 = vector.shape_cast %1 : vector<8x1xf32> to vector<1x8x1xf32>
    %8 = vector.broadcast %7 : vector<1x8x1xf32> to vector<4x8x256xf32>
    %9 = arith.mulf %6, %8 : vector<4x8x256xf32>
    %c0_6 = arith.constant 0 : index
    %c1 = arith.constant 1 : index
    %10 = vector.load %arg3[%c0_6, %c1] : memref<8x9xf32, #tpu.memory_space<vmem>>, vector<8x1xf32>
    %c32_i32 = arith.constant 32 : i32
    %11 = tpu.dynamic_rotate %0 by %c32_i32 dim 2 : vector<4x8x256xf32>, i32 -> vector<4x8x256xf32>
    %c1_7 = arith.constant 1 : index
    %c0_8 = arith.constant 0 : index
    %12 = vector.load %arg2[%c1_7, %c0_8] : memref<9x256xf32, #tpu.memory_space<vmem>>, vector<1x256xf32>
    %13 = vector.shape_cast %12 : vector<1x256xf32> to vector<1x1x256xf32>
    %14 = vector.broadcast %13 : vector<1x1x256xf32> to vector<4x8x256xf32>
    %15 = arith.mulf %11, %14 : vector<4x8x256xf32>
    %16 = vector.shape_cast %10 : vector<8x1xf32> to vector<1x8x1xf32>
    %17 = vector.broadcast %16 : vector<1x8x1xf32> to vector<4x8x256xf32>
    %18 = arith.mulf %15, %17 : vector<4x8x256xf32>
    %19 = arith.addf %9, %18 : vector<4x8x256xf32>
    %c0_9 = arith.constant 0 : index
    %c2 = arith.constant 2 : index
    %20 = vector.load %arg3[%c0_9, %c2] : memref<8x9xf32, #tpu.memory_space<vmem>>, vector<8x1xf32>
    %c30_i32 = arith.constant 30 : i32
    %21 = tpu.dynamic_rotate %0 by %c30_i32 dim 2 : vector<4x8x256xf32>, i32 -> vector<4x8x256xf32>
    %c2_10 = arith.constant 2 : index
    %c0_11 = arith.constant 0 : index
    %22 = vector.load %arg2[%c2_10, %c0_11] : memref<9x256xf32, #tpu.memory_space<vmem>>, vector<1x256xf32>
    %23 = vector.shape_cast %22 : vector<1x256xf32> to vector<1x1x256xf32>
    %24 = vector.broadcast %23 : vector<1x1x256xf32> to vector<4x8x256xf32>
    %25 = arith.mulf %21, %24 : vector<4x8x256xf32>
    %26 = vector.shape_cast %20 : vector<8x1xf32> to vector<1x8x1xf32>
    %27 = vector.broadcast %26 : vector<1x8x1xf32> to vector<4x8x256xf32>
    %28 = arith.mulf %25, %27 : vector<4x8x256xf32>
    %29 = arith.addf %19, %28 : vector<4x8x256xf32>
    %c0_12 = arith.constant 0 : index
    %c3 = arith.constant 3 : index
    %30 = vector.load %arg3[%c0_12, %c3] : memref<8x9xf32, #tpu.memory_space<vmem>>, vector<8x1xf32>
    %c2_i32 = arith.constant 2 : i32
    %31 = tpu.dynamic_rotate %0 by %c2_i32 dim 2 : vector<4x8x256xf32>, i32 -> vector<4x8x256xf32>
    %c3_13 = arith.constant 3 : index
    %c0_14 = arith.constant 0 : index
    %32 = vector.load %arg2[%c3_13, %c0_14] : memref<9x256xf32, #tpu.memory_space<vmem>>, vector<1x256xf32>
    %33 = vector.shape_cast %32 : vector<1x256xf32> to vector<1x1x256xf32>
    %34 = vector.broadcast %33 : vector<1x1x256xf32> to vector<4x8x256xf32>
    %35 = arith.mulf %31, %34 : vector<4x8x256xf32>
    %36 = vector.shape_cast %30 : vector<8x1xf32> to vector<1x8x1xf32>
    %37 = vector.broadcast %36 : vector<1x8x1xf32> to vector<4x8x256xf32>
    %38 = arith.mulf %35, %37 : vector<4x8x256xf32>
    %39 = arith.addf %29, %38 : vector<4x8x256xf32>
    %c0_15 = arith.constant 0 : index
    %c4 = arith.constant 4 : index
    %40 = vector.load %arg3[%c0_15, %c4] : memref<8x9xf32, #tpu.memory_space<vmem>>, vector<8x1xf32>
    %41 = vector.shape_cast %40 : vector<8x1xf32> to vector<1x8x1xf32>
    %42 = vector.broadcast %41 : vector<1x8x1xf32> to vector<4x8x256xf32>
    %43 = arith.mulf %0, %42 : vector<4x8x256xf32>
    %44 = arith.addf %39, %43 : vector<4x8x256xf32>
    %c0_16 = arith.constant 0 : index
    %c5 = arith.constant 5 : index
    %45 = vector.load %arg3[%c0_16, %c5] : memref<8x9xf32, #tpu.memory_space<vmem>>, vector<8x1xf32>
    %c254_i32 = arith.constant 254 : i32
    %46 = tpu.dynamic_rotate %0 by %c254_i32 dim 2 : vector<4x8x256xf32>, i32 -> vector<4x8x256xf32>
    %c5_17 = arith.constant 5 : index
    %c0_18 = arith.constant 0 : index
    %47 = vector.load %arg2[%c5_17, %c0_18] : memref<9x256xf32, #tpu.memory_space<vmem>>, vector<1x256xf32>
    %48 = vector.shape_cast %47 : vector<1x256xf32> to vector<1x1x256xf32>
    %49 = vector.broadcast %48 : vector<1x1x256xf32> to vector<4x8x256xf32>
    %50 = arith.mulf %46, %49 : vector<4x8x256xf32>
    %51 = vector.shape_cast %45 : vector<8x1xf32> to vector<1x8x1xf32>
    %52 = vector.broadcast %51 : vector<1x8x1xf32> to vector<4x8x256xf32>
    %53 = arith.mulf %50, %52 : vector<4x8x256xf32>
    %54 = arith.addf %44, %53 : vector<4x8x256xf32>
    %c0_19 = arith.constant 0 : index
    %c6 = arith.constant 6 : index
    %55 = vector.load %arg3[%c0_19, %c6] : memref<8x9xf32, #tpu.memory_space<vmem>>, vector<8x1xf32>
    %c226_i32 = arith.constant 226 : i32
    %56 = tpu.dynamic_rotate %0 by %c226_i32 dim 2 : vector<4x8x256xf32>, i32 -> vector<4x8x256xf32>
    %c6_20 = arith.constant 6 : index
    %c0_21 = arith.constant 0 : index
    %57 = vector.load %arg2[%c6_20, %c0_21] : memref<9x256xf32, #tpu.memory_space<vmem>>, vector<1x256xf32>
    %58 = vector.shape_cast %57 : vector<1x256xf32> to vector<1x1x256xf32>
    %59 = vector.broadcast %58 : vector<1x1x256xf32> to vector<4x8x256xf32>
    %60 = arith.mulf %56, %59 : vector<4x8x256xf32>
    %61 = vector.shape_cast %55 : vector<8x1xf32> to vector<1x8x1xf32>
    %62 = vector.broadcast %61 : vector<1x8x1xf32> to vector<4x8x256xf32>
    %63 = arith.mulf %60, %62 : vector<4x8x256xf32>
    %64 = arith.addf %54, %63 : vector<4x8x256xf32>
    %c0_22 = arith.constant 0 : index
    %c7 = arith.constant 7 : index
    %65 = vector.load %arg3[%c0_22, %c7] : memref<8x9xf32, #tpu.memory_space<vmem>>, vector<8x1xf32>
    %c224_i32 = arith.constant 224 : i32
    %66 = tpu.dynamic_rotate %0 by %c224_i32 dim 2 : vector<4x8x256xf32>, i32 -> vector<4x8x256xf32>
    %c7_23 = arith.constant 7 : index
    %c0_24 = arith.constant 0 : index
    %67 = vector.load %arg2[%c7_23, %c0_24] : memref<9x256xf32, #tpu.memory_space<vmem>>, vector<1x256xf32>
    %68 = vector.shape_cast %67 : vector<1x256xf32> to vector<1x1x256xf32>
    %69 = vector.broadcast %68 : vector<1x1x256xf32> to vector<4x8x256xf32>
    %70 = arith.mulf %66, %69 : vector<4x8x256xf32>
    %71 = vector.shape_cast %65 : vector<8x1xf32> to vector<1x8x1xf32>
    %72 = vector.broadcast %71 : vector<1x8x1xf32> to vector<4x8x256xf32>
    %73 = arith.mulf %70, %72 : vector<4x8x256xf32>
    %74 = arith.addf %64, %73 : vector<4x8x256xf32>
    %c0_25 = arith.constant 0 : index
    %c8 = arith.constant 8 : index
    %75 = vector.load %arg3[%c0_25, %c8] : memref<8x9xf32, #tpu.memory_space<vmem>>, vector<8x1xf32>
    %c222_i32 = arith.constant 222 : i32
    %76 = tpu.dynamic_rotate %0 by %c222_i32 dim 2 : vector<4x8x256xf32>, i32 -> vector<4x8x256xf32>
    %c8_26 = arith.constant 8 : index
    %c0_27 = arith.constant 0 : index
    %77 = vector.load %arg2[%c8_26, %c0_27] : memref<9x256xf32, #tpu.memory_space<vmem>>, vector<1x256xf32>
    %78 = vector.shape_cast %77 : vector<1x256xf32> to vector<1x1x256xf32>
    %79 = vector.broadcast %78 : vector<1x1x256xf32> to vector<4x8x256xf32>
    %80 = arith.mulf %76, %79 : vector<4x8x256xf32>
    %81 = vector.shape_cast %75 : vector<8x1xf32> to vector<1x8x1xf32>
    %82 = vector.broadcast %81 : vector<1x8x1xf32> to vector<4x8x256xf32>
    %83 = arith.mulf %80, %82 : vector<4x8x256xf32>
    %84 = arith.addf %74, %83 : vector<4x8x256xf32>
    %c0_28 = arith.constant 0 : index
    %c0_29 = arith.constant 0 : index
    %85 = vector.load %arg4[%c0_28, %c0_29] : memref<8x1xf32, #tpu.memory_space<vmem>>, vector<8x1xf32>
    %86 = vector.shape_cast %85 : vector<8x1xf32> to vector<1x8x1xf32>
    %87 = vector.broadcast %86 : vector<1x8x1xf32> to vector<4x8x256xf32>
    %88 = arith.addf %84, %87 : vector<4x8x256xf32>
    %cst = arith.constant 0.000000e+00 : f32
    %89 = vector.broadcast %cst : f32 to vector<4x8x256xf32>
    %90 = arith.maximumf %88, %89 : vector<4x8x256xf32>
    %c0_30 = arith.constant 0 : index
    %c0_31 = arith.constant 0 : index
    %91 = vector.load %arg5[%c0_30, %c0_31] : memref<16x8xf32, #tpu.memory_space<vmem>>, vector<16x8xf32>
    %c0_32 = arith.constant 0 : index
    %c0_33 = arith.constant 0 : index
    %92 = vector.load %arg6[%c0_32, %c0_33] : memref<16x1xf32, #tpu.memory_space<vmem>>, vector<16x1xf32>
    %cst_34 = arith.constant 0.000000e+00 : f32
    %93 = vector.broadcast %cst_34 : f32 to vector<16x1xf32>
    %cst_35 = arith.constant 0.000000e+00 : f32
    %94 = vector.broadcast %cst_35 : f32 to vector<16x1xf32>
    %95 = vector.extract_strided_slice %90 {offsets = [0, 0, 0], sizes = [1, 8, 256], strides = [1, 1, 1]} : vector<4x8x256xf32> to vector<1x8x256xf32>
    %96 = vector.shape_cast %95 : vector<1x8x256xf32> to vector<8x256xf32>
    %cst_36 = arith.constant dense<0.000000e+00> : vector<16x256xf32>
    %97 = tpu.matmul %91, %96, %cst_36 {dimension_numbers = #tpu.dot_dimension_numbers<[1], [0], [0], [1], [0, 0, 1, 1], [], []>} : vector<16x8xf32>, vector<8x256xf32>, vector<16x256xf32> -> vector<16x256xf32>
    %98 = vector.broadcast %92 : vector<16x1xf32> to vector<16x256xf32>
    %99 = arith.addf %97, %98 : vector<16x256xf32>
    %cst_37 = arith.constant dense<0.000000e+00> : vector<16xf32>
    %100 = vector.multi_reduction <add>, %99, %cst_37 [1] : vector<16x256xf32> to vector<16xf32>
    %101 = vector.shape_cast %100 : vector<16xf32> to vector<16x1xf32>
    %102 = arith.addf %93, %101 : vector<16x1xf32>
    %103 = arith.mulf %99, %99 : vector<16x256xf32>
    %cst_38 = arith.constant dense<0.000000e+00> : vector<16xf32>
    %104 = vector.multi_reduction <add>, %103, %cst_38 [1] : vector<16x256xf32> to vector<16xf32>
    %105 = vector.shape_cast %104 : vector<16xf32> to vector<16x1xf32>
    %106 = arith.addf %94, %105 : vector<16x1xf32>
    %107 = vector.extract_strided_slice %90 {offsets = [1, 0, 0], sizes = [1, 8, 256], strides = [1, 1, 1]} : vector<4x8x256xf32> to vector<1x8x256xf32>
    %108 = vector.shape_cast %107 : vector<1x8x256xf32> to vector<8x256xf32>
    %cst_39 = arith.constant dense<0.000000e+00> : vector<16x256xf32>
    %109 = tpu.matmul %91, %108, %cst_39 {dimension_numbers = #tpu.dot_dimension_numbers<[1], [0], [0], [1], [0, 0, 1, 1], [], []>} : vector<16x8xf32>, vector<8x256xf32>, vector<16x256xf32> -> vector<16x256xf32>
    %110 = vector.broadcast %92 : vector<16x1xf32> to vector<16x256xf32>
    %111 = arith.addf %109, %110 : vector<16x256xf32>
    %cst_40 = arith.constant dense<0.000000e+00> : vector<16xf32>
    %112 = vector.multi_reduction <add>, %111, %cst_40 [1] : vector<16x256xf32> to vector<16xf32>
    %113 = vector.shape_cast %112 : vector<16xf32> to vector<16x1xf32>
    %114 = arith.addf %102, %113 : vector<16x1xf32>
    %115 = arith.mulf %111, %111 : vector<16x256xf32>
    %cst_41 = arith.constant dense<0.000000e+00> : vector<16xf32>
    %116 = vector.multi_reduction <add>, %115, %cst_41 [1] : vector<16x256xf32> to vector<16xf32>
    %117 = vector.shape_cast %116 : vector<16xf32> to vector<16x1xf32>
    %118 = arith.addf %106, %117 : vector<16x1xf32>
    %119 = vector.extract_strided_slice %90 {offsets = [2, 0, 0], sizes = [1, 8, 256], strides = [1, 1, 1]} : vector<4x8x256xf32> to vector<1x8x256xf32>
    %120 = vector.shape_cast %119 : vector<1x8x256xf32> to vector<8x256xf32>
    %cst_42 = arith.constant dense<0.000000e+00> : vector<16x256xf32>
    %121 = tpu.matmul %91, %120, %cst_42 {dimension_numbers = #tpu.dot_dimension_numbers<[1], [0], [0], [1], [0, 0, 1, 1], [], []>} : vector<16x8xf32>, vector<8x256xf32>, vector<16x256xf32> -> vector<16x256xf32>
    %122 = vector.broadcast %92 : vector<16x1xf32> to vector<16x256xf32>
    %123 = arith.addf %121, %122 : vector<16x256xf32>
    %cst_43 = arith.constant dense<0.000000e+00> : vector<16xf32>
    %124 = vector.multi_reduction <add>, %123, %cst_43 [1] : vector<16x256xf32> to vector<16xf32>
    %125 = vector.shape_cast %124 : vector<16xf32> to vector<16x1xf32>
    %126 = arith.addf %114, %125 : vector<16x1xf32>
    %127 = arith.mulf %123, %123 : vector<16x256xf32>
    %cst_44 = arith.constant dense<0.000000e+00> : vector<16xf32>
    %128 = vector.multi_reduction <add>, %127, %cst_44 [1] : vector<16x256xf32> to vector<16xf32>
    %129 = vector.shape_cast %128 : vector<16xf32> to vector<16x1xf32>
    %130 = arith.addf %118, %129 : vector<16x1xf32>
    %131 = vector.extract_strided_slice %90 {offsets = [3, 0, 0], sizes = [1, 8, 256], strides = [1, 1, 1]} : vector<4x8x256xf32> to vector<1x8x256xf32>
    %132 = vector.shape_cast %131 : vector<1x8x256xf32> to vector<8x256xf32>
    %cst_45 = arith.constant dense<0.000000e+00> : vector<16x256xf32>
    %133 = tpu.matmul %91, %132, %cst_45 {dimension_numbers = #tpu.dot_dimension_numbers<[1], [0], [0], [1], [0, 0, 1, 1], [], []>} : vector<16x8xf32>, vector<8x256xf32>, vector<16x256xf32> -> vector<16x256xf32>
    %134 = vector.broadcast %92 : vector<16x1xf32> to vector<16x256xf32>
    %135 = arith.addf %133, %134 : vector<16x256xf32>
    %cst_46 = arith.constant dense<0.000000e+00> : vector<16xf32>
    %136 = vector.multi_reduction <add>, %135, %cst_46 [1] : vector<16x256xf32> to vector<16xf32>
    %137 = vector.shape_cast %136 : vector<16xf32> to vector<16x1xf32>
    %138 = arith.addf %126, %137 : vector<16x1xf32>
    %139 = arith.mulf %135, %135 : vector<16x256xf32>
    %cst_47 = arith.constant dense<0.000000e+00> : vector<16xf32>
    %140 = vector.multi_reduction <add>, %139, %cst_47 [1] : vector<16x256xf32> to vector<16xf32>
    %141 = vector.shape_cast %140 : vector<16xf32> to vector<16x1xf32>
    %142 = arith.addf %130, %141 : vector<16x1xf32>
    %c0_48 = arith.constant 0 : index
    %c0_49 = arith.constant 0 : index
    %c0_50 = arith.constant 0 : index
    %143 = vector.load %arg7[%c0_48, %c0_49, %c0_50] : memref<1x16x2xf32, #tpu.memory_space<vmem>>, vector<1x16x1xf32>
    %144 = vector.shape_cast %143 : vector<1x16x1xf32> to vector<16x1xf32>
    %145 = vector.shape_cast %138 : vector<16x1xf32> to vector<1x16x1xf32>
    tpu.vector_store %arg7[%c0_48, %c0_49, %c0_50], %145 {strides = array<i32>} : memref<1x16x2xf32, #tpu.memory_space<vmem>>, vector<1x16x1xf32>,
    %c0_51 = arith.constant 0 : index
    %c0_52 = arith.constant 0 : index
    %c1_53 = arith.constant 1 : index
    %146 = vector.load %arg7[%c0_51, %c0_52, %c1_53] : memref<1x16x2xf32, #tpu.memory_space<vmem>>, vector<1x16x1xf32>
    %147 = vector.shape_cast %146 : vector<1x16x1xf32> to vector<16x1xf32>
    %148 = vector.shape_cast %142 : vector<16x1xf32> to vector<1x16x1xf32>
    tpu.vector_store %arg7[%c0_51, %c0_52, %c1_53], %148 {strides = array<i32>} : memref<1x16x2xf32, #tpu.memory_space<vmem>>, vector<1x16x1xf32>,
    return
  }
  func.func @transform_0(%arg0: i32) -> (i32, i32, i32) {
    %c0_i32 = arith.constant 0 : i32
    %c0_i32_0 = arith.constant 0 : i32
    %c0_i32_1 = arith.constant 0 : i32
    return %arg0, %c0_i32, %c0_i32_0 : i32, i32, i32
  }
  func.func @transform_1(%arg0: i32) -> (i32, i32) {
    %c0_i32 = arith.constant 0 : i32
    %c0_i32_0 = arith.constant 0 : i32
    %c0_i32_1 = arith.constant 0 : i32
    return %c0_i32, %c0_i32_0 : i32, i32
  }
  func.func @transform_2(%arg0: i32) -> (i32, i32) {
    %c0_i32 = arith.constant 0 : i32
    %c0_i32_0 = arith.constant 0 : i32
    %c0_i32_1 = arith.constant 0 : i32
    return %c0_i32, %c0_i32_0 : i32, i32
  }
  func.func @transform_3(%arg0: i32) -> (i32, i32) {
    %c0_i32 = arith.constant 0 : i32
    %c0_i32_0 = arith.constant 0 : i32
    %c0_i32_1 = arith.constant 0 : i32
    return %c0_i32, %c0_i32_0 : i32, i32
  }
  func.func @transform_4(%arg0: i32) -> (i32, i32) {
    %c0_i32 = arith.constant 0 : i32
    %c0_i32_0 = arith.constant 0 : i32
    %c0_i32_1 = arith.constant 0 : i32
    return %c0_i32, %c0_i32_0 : i32, i32
  }
  func.func @transform_5(%arg0: i32) -> (i32, i32) {
    %c0_i32 = arith.constant 0 : i32
    %c0_i32_0 = arith.constant 0 : i32
    %c0_i32_1 = arith.constant 0 : i32
    return %c0_i32, %c0_i32_0 : i32, i32
  }
  func.func @transform_6(%arg0: i32) -> (i32, i32, i32) {
    %c0_i32 = arith.constant 0 : i32
    %c0_i32_0 = arith.constant 0 : i32
    %c0_i32_1 = arith.constant 0 : i32
    return %arg0, %c0_i32, %c0_i32_0 : i32, i32, i32
  }
}

module attributes {stable_mosaic.version = 11 : i64} {
  func.func @_dw_stats_kernel(%arg0: i32, %arg1: memref<4x8x256xf32, #tpu.memory_space<vmem>>, %arg2: memref<9x256xf32, #tpu.memory_space<vmem>>, %arg3: memref<8x9xf32, #tpu.memory_space<vmem>>, %arg4: memref<8x1xf32, #tpu.memory_space<vmem>>, %arg5: memref<1x8x2xf32, #tpu.memory_space<vmem>>) attributes {dimension_semantics = [#tpu.dimension_semantics<parallel>], iteration_bounds = array<i64: 2>, scalar_prefetch = 0 : i64, scratch_operands = 0 : i64, tpu.core_type = #tpu.core_type<tc>, window_params = [{transform_indices = @transform_0, window_bounds = array<i64: 4, 8, 256>}, {pipeline_mode = #tpu.pipeline_mode<synchronous>, transform_indices = @transform_1, window_bounds = array<i64: 9, 256>}, {pipeline_mode = #tpu.pipeline_mode<synchronous>, transform_indices = @transform_2, window_bounds = array<i64: 8, 9>}, {pipeline_mode = #tpu.pipeline_mode<synchronous>, transform_indices = @transform_3, window_bounds = array<i64: 8, 1>}, {transform_indices = @transform_4, window_bounds = array<i64: 1, 8, 2>}]} {
    %c0 = arith.constant 0 : index
    %c0_0 = arith.constant 0 : index
    %c0_1 = arith.constant 0 : index
    %0 = vector.load %arg1[%c0, %c0_0, %c0_1] : memref<4x8x256xf32, #tpu.memory_space<vmem>>, vector<4x8x256xf32>
    %c0_2 = arith.constant 0 : index
    %c0_3 = arith.constant 0 : index
    %1 = vector.load %arg3[%c0_2, %c0_3] : memref<8x9xf32, #tpu.memory_space<vmem>>, vector<8x1xf32>
    %c34_i32 = arith.constant 34 : i32
    %2 = tpu.dynamic_rotate %0 by %c34_i32 dim 2 : vector<4x8x256xf32>, i32 -> vector<4x8x256xf32>
    %c0_4 = arith.constant 0 : index
    %c0_5 = arith.constant 0 : index
    %3 = vector.load %arg2[%c0_4, %c0_5] : memref<9x256xf32, #tpu.memory_space<vmem>>, vector<1x256xf32>
    %4 = vector.shape_cast %3 : vector<1x256xf32> to vector<1x1x256xf32>
    %5 = vector.broadcast %4 : vector<1x1x256xf32> to vector<4x8x256xf32>
    %6 = arith.mulf %2, %5 : vector<4x8x256xf32>
    %7 = vector.shape_cast %1 : vector<8x1xf32> to vector<1x8x1xf32>
    %8 = vector.broadcast %7 : vector<1x8x1xf32> to vector<4x8x256xf32>
    %9 = arith.mulf %6, %8 : vector<4x8x256xf32>
    %c0_6 = arith.constant 0 : index
    %c1 = arith.constant 1 : index
    %10 = vector.load %arg3[%c0_6, %c1] : memref<8x9xf32, #tpu.memory_space<vmem>>, vector<8x1xf32>
    %c32_i32 = arith.constant 32 : i32
    %11 = tpu.dynamic_rotate %0 by %c32_i32 dim 2 : vector<4x8x256xf32>, i32 -> vector<4x8x256xf32>
    %c1_7 = arith.constant 1 : index
    %c0_8 = arith.constant 0 : index
    %12 = vector.load %arg2[%c1_7, %c0_8] : memref<9x256xf32, #tpu.memory_space<vmem>>, vector<1x256xf32>
    %13 = vector.shape_cast %12 : vector<1x256xf32> to vector<1x1x256xf32>
    %14 = vector.broadcast %13 : vector<1x1x256xf32> to vector<4x8x256xf32>
    %15 = arith.mulf %11, %14 : vector<4x8x256xf32>
    %16 = vector.shape_cast %10 : vector<8x1xf32> to vector<1x8x1xf32>
    %17 = vector.broadcast %16 : vector<1x8x1xf32> to vector<4x8x256xf32>
    %18 = arith.mulf %15, %17 : vector<4x8x256xf32>
    %19 = arith.addf %9, %18 : vector<4x8x256xf32>
    %c0_9 = arith.constant 0 : index
    %c2 = arith.constant 2 : index
    %20 = vector.load %arg3[%c0_9, %c2] : memref<8x9xf32, #tpu.memory_space<vmem>>, vector<8x1xf32>
    %c30_i32 = arith.constant 30 : i32
    %21 = tpu.dynamic_rotate %0 by %c30_i32 dim 2 : vector<4x8x256xf32>, i32 -> vector<4x8x256xf32>
    %c2_10 = arith.constant 2 : index
    %c0_11 = arith.constant 0 : index
    %22 = vector.load %arg2[%c2_10, %c0_11] : memref<9x256xf32, #tpu.memory_space<vmem>>, vector<1x256xf32>
    %23 = vector.shape_cast %22 : vector<1x256xf32> to vector<1x1x256xf32>
    %24 = vector.broadcast %23 : vector<1x1x256xf32> to vector<4x8x256xf32>
    %25 = arith.mulf %21, %24 : vector<4x8x256xf32>
    %26 = vector.shape_cast %20 : vector<8x1xf32> to vector<1x8x1xf32>
    %27 = vector.broadcast %26 : vector<1x8x1xf32> to vector<4x8x256xf32>
    %28 = arith.mulf %25, %27 : vector<4x8x256xf32>
    %29 = arith.addf %19, %28 : vector<4x8x256xf32>
    %c0_12 = arith.constant 0 : index
    %c3 = arith.constant 3 : index
    %30 = vector.load %arg3[%c0_12, %c3] : memref<8x9xf32, #tpu.memory_space<vmem>>, vector<8x1xf32>
    %c2_i32 = arith.constant 2 : i32
    %31 = tpu.dynamic_rotate %0 by %c2_i32 dim 2 : vector<4x8x256xf32>, i32 -> vector<4x8x256xf32>
    %c3_13 = arith.constant 3 : index
    %c0_14 = arith.constant 0 : index
    %32 = vector.load %arg2[%c3_13, %c0_14] : memref<9x256xf32, #tpu.memory_space<vmem>>, vector<1x256xf32>
    %33 = vector.shape_cast %32 : vector<1x256xf32> to vector<1x1x256xf32>
    %34 = vector.broadcast %33 : vector<1x1x256xf32> to vector<4x8x256xf32>
    %35 = arith.mulf %31, %34 : vector<4x8x256xf32>
    %36 = vector.shape_cast %30 : vector<8x1xf32> to vector<1x8x1xf32>
    %37 = vector.broadcast %36 : vector<1x8x1xf32> to vector<4x8x256xf32>
    %38 = arith.mulf %35, %37 : vector<4x8x256xf32>
    %39 = arith.addf %29, %38 : vector<4x8x256xf32>
    %c0_15 = arith.constant 0 : index
    %c4 = arith.constant 4 : index
    %40 = vector.load %arg3[%c0_15, %c4] : memref<8x9xf32, #tpu.memory_space<vmem>>, vector<8x1xf32>
    %41 = vector.shape_cast %40 : vector<8x1xf32> to vector<1x8x1xf32>
    %42 = vector.broadcast %41 : vector<1x8x1xf32> to vector<4x8x256xf32>
    %43 = arith.mulf %0, %42 : vector<4x8x256xf32>
    %44 = arith.addf %39, %43 : vector<4x8x256xf32>
    %c0_16 = arith.constant 0 : index
    %c5 = arith.constant 5 : index
    %45 = vector.load %arg3[%c0_16, %c5] : memref<8x9xf32, #tpu.memory_space<vmem>>, vector<8x1xf32>
    %c254_i32 = arith.constant 254 : i32
    %46 = tpu.dynamic_rotate %0 by %c254_i32 dim 2 : vector<4x8x256xf32>, i32 -> vector<4x8x256xf32>
    %c5_17 = arith.constant 5 : index
    %c0_18 = arith.constant 0 : index
    %47 = vector.load %arg2[%c5_17, %c0_18] : memref<9x256xf32, #tpu.memory_space<vmem>>, vector<1x256xf32>
    %48 = vector.shape_cast %47 : vector<1x256xf32> to vector<1x1x256xf32>
    %49 = vector.broadcast %48 : vector<1x1x256xf32> to vector<4x8x256xf32>
    %50 = arith.mulf %46, %49 : vector<4x8x256xf32>
    %51 = vector.shape_cast %45 : vector<8x1xf32> to vector<1x8x1xf32>
    %52 = vector.broadcast %51 : vector<1x8x1xf32> to vector<4x8x256xf32>
    %53 = arith.mulf %50, %52 : vector<4x8x256xf32>
    %54 = arith.addf %44, %53 : vector<4x8x256xf32>
    %c0_19 = arith.constant 0 : index
    %c6 = arith.constant 6 : index
    %55 = vector.load %arg3[%c0_19, %c6] : memref<8x9xf32, #tpu.memory_space<vmem>>, vector<8x1xf32>
    %c226_i32 = arith.constant 226 : i32
    %56 = tpu.dynamic_rotate %0 by %c226_i32 dim 2 : vector<4x8x256xf32>, i32 -> vector<4x8x256xf32>
    %c6_20 = arith.constant 6 : index
    %c0_21 = arith.constant 0 : index
    %57 = vector.load %arg2[%c6_20, %c0_21] : memref<9x256xf32, #tpu.memory_space<vmem>>, vector<1x256xf32>
    %58 = vector.shape_cast %57 : vector<1x256xf32> to vector<1x1x256xf32>
    %59 = vector.broadcast %58 : vector<1x1x256xf32> to vector<4x8x256xf32>
    %60 = arith.mulf %56, %59 : vector<4x8x256xf32>
    %61 = vector.shape_cast %55 : vector<8x1xf32> to vector<1x8x1xf32>
    %62 = vector.broadcast %61 : vector<1x8x1xf32> to vector<4x8x256xf32>
    %63 = arith.mulf %60, %62 : vector<4x8x256xf32>
    %64 = arith.addf %54, %63 : vector<4x8x256xf32>
    %c0_22 = arith.constant 0 : index
    %c7 = arith.constant 7 : index
    %65 = vector.load %arg3[%c0_22, %c7] : memref<8x9xf32, #tpu.memory_space<vmem>>, vector<8x1xf32>
    %c224_i32 = arith.constant 224 : i32
    %66 = tpu.dynamic_rotate %0 by %c224_i32 dim 2 : vector<4x8x256xf32>, i32 -> vector<4x8x256xf32>
    %c7_23 = arith.constant 7 : index
    %c0_24 = arith.constant 0 : index
    %67 = vector.load %arg2[%c7_23, %c0_24] : memref<9x256xf32, #tpu.memory_space<vmem>>, vector<1x256xf32>
    %68 = vector.shape_cast %67 : vector<1x256xf32> to vector<1x1x256xf32>
    %69 = vector.broadcast %68 : vector<1x1x256xf32> to vector<4x8x256xf32>
    %70 = arith.mulf %66, %69 : vector<4x8x256xf32>
    %71 = vector.shape_cast %65 : vector<8x1xf32> to vector<1x8x1xf32>
    %72 = vector.broadcast %71 : vector<1x8x1xf32> to vector<4x8x256xf32>
    %73 = arith.mulf %70, %72 : vector<4x8x256xf32>
    %74 = arith.addf %64, %73 : vector<4x8x256xf32>
    %c0_25 = arith.constant 0 : index
    %c8 = arith.constant 8 : index
    %75 = vector.load %arg3[%c0_25, %c8] : memref<8x9xf32, #tpu.memory_space<vmem>>, vector<8x1xf32>
    %c222_i32 = arith.constant 222 : i32
    %76 = tpu.dynamic_rotate %0 by %c222_i32 dim 2 : vector<4x8x256xf32>, i32 -> vector<4x8x256xf32>
    %c8_26 = arith.constant 8 : index
    %c0_27 = arith.constant 0 : index
    %77 = vector.load %arg2[%c8_26, %c0_27] : memref<9x256xf32, #tpu.memory_space<vmem>>, vector<1x256xf32>
    %78 = vector.shape_cast %77 : vector<1x256xf32> to vector<1x1x256xf32>
    %79 = vector.broadcast %78 : vector<1x1x256xf32> to vector<4x8x256xf32>
    %80 = arith.mulf %76, %79 : vector<4x8x256xf32>
    %81 = vector.shape_cast %75 : vector<8x1xf32> to vector<1x8x1xf32>
    %82 = vector.broadcast %81 : vector<1x8x1xf32> to vector<4x8x256xf32>
    %83 = arith.mulf %80, %82 : vector<4x8x256xf32>
    %84 = arith.addf %74, %83 : vector<4x8x256xf32>
    %c0_28 = arith.constant 0 : index
    %c0_29 = arith.constant 0 : index
    %85 = vector.load %arg4[%c0_28, %c0_29] : memref<8x1xf32, #tpu.memory_space<vmem>>, vector<8x1xf32>
    %86 = vector.shape_cast %85 : vector<8x1xf32> to vector<1x8x1xf32>
    %87 = vector.broadcast %86 : vector<1x8x1xf32> to vector<4x8x256xf32>
    %88 = arith.addf %84, %87 : vector<4x8x256xf32>
    %cst = arith.constant dense<0.000000e+00> : vector<4x8xf32>
    %89 = vector.multi_reduction <add>, %88, %cst [2] : vector<4x8x256xf32> to vector<4x8xf32>
    %90 = vector.shape_cast %89 : vector<4x8xf32> to vector<4x8x1xf32>
    %cst_30 = arith.constant dense<0.000000e+00> : vector<8x1xf32>
    %91 = vector.multi_reduction <add>, %90, %cst_30 [0] : vector<4x8x1xf32> to vector<8x1xf32>
    %c0_31 = arith.constant 0 : index
    %c0_32 = arith.constant 0 : index
    %c0_33 = arith.constant 0 : index
    %92 = vector.load %arg5[%c0_31, %c0_32, %c0_33] : memref<1x8x2xf32, #tpu.memory_space<vmem>>, vector<1x8x1xf32>
    %93 = vector.shape_cast %92 : vector<1x8x1xf32> to vector<8x1xf32>
    %94 = vector.shape_cast %91 : vector<8x1xf32> to vector<1x8x1xf32>
    tpu.vector_store %arg5[%c0_31, %c0_32, %c0_33], %94 {strides = array<i32>} : memref<1x8x2xf32, #tpu.memory_space<vmem>>, vector<1x8x1xf32>,
    %95 = arith.mulf %88, %88 : vector<4x8x256xf32>
    %cst_34 = arith.constant dense<0.000000e+00> : vector<4x8xf32>
    %96 = vector.multi_reduction <add>, %95, %cst_34 [2] : vector<4x8x256xf32> to vector<4x8xf32>
    %97 = vector.shape_cast %96 : vector<4x8xf32> to vector<4x8x1xf32>
    %cst_35 = arith.constant dense<0.000000e+00> : vector<8x1xf32>
    %98 = vector.multi_reduction <add>, %97, %cst_35 [0] : vector<4x8x1xf32> to vector<8x1xf32>
    %c0_36 = arith.constant 0 : index
    %c0_37 = arith.constant 0 : index
    %c1_38 = arith.constant 1 : index
    %99 = vector.load %arg5[%c0_36, %c0_37, %c1_38] : memref<1x8x2xf32, #tpu.memory_space<vmem>>, vector<1x8x1xf32>
    %100 = vector.shape_cast %99 : vector<1x8x1xf32> to vector<8x1xf32>
    %101 = vector.shape_cast %98 : vector<8x1xf32> to vector<1x8x1xf32>
    tpu.vector_store %arg5[%c0_36, %c0_37, %c1_38], %101 {strides = array<i32>} : memref<1x8x2xf32, #tpu.memory_space<vmem>>, vector<1x8x1xf32>,
    return
  }
  func.func @transform_0(%arg0: i32) -> (i32, i32, i32) {
    %c0_i32 = arith.constant 0 : i32
    %c0_i32_0 = arith.constant 0 : i32
    %c0_i32_1 = arith.constant 0 : i32
    return %arg0, %c0_i32, %c0_i32_0 : i32, i32, i32
  }
  func.func @transform_1(%arg0: i32) -> (i32, i32) {
    %c0_i32 = arith.constant 0 : i32
    %c0_i32_0 = arith.constant 0 : i32
    %c0_i32_1 = arith.constant 0 : i32
    return %c0_i32, %c0_i32_0 : i32, i32
  }
  func.func @transform_2(%arg0: i32) -> (i32, i32) {
    %c0_i32 = arith.constant 0 : i32
    %c0_i32_0 = arith.constant 0 : i32
    %c0_i32_1 = arith.constant 0 : i32
    return %c0_i32, %c0_i32_0 : i32, i32
  }
  func.func @transform_3(%arg0: i32) -> (i32, i32) {
    %c0_i32 = arith.constant 0 : i32
    %c0_i32_0 = arith.constant 0 : i32
    %c0_i32_1 = arith.constant 0 : i32
    return %c0_i32, %c0_i32_0 : i32, i32
  }
  func.func @transform_4(%arg0: i32) -> (i32, i32, i32) {
    %c0_i32 = arith.constant 0 : i32
    %c0_i32_0 = arith.constant 0 : i32
    %c0_i32_1 = arith.constant 0 : i32
    return %arg0, %c0_i32, %c0_i32_0 : i32, i32, i32
  }
}

module attributes {stable_mosaic.version = 11 : i64} {
  func.func @_output_kernel(%arg0: i32, %arg1: memref<4x8x256xf32, #tpu.memory_space<vmem>>, %arg2: memref<9x256xf32, #tpu.memory_space<vmem>>, %arg3: memref<8x9xf32, #tpu.memory_space<vmem>>, %arg4: memref<8x1xf32, #tpu.memory_space<vmem>>, %arg5: memref<16x8xf32, #tpu.memory_space<vmem>>, %arg6: memref<16x1xf32, #tpu.memory_space<vmem>>, %arg7: memref<4x16x256xf32, #tpu.memory_space<vmem>>) attributes {dimension_semantics = [#tpu.dimension_semantics<parallel>], iteration_bounds = array<i64: 2>, scalar_prefetch = 0 : i64, scratch_operands = 0 : i64, tpu.core_type = #tpu.core_type<tc>, window_params = [{transform_indices = @transform_0, window_bounds = array<i64: 4, 8, 256>}, {pipeline_mode = #tpu.pipeline_mode<synchronous>, transform_indices = @transform_1, window_bounds = array<i64: 9, 256>}, {pipeline_mode = #tpu.pipeline_mode<synchronous>, transform_indices = @transform_2, window_bounds = array<i64: 8, 9>}, {pipeline_mode = #tpu.pipeline_mode<synchronous>, transform_indices = @transform_3, window_bounds = array<i64: 8, 1>}, {pipeline_mode = #tpu.pipeline_mode<synchronous>, transform_indices = @transform_4, window_bounds = array<i64: 16, 8>}, {pipeline_mode = #tpu.pipeline_mode<synchronous>, transform_indices = @transform_5, window_bounds = array<i64: 16, 1>}, {transform_indices = @transform_6, window_bounds = array<i64: 4, 16, 256>}]} {
    %c0 = arith.constant 0 : index
    %c0_0 = arith.constant 0 : index
    %c0_1 = arith.constant 0 : index
    %0 = vector.load %arg1[%c0, %c0_0, %c0_1] : memref<4x8x256xf32, #tpu.memory_space<vmem>>, vector<4x8x256xf32>
    %c0_2 = arith.constant 0 : index
    %c0_3 = arith.constant 0 : index
    %1 = vector.load %arg3[%c0_2, %c0_3] : memref<8x9xf32, #tpu.memory_space<vmem>>, vector<8x1xf32>
    %c34_i32 = arith.constant 34 : i32
    %2 = tpu.dynamic_rotate %0 by %c34_i32 dim 2 : vector<4x8x256xf32>, i32 -> vector<4x8x256xf32>
    %c0_4 = arith.constant 0 : index
    %c0_5 = arith.constant 0 : index
    %3 = vector.load %arg2[%c0_4, %c0_5] : memref<9x256xf32, #tpu.memory_space<vmem>>, vector<1x256xf32>
    %4 = vector.shape_cast %3 : vector<1x256xf32> to vector<1x1x256xf32>
    %5 = vector.broadcast %4 : vector<1x1x256xf32> to vector<4x8x256xf32>
    %6 = arith.mulf %2, %5 : vector<4x8x256xf32>
    %7 = vector.shape_cast %1 : vector<8x1xf32> to vector<1x8x1xf32>
    %8 = vector.broadcast %7 : vector<1x8x1xf32> to vector<4x8x256xf32>
    %9 = arith.mulf %6, %8 : vector<4x8x256xf32>
    %c0_6 = arith.constant 0 : index
    %c1 = arith.constant 1 : index
    %10 = vector.load %arg3[%c0_6, %c1] : memref<8x9xf32, #tpu.memory_space<vmem>>, vector<8x1xf32>
    %c32_i32 = arith.constant 32 : i32
    %11 = tpu.dynamic_rotate %0 by %c32_i32 dim 2 : vector<4x8x256xf32>, i32 -> vector<4x8x256xf32>
    %c1_7 = arith.constant 1 : index
    %c0_8 = arith.constant 0 : index
    %12 = vector.load %arg2[%c1_7, %c0_8] : memref<9x256xf32, #tpu.memory_space<vmem>>, vector<1x256xf32>
    %13 = vector.shape_cast %12 : vector<1x256xf32> to vector<1x1x256xf32>
    %14 = vector.broadcast %13 : vector<1x1x256xf32> to vector<4x8x256xf32>
    %15 = arith.mulf %11, %14 : vector<4x8x256xf32>
    %16 = vector.shape_cast %10 : vector<8x1xf32> to vector<1x8x1xf32>
    %17 = vector.broadcast %16 : vector<1x8x1xf32> to vector<4x8x256xf32>
    %18 = arith.mulf %15, %17 : vector<4x8x256xf32>
    %19 = arith.addf %9, %18 : vector<4x8x256xf32>
    %c0_9 = arith.constant 0 : index
    %c2 = arith.constant 2 : index
    %20 = vector.load %arg3[%c0_9, %c2] : memref<8x9xf32, #tpu.memory_space<vmem>>, vector<8x1xf32>
    %c30_i32 = arith.constant 30 : i32
    %21 = tpu.dynamic_rotate %0 by %c30_i32 dim 2 : vector<4x8x256xf32>, i32 -> vector<4x8x256xf32>
    %c2_10 = arith.constant 2 : index
    %c0_11 = arith.constant 0 : index
    %22 = vector.load %arg2[%c2_10, %c0_11] : memref<9x256xf32, #tpu.memory_space<vmem>>, vector<1x256xf32>
    %23 = vector.shape_cast %22 : vector<1x256xf32> to vector<1x1x256xf32>
    %24 = vector.broadcast %23 : vector<1x1x256xf32> to vector<4x8x256xf32>
    %25 = arith.mulf %21, %24 : vector<4x8x256xf32>
    %26 = vector.shape_cast %20 : vector<8x1xf32> to vector<1x8x1xf32>
    %27 = vector.broadcast %26 : vector<1x8x1xf32> to vector<4x8x256xf32>
    %28 = arith.mulf %25, %27 : vector<4x8x256xf32>
    %29 = arith.addf %19, %28 : vector<4x8x256xf32>
    %c0_12 = arith.constant 0 : index
    %c3 = arith.constant 3 : index
    %30 = vector.load %arg3[%c0_12, %c3] : memref<8x9xf32, #tpu.memory_space<vmem>>, vector<8x1xf32>
    %c2_i32 = arith.constant 2 : i32
    %31 = tpu.dynamic_rotate %0 by %c2_i32 dim 2 : vector<4x8x256xf32>, i32 -> vector<4x8x256xf32>
    %c3_13 = arith.constant 3 : index
    %c0_14 = arith.constant 0 : index
    %32 = vector.load %arg2[%c3_13, %c0_14] : memref<9x256xf32, #tpu.memory_space<vmem>>, vector<1x256xf32>
    %33 = vector.shape_cast %32 : vector<1x256xf32> to vector<1x1x256xf32>
    %34 = vector.broadcast %33 : vector<1x1x256xf32> to vector<4x8x256xf32>
    %35 = arith.mulf %31, %34 : vector<4x8x256xf32>
    %36 = vector.shape_cast %30 : vector<8x1xf32> to vector<1x8x1xf32>
    %37 = vector.broadcast %36 : vector<1x8x1xf32> to vector<4x8x256xf32>
    %38 = arith.mulf %35, %37 : vector<4x8x256xf32>
    %39 = arith.addf %29, %38 : vector<4x8x256xf32>
    %c0_15 = arith.constant 0 : index
    %c4 = arith.constant 4 : index
    %40 = vector.load %arg3[%c0_15, %c4] : memref<8x9xf32, #tpu.memory_space<vmem>>, vector<8x1xf32>
    %41 = vector.shape_cast %40 : vector<8x1xf32> to vector<1x8x1xf32>
    %42 = vector.broadcast %41 : vector<1x8x1xf32> to vector<4x8x256xf32>
    %43 = arith.mulf %0, %42 : vector<4x8x256xf32>
    %44 = arith.addf %39, %43 : vector<4x8x256xf32>
    %c0_16 = arith.constant 0 : index
    %c5 = arith.constant 5 : index
    %45 = vector.load %arg3[%c0_16, %c5] : memref<8x9xf32, #tpu.memory_space<vmem>>, vector<8x1xf32>
    %c254_i32 = arith.constant 254 : i32
    %46 = tpu.dynamic_rotate %0 by %c254_i32 dim 2 : vector<4x8x256xf32>, i32 -> vector<4x8x256xf32>
    %c5_17 = arith.constant 5 : index
    %c0_18 = arith.constant 0 : index
    %47 = vector.load %arg2[%c5_17, %c0_18] : memref<9x256xf32, #tpu.memory_space<vmem>>, vector<1x256xf32>
    %48 = vector.shape_cast %47 : vector<1x256xf32> to vector<1x1x256xf32>
    %49 = vector.broadcast %48 : vector<1x1x256xf32> to vector<4x8x256xf32>
    %50 = arith.mulf %46, %49 : vector<4x8x256xf32>
    %51 = vector.shape_cast %45 : vector<8x1xf32> to vector<1x8x1xf32>
    %52 = vector.broadcast %51 : vector<1x8x1xf32> to vector<4x8x256xf32>
    %53 = arith.mulf %50, %52 : vector<4x8x256xf32>
    %54 = arith.addf %44, %53 : vector<4x8x256xf32>
    %c0_19 = arith.constant 0 : index
    %c6 = arith.constant 6 : index
    %55 = vector.load %arg3[%c0_19, %c6] : memref<8x9xf32, #tpu.memory_space<vmem>>, vector<8x1xf32>
    %c226_i32 = arith.constant 226 : i32
    %56 = tpu.dynamic_rotate %0 by %c226_i32 dim 2 : vector<4x8x256xf32>, i32 -> vector<4x8x256xf32>
    %c6_20 = arith.constant 6 : index
    %c0_21 = arith.constant 0 : index
    %57 = vector.load %arg2[%c6_20, %c0_21] : memref<9x256xf32, #tpu.memory_space<vmem>>, vector<1x256xf32>
    %58 = vector.shape_cast %57 : vector<1x256xf32> to vector<1x1x256xf32>
    %59 = vector.broadcast %58 : vector<1x1x256xf32> to vector<4x8x256xf32>
    %60 = arith.mulf %56, %59 : vector<4x8x256xf32>
    %61 = vector.shape_cast %55 : vector<8x1xf32> to vector<1x8x1xf32>
    %62 = vector.broadcast %61 : vector<1x8x1xf32> to vector<4x8x256xf32>
    %63 = arith.mulf %60, %62 : vector<4x8x256xf32>
    %64 = arith.addf %54, %63 : vector<4x8x256xf32>
    %c0_22 = arith.constant 0 : index
    %c7 = arith.constant 7 : index
    %65 = vector.load %arg3[%c0_22, %c7] : memref<8x9xf32, #tpu.memory_space<vmem>>, vector<8x1xf32>
    %c224_i32 = arith.constant 224 : i32
    %66 = tpu.dynamic_rotate %0 by %c224_i32 dim 2 : vector<4x8x256xf32>, i32 -> vector<4x8x256xf32>
    %c7_23 = arith.constant 7 : index
    %c0_24 = arith.constant 0 : index
    %67 = vector.load %arg2[%c7_23, %c0_24] : memref<9x256xf32, #tpu.memory_space<vmem>>, vector<1x256xf32>
    %68 = vector.shape_cast %67 : vector<1x256xf32> to vector<1x1x256xf32>
    %69 = vector.broadcast %68 : vector<1x1x256xf32> to vector<4x8x256xf32>
    %70 = arith.mulf %66, %69 : vector<4x8x256xf32>
    %71 = vector.shape_cast %65 : vector<8x1xf32> to vector<1x8x1xf32>
    %72 = vector.broadcast %71 : vector<1x8x1xf32> to vector<4x8x256xf32>
    %73 = arith.mulf %70, %72 : vector<4x8x256xf32>
    %74 = arith.addf %64, %73 : vector<4x8x256xf32>
    %c0_25 = arith.constant 0 : index
    %c8 = arith.constant 8 : index
    %75 = vector.load %arg3[%c0_25, %c8] : memref<8x9xf32, #tpu.memory_space<vmem>>, vector<8x1xf32>
    %c222_i32 = arith.constant 222 : i32
    %76 = tpu.dynamic_rotate %0 by %c222_i32 dim 2 : vector<4x8x256xf32>, i32 -> vector<4x8x256xf32>
    %c8_26 = arith.constant 8 : index
    %c0_27 = arith.constant 0 : index
    %77 = vector.load %arg2[%c8_26, %c0_27] : memref<9x256xf32, #tpu.memory_space<vmem>>, vector<1x256xf32>
    %78 = vector.shape_cast %77 : vector<1x256xf32> to vector<1x1x256xf32>
    %79 = vector.broadcast %78 : vector<1x1x256xf32> to vector<4x8x256xf32>
    %80 = arith.mulf %76, %79 : vector<4x8x256xf32>
    %81 = vector.shape_cast %75 : vector<8x1xf32> to vector<1x8x1xf32>
    %82 = vector.broadcast %81 : vector<1x8x1xf32> to vector<4x8x256xf32>
    %83 = arith.mulf %80, %82 : vector<4x8x256xf32>
    %84 = arith.addf %74, %83 : vector<4x8x256xf32>
    %c0_28 = arith.constant 0 : index
    %c0_29 = arith.constant 0 : index
    %85 = vector.load %arg4[%c0_28, %c0_29] : memref<8x1xf32, #tpu.memory_space<vmem>>, vector<8x1xf32>
    %86 = vector.shape_cast %85 : vector<8x1xf32> to vector<1x8x1xf32>
    %87 = vector.broadcast %86 : vector<1x8x1xf32> to vector<4x8x256xf32>
    %88 = arith.addf %84, %87 : vector<4x8x256xf32>
    %cst = arith.constant 0.000000e+00 : f32
    %89 = vector.broadcast %cst : f32 to vector<4x8x256xf32>
    %90 = arith.maximumf %88, %89 : vector<4x8x256xf32>
    %c0_30 = arith.constant 0 : index
    %c0_31 = arith.constant 0 : index
    %91 = vector.load %arg5[%c0_30, %c0_31] : memref<16x8xf32, #tpu.memory_space<vmem>>, vector<16x8xf32>
    %c0_32 = arith.constant 0 : index
    %c0_33 = arith.constant 0 : index
    %92 = vector.load %arg6[%c0_32, %c0_33] : memref<16x1xf32, #tpu.memory_space<vmem>>, vector<16x1xf32>
    %93 = vector.extract_strided_slice %90 {offsets = [0, 0, 0], sizes = [1, 8, 256], strides = [1, 1, 1]} : vector<4x8x256xf32> to vector<1x8x256xf32>
    %94 = vector.shape_cast %93 : vector<1x8x256xf32> to vector<8x256xf32>
    %cst_34 = arith.constant dense<0.000000e+00> : vector<16x256xf32>
    %95 = tpu.matmul %91, %94, %cst_34 {dimension_numbers = #tpu.dot_dimension_numbers<[1], [0], [0], [1], [0, 0, 1, 1], [], []>} : vector<16x8xf32>, vector<8x256xf32>, vector<16x256xf32> -> vector<16x256xf32>
    %96 = vector.broadcast %92 : vector<16x1xf32> to vector<16x256xf32>
    %97 = arith.addf %95, %96 : vector<16x256xf32>
    %cst_35 = arith.constant 0.000000e+00 : f32
    %98 = vector.broadcast %cst_35 : f32 to vector<16x256xf32>
    %99 = arith.maximumf %97, %98 : vector<16x256xf32>
    %c0_36 = arith.constant 0 : index
    %c0_37 = arith.constant 0 : index
    %c0_38 = arith.constant 0 : index
    %100 = vector.load %arg7[%c0_36, %c0_37, %c0_38] : memref<4x16x256xf32, #tpu.memory_space<vmem>>, vector<1x16x256xf32>
    %101 = vector.shape_cast %100 : vector<1x16x256xf32> to vector<16x256xf32>
    %102 = vector.shape_cast %99 : vector<16x256xf32> to vector<1x16x256xf32>
    tpu.vector_store %arg7[%c0_36, %c0_37, %c0_38], %102 {strides = array<i32>} : memref<4x16x256xf32, #tpu.memory_space<vmem>>, vector<1x16x256xf32>,
    %103 = vector.extract_strided_slice %90 {offsets = [1, 0, 0], sizes = [1, 8, 256], strides = [1, 1, 1]} : vector<4x8x256xf32> to vector<1x8x256xf32>
    %104 = vector.shape_cast %103 : vector<1x8x256xf32> to vector<8x256xf32>
    %cst_39 = arith.constant dense<0.000000e+00> : vector<16x256xf32>
    %105 = tpu.matmul %91, %104, %cst_39 {dimension_numbers = #tpu.dot_dimension_numbers<[1], [0], [0], [1], [0, 0, 1, 1], [], []>} : vector<16x8xf32>, vector<8x256xf32>, vector<16x256xf32> -> vector<16x256xf32>
    %106 = vector.broadcast %92 : vector<16x1xf32> to vector<16x256xf32>
    %107 = arith.addf %105, %106 : vector<16x256xf32>
    %cst_40 = arith.constant 0.000000e+00 : f32
    %108 = vector.broadcast %cst_40 : f32 to vector<16x256xf32>
    %109 = arith.maximumf %107, %108 : vector<16x256xf32>
    %c1_41 = arith.constant 1 : index
    %c0_42 = arith.constant 0 : index
    %c0_43 = arith.constant 0 : index
    %110 = vector.load %arg7[%c1_41, %c0_42, %c0_43] : memref<4x16x256xf32, #tpu.memory_space<vmem>>, vector<1x16x256xf32>
    %111 = vector.shape_cast %110 : vector<1x16x256xf32> to vector<16x256xf32>
    %112 = vector.shape_cast %109 : vector<16x256xf32> to vector<1x16x256xf32>
    tpu.vector_store %arg7[%c1_41, %c0_42, %c0_43], %112 {strides = array<i32>} : memref<4x16x256xf32, #tpu.memory_space<vmem>>, vector<1x16x256xf32>,
    %113 = vector.extract_strided_slice %90 {offsets = [2, 0, 0], sizes = [1, 8, 256], strides = [1, 1, 1]} : vector<4x8x256xf32> to vector<1x8x256xf32>
    %114 = vector.shape_cast %113 : vector<1x8x256xf32> to vector<8x256xf32>
    %cst_44 = arith.constant dense<0.000000e+00> : vector<16x256xf32>
    %115 = tpu.matmul %91, %114, %cst_44 {dimension_numbers = #tpu.dot_dimension_numbers<[1], [0], [0], [1], [0, 0, 1, 1], [], []>} : vector<16x8xf32>, vector<8x256xf32>, vector<16x256xf32> -> vector<16x256xf32>
    %116 = vector.broadcast %92 : vector<16x1xf32> to vector<16x256xf32>
    %117 = arith.addf %115, %116 : vector<16x256xf32>
    %cst_45 = arith.constant 0.000000e+00 : f32
    %118 = vector.broadcast %cst_45 : f32 to vector<16x256xf32>
    %119 = arith.maximumf %117, %118 : vector<16x256xf32>
    %c2_46 = arith.constant 2 : index
    %c0_47 = arith.constant 0 : index
    %c0_48 = arith.constant 0 : index
    %120 = vector.load %arg7[%c2_46, %c0_47, %c0_48] : memref<4x16x256xf32, #tpu.memory_space<vmem>>, vector<1x16x256xf32>
    %121 = vector.shape_cast %120 : vector<1x16x256xf32> to vector<16x256xf32>
    %122 = vector.shape_cast %119 : vector<16x256xf32> to vector<1x16x256xf32>
    tpu.vector_store %arg7[%c2_46, %c0_47, %c0_48], %122 {strides = array<i32>} : memref<4x16x256xf32, #tpu.memory_space<vmem>>, vector<1x16x256xf32>,
    %123 = vector.extract_strided_slice %90 {offsets = [3, 0, 0], sizes = [1, 8, 256], strides = [1, 1, 1]} : vector<4x8x256xf32> to vector<1x8x256xf32>
    %124 = vector.shape_cast %123 : vector<1x8x256xf32> to vector<8x256xf32>
    %cst_49 = arith.constant dense<0.000000e+00> : vector<16x256xf32>
    %125 = tpu.matmul %91, %124, %cst_49 {dimension_numbers = #tpu.dot_dimension_numbers<[1], [0], [0], [1], [0, 0, 1, 1], [], []>} : vector<16x8xf32>, vector<8x256xf32>, vector<16x256xf32> -> vector<16x256xf32>
    %126 = vector.broadcast %92 : vector<16x1xf32> to vector<16x256xf32>
    %127 = arith.addf %125, %126 : vector<16x256xf32>
    %cst_50 = arith.constant 0.000000e+00 : f32
    %128 = vector.broadcast %cst_50 : f32 to vector<16x256xf32>
    %129 = arith.maximumf %127, %128 : vector<16x256xf32>
    %c3_51 = arith.constant 3 : index
    %c0_52 = arith.constant 0 : index
    %c0_53 = arith.constant 0 : index
    %130 = vector.load %arg7[%c3_51, %c0_52, %c0_53] : memref<4x16x256xf32, #tpu.memory_space<vmem>>, vector<1x16x256xf32>
    %131 = vector.shape_cast %130 : vector<1x16x256xf32> to vector<16x256xf32>
    %132 = vector.shape_cast %129 : vector<16x256xf32> to vector<1x16x256xf32>
    tpu.vector_store %arg7[%c3_51, %c0_52, %c0_53], %132 {strides = array<i32>} : memref<4x16x256xf32, #tpu.memory_space<vmem>>, vector<1x16x256xf32>,
    return
  }
  func.func @transform_0(%arg0: i32) -> (i32, i32, i32) {
    %c0_i32 = arith.constant 0 : i32
    %c0_i32_0 = arith.constant 0 : i32
    %c0_i32_1 = arith.constant 0 : i32
    return %arg0, %c0_i32, %c0_i32_0 : i32, i32, i32
  }
  func.func @transform_1(%arg0: i32) -> (i32, i32) {
    %c0_i32 = arith.constant 0 : i32
    %c0_i32_0 = arith.constant 0 : i32
    %c0_i32_1 = arith.constant 0 : i32
    return %c0_i32, %c0_i32_0 : i32, i32
  }
  func.func @transform_2(%arg0: i32) -> (i32, i32) {
    %c0_i32 = arith.constant 0 : i32
    %c0_i32_0 = arith.constant 0 : i32
    %c0_i32_1 = arith.constant 0 : i32
    return %c0_i32, %c0_i32_0 : i32, i32
  }
  func.func @transform_3(%arg0: i32) -> (i32, i32) {
    %c0_i32 = arith.constant 0 : i32
    %c0_i32_0 = arith.constant 0 : i32
    %c0_i32_1 = arith.constant 0 : i32
    return %c0_i32, %c0_i32_0 : i32, i32
  }
  func.func @transform_4(%arg0: i32) -> (i32, i32) {
    %c0_i32 = arith.constant 0 : i32
    %c0_i32_0 = arith.constant 0 : i32
    %c0_i32_1 = arith.constant 0 : i32
    return %c0_i32, %c0_i32_0 : i32, i32
  }
  func.func @transform_5(%arg0: i32) -> (i32, i32) {
    %c0_i32 = arith.constant 0 : i32
    %c0_i32_0 = arith.constant 0 : i32
    %c0_i32_1 = arith.constant 0 : i32
    return %c0_i32, %c0_i32_0 : i32, i32
  }
  func.func @transform_6(%arg0: i32) -> (i32, i32, i32) {
    %c0_i32 = arith.constant 0 : i32
    %c0_i32_0 = arith.constant 0 : i32
    %c0_i32_1 = arith.constant 0 : i32
    return %arg0, %c0_i32, %c0_i32_0 : i32, i32, i32
  }
}

</mosaic_0001>

<bundles_post_ra>
// kernel: dilated_ir_block.3
= control target key start
LH: loop header
LB: loop body
LE: loop exit
PB: predicated region body
PF: predicated region fallthrough
CT: control target
= control target key end

     0   :  { %s964_s15 = smov 0   ;;  %s1578_s0 = inlined_call_operand.vmem [shape: f32[8,8,256], index: 0, kind: input, shape index: {}]   ;;  %s1579_s1 = inlined_call_operand.vmem [shape: f32[9,256], index: 1, kind: input, shape index: {}]   ;;  %s1580_s2 = inlined_call_operand.vmem [shape: f32[8,9], index: 2, kind: input, shape index: {}]   ;;  %s1581_s3 = inlined_call_operand.vmem [shape: f32[8,1], index: 3, kind: input, shape index: {}]   ;;  %s1582_s4 = inlined_call_operand.vmem [shape: f32[2,8,2], index: 4, kind: output, shape index: {}]  }
   0x1 LB: > { %s970_s16 = sadd.s32 4294967295, %s920_s15   ;;  %p865_p0 = scmp.ge.s32.totalorder %s920_s15, 1  ;;  %s920_s15 = sphi %s964_s15, %s14_s15  }
   0x2   : > { %p164_p1 = scmp.lt.s32.totalorder %s920_s15, 3 }
   0x4   : > { %p165_p2 = pnand %p865_p0, %p164_p1 }
   0x6   : > { %168 = sbr.rel (%p165_p2) target bundleno = 464 (0x1d0), region = 36 }
   0xd   : > { %s866_s17 = sshll.u32 %s970_s16, 2  ;;  %v922_v0 = vmov 1   ;;  %v923_v1 = vmov 2   ;;  %s924_s22 = smov 34   ;;  %v209_v10 = vld [vmem:[%s1580_s2] sm:$0xff]  ;;  %v926_v11 = vmov 6   ;;  %v226_v20 = vlaneseq }
   0xe   : > { %p191_p3 = scmp.lt.s32.totalorder %s866_s17, 7  ;;  %905 = vset.pattern.permute.xlu0 %v922_v0  ;;  %906 = vset.pattern.permute.xlu1 %v923_v1  ;;  %s925_s23 = smov 32   ;;  %v928_v12 = vmov 3   ;;  %v929_v13 = vmov 4   ;;  %v931_v14 = vmov 5   ;;  %v933_v15 = vmov 7  }
   0xf   : > { %s927_s26 = smov 30   ;;  %s930_s27 = smov 2   ;;  %v935_v16 = vmov 8   ;;  %v936_v17 = vmov 0   ;;  %v1063_v21 = vand.u32 127, %v226_v20  ;;  %v752_v26 = vld [vmem:[%s1581_s3] sm:$0xff] }
  0x10   : > { %s1610_s17 = smov (!%p191_p3, %s866_s17), 7  ;;  %s932_s28 = smov 126   ;;  %v240_v44 = vshrl.u32 %v226_v20, 7  ;;  %v870_v46 = vld [vmem:[%s1579_s1 + $0x1] ss:$8 sm:$0x3] }
  0x11   : > { %s879_s18 = sshll.u32 %s1610_s17, 4  ;;  %s934_s29 = smov 98   ;;  %vm228_vm0 = vcmp.lt.s32.totalorder %v1063_v21, 34  ;;  %vm286_vm1 = vcmp.lt.s32.totalorder %v1063_v21, 32  ;;  %vm352_vm2 = vcmp.lt.s32.totalorder %v1063_v21, 30  ;;  %vm418_vm3 = vcmp.lt.s32.totalorder %v1063_v21, 2 }
  0x12   : > { %s195_s21 = scalar_lea.vmem %s1578_s0, %s879_s18  ;;  %s937_s30 = smov 96   ;;  %v1135_v49 = vsub.s32 0, %v240_v44  ;;  %v1137_v50 = vsub.s32 1, %v240_v44  ;;  %vm504_vm4 = vcmp.lt.s32.totalorder %v1063_v21, 126  ;;  %vm570_vm5 = vcmp.lt.s32.totalorder %v1063_v21, 98 }
  0x13   : > { %v978_v2 = vld [vmem:[%s195_s21 + $0x20] sm:$0xff]  ;;  %v984_v4 = vld [vmem:[%s195_s21 + $0x30] sm:$0xff]  ;;  %v990_v6 = vld [vmem:[%s195_s21 + $0x18] sm:$0xff]  ;;  %s938_s5 = smov 94   ;;  %vm636_vm6 = vcmp.lt.s32.totalorder %v1063_v21, 96  ;;  %vm702_vm7 = vcmp.lt.s32.totalorder %v1063_v21, 94 }
  0x14   : > { %v980_v3 = vld [vmem:[%s195_s21] sm:$0xff]  ;;  %214 = vrot.lane.b32.xlu1 %v978_v2, %s924_s22  ;;  %v986_v5 = vld [vmem:[%s195_s21 + $0x10] sm:$0xff]  ;;  %v992_v7 = vld [vmem:[%s195_s21 + $0x8] sm:$0xff]  ;;  %1593 = vst [vmem:[#allocation2_spill] sm:$0xff] %v1135_v49  ;;  %v301_v51 = vrot.slane %v870_v46, %v1135_v49  ;;  %v305_v52 = vrot.slane %v870_v46, %v1137_v50  ;;  %p197_p4 = scmp.lt.s32.totalorder %s970_s16, 1  ;;  %vm781_vm8 = vcmask 7168  }
  0x15   : > { %210 = vrot.lane.b32.xlu0 %v980_v3, %s924_s22  ;;  %v996_v8 = vld [vmem:[%s195_s21 + $0x38] sm:$0xff]  ;;  %v998_v9 = vld [vmem:[%s195_s21 + $0x28] sm:$0xff]  ;;  %1594 = vst [vmem:[#allocation3_spill] sm:$0xff] %v1137_v50  ;;  %vm806_vm9 = vcmask 15368  }
  0x16   : > { %s1612_s16 = smov (!%p197_p4, %s970_s16), 1 }
  0x18   : > { %216 = vrot.lane.b32.xlu1 %v984_v4, %s924_s22 }
  0x19   : > { %212 = vrot.lane.b32.xlu0 %v986_v5, %s924_s22 }
  0x1c   : > { %220 = vrot.lane.b32.xlu1 %v990_v6, %s924_s22 }
  0x1d   : > { %218 = vrot.lane.b32.xlu0 %v992_v7, %s924_s22 }
  0x20   : > { %224 = vrot.lane.b32.xlu1 %v996_v8, %s924_s22 }
  0x21   : > { %222 = vrot.lane.b32.xlu0 %v998_v9, %s924_s22 }
  0x24   : > { %270 = vrot.lane.b32.xlu1 %v980_v3, %s925_s23 }
  0x25   : > { %274 = vrot.lane.b32.xlu0 %v978_v2, %s925_s23 }
  0x28   : > { %272 = vrot.lane.b32.xlu1 %v986_v5, %s925_s23 }
  0x29   : > { %278 = vrot.lane.b32.xlu0 %v992_v7, %s925_s23 }
  0x2c   : > { %276 = vrot.lane.b32.xlu1 %v984_v4, %s925_s23 }
  0x2d   : > { %317 = vperm.xlu0 %905, %v209_v10  }
  0x30   : > { %280 = vrot.lane.b32.xlu1 %v990_v6, %s925_s23 }
  0x31   : > { %282 = vrot.lane.b32.xlu0 %v998_v9, %s925_s23 }
  0x32   : > { %910 = vset.pattern.permute.xlu0 %v926_v11  ;;  %v871_v11 = vld [vmem:[%s1579_s1 + $0x2] ss:$8 sm:$0x3] }
  0x34   : > { %383 = vperm.xlu1 %906, %v209_v10  }
  0x35   : > { %338 = vrot.lane.b32.xlu0 %v986_v5, %s927_s26 }
  0x38   : > { %907 = vset.pattern.permute.xlu1 %v928_v12 }
  0x39   : > { %346 = vrot.lane.b32.xlu0 %v990_v6, %s927_s26  ;;  %449 = vperm.xlu1 %907, %v209_v10  }
  0x3d   : > { %284 = vrot.lane.b32.xlu0 %v996_v8, %s925_s23  ;;  %336 = vrot.lane.b32.xlu1 %v980_v3, %s927_s26 }
  0x3e   : > { %908 = vset.pattern.permute.xlu1 %v929_v13 }
  0x41   : > { %348 = vrot.lane.b32.xlu0 %v998_v9, %s927_s26  ;;  %344 = vrot.lane.b32.xlu1 %v992_v7, %s927_s26 }
  0x45   : > { %404 = vrot.lane.b32.xlu0 %v986_v5, %s930_s27  ;;  %469 = vperm.xlu1 %908, %v209_v10  }
  0x49   : > { %412 = vrot.lane.b32.xlu0 %v990_v6, %s930_s27  ;;  %340 = vrot.lane.b32.xlu1 %v978_v2, %s927_s26 }
  0x4a   : > { %909 = vset.pattern.permute.xlu1 %v931_v14 }
  0x4d   : > { %342 = vrot.lane.b32.xlu0 %v984_v4, %s927_s26  ;;  %402 = vrot.lane.b32.xlu1 %v980_v3, %s930_s27 }
  0x51   : > { %406 = vrot.lane.b32.xlu0 %v978_v2, %s930_s27  ;;  %410 = vrot.lane.b32.xlu1 %v992_v7, %s930_s27 }
  0x55   : > { %601 = vperm.xlu0 %910, %v209_v10   ;;  %535 = vperm.xlu1 %909, %v209_v10  }
  0x59   : > { %488 = vrot.lane.b32.xlu0 %v980_v3, %s932_s28  ;;  %350 = vrot.lane.b32.xlu1 %v996_v8, %s927_s26  ;;  %s869_s26 = sshll.u32 %s1612_s16, 3 }
  0x5a   : > { %911 = vset.pattern.permute.xlu0 %v933_v15 }
  0x5d   : > { %496 = vrot.lane.b32.xlu0 %v992_v7, %s932_s28  ;;  %414 = vrot.lane.b32.xlu1 %v998_v9, %s930_s27 }
  0x61   : > { %667 = vperm.xlu0 %911, %v209_v10   ;;  %408 = vrot.lane.b32.xlu1 %v984_v4, %s930_s27 }
  0x65   : > { %554 = vrot.lane.b32.xlu0 %v980_v3, %s934_s29  ;;  %416 = vrot.lane.b32.xlu1 %v996_v8, %s930_s27 }
  0x66   : > { %912 = vset.pattern.permute.xlu0 %v935_v16  ;;  %v367_v16 = vrot.slane %v871_v11, %v1135_v49 }
  0x69   : > { %562 = vrot.lane.b32.xlu0 %v992_v7, %s934_s29  ;;  %490 = vrot.lane.b32.xlu1 %v986_v5, %s932_s28 }
  0x6d   : > { %733 = vperm.xlu0 %912, %v209_v10   ;;  %498 = vrot.lane.b32.xlu1 %v990_v6, %s932_s28 }
  0x71   : > { %913 = vset.pattern.permute.xlu0 %v936_v17  ;;  %492 = vrot.lane.b32.xlu1 %v978_v2, %s932_s28  ;;  %v371_v17 = vrot.slane %v871_v11, %v1137_v50 }
  0x72   : > { %259 = vperm.xlu0 %913, %v209_v10  }
  0x75   : > { %500 = vrot.lane.b32.xlu1 %v998_v9, %s932_s28 }
  0x76   : > { %558 = vrot.lane.b32.xlu0 %v978_v2, %s934_s29 }
  0x79   : > { %556 = vrot.lane.b32.xlu1 %v986_v5, %s934_s29 }
  0x7a   : > { %620 = vrot.lane.b32.xlu0 %v980_v3, %s937_s30 }
  0x7d   : > { %564 = vrot.lane.b32.xlu1 %v990_v6, %s934_s29 }
  0x7e   : > { %628 = vrot.lane.b32.xlu0 %v992_v7, %s937_s30 }
  0x81   : > { %494 = vrot.lane.b32.xlu1 %v984_v4, %s932_s28 }
  0x82   : > { %560 = vrot.lane.b32.xlu0 %v984_v4, %s934_s29 }
  0x85   : > { %502 = vrot.lane.b32.xlu1 %v996_v8, %s932_s28 }
  0x86   : > { %624 = vrot.lane.b32.xlu0 %v978_v2, %s937_s30  ;;  %v215_v18 = vpop.permute.xlu1 %214 }
  0x87   : > { %v211_v19 = vpop.permute.xlu0 %210 }
  0x89   : > { %566 = vrot.lane.b32.xlu1 %v998_v9, %s934_s29 }
  0x8a   : > { %686 = vrot.lane.b32.xlu0 %v980_v3, %s938_s5  ;;  %v217_v22 = vpop.permute.xlu1 %216 }
  0x8b   : > { %v213_v23 = vpop.permute.xlu0 %212 }
  0x8d   : > { %622 = vrot.lane.b32.xlu1 %v986_v5, %s937_s30 }
  0x8e   : > { %694 = vrot.lane.b32.xlu0 %v992_v7, %s938_s5  ;;  %v221_v24 = vpop.permute.xlu1 %220 }
  0x8f   : > { %v219_v25 = vpop.permute.xlu0 %218  ;;  %v1079_v27 = vsel %vm228_vm0, %v213_v23, %v221_v24  ;;  %v1083_v28 = vsel %vm228_vm0, %v221_v24, %v213_v23 }
  0x90   : > { %v1087_v29 = vsel %vm228_vm0, %v211_v19, %v219_v25  ;;  %v1091_v30 = vsel %vm228_vm0, %v219_v25, %v211_v19 }
  0x91   : > { %630 = vrot.lane.b32.xlu1 %v990_v6, %s937_s30 }
  0x92   : > { %755 = vperm.xlu0 %913, %v752_v26   ;;  %v225_v31 = vpop.permute.xlu1 %224 }
  0x93   : > { %v223_v32 = vpop.permute.xlu0 %222  ;;  %v1097_v33 = vsel %vm228_vm0, %v217_v22, %v225_v31  ;;  %v1101_v34 = vsel %vm228_vm0, %v225_v31, %v217_v22 }
  0x94   : > { %v1105_v35 = vsel %vm228_vm0, %v215_v18, %v223_v32  ;;  %v1109_v36 = vsel %vm228_vm0, %v223_v32, %v215_v18 }
  0x95   : > { %568 = vrot.lane.b32.xlu1 %v996_v8, %s934_s29  ;;  %s200_s29 = scalar_lea.vmem %s1582_s4, %s869_s26 }
  0x96   : > { %690 = vrot.lane.b32.xlu0 %v978_v2, %s938_s5  ;;  %v271_v37 = vpop.permute.xlu1 %270 }
  0x97   : > { %v275_v38 = vpop.permute.xlu0 %274 }
  0x99   : > { %632 = vrot.lane.b32.xlu1 %v998_v9, %s937_s30 }
  0x9a   : > { %692 = vrot.lane.b32.xlu0 %v984_v4, %s938_s5  ;;  %v273_v39 = vpop.permute.xlu1 %272 }
  0x9b   : > { %v279_v40 = vpop.permute.xlu0 %278 }
  0x9c   : > { %v287_v41 = vsel %vm286_vm1, %v271_v37, %v279_v40  ;;  %v291_v42 = vsel %vm286_vm1, %v279_v40, %v271_v37 }
  0x9d   : > { %688 = vrot.lane.b32.xlu1 %v986_v5, %s938_s5  ;;  %v308_v53 = vmul.f32 %v301_v51, %v291_v42  ;;  %v309_v54 = vmul.f32 %v305_v52, %v287_v41 }
  0x9e   : > { %v277_v43 = vpop.permute.xlu1 %276 }
  0xa1   : > { %696 = vrot.lane.b32.xlu1 %v990_v6, %s938_s5 }
  0xa2   : > { %v281_v45 = vpop.permute.xlu1 %280 }
  0xa3   : > { %v288_v47 = vsel %vm286_vm1, %v273_v39, %v281_v45  ;;  %v292_v48 = vsel %vm286_vm1, %v281_v45, %v273_v39 }
  0xa4   : > { %v310_v55 = vmul.f32 %v301_v51, %v292_v48  ;;  %v311_v56 = vmul.f32 %v305_v52, %v288_v47 }
  0xa5   : > { %626 = vrot.lane.b32.xlu1 %v984_v4, %s937_s30 }
  0xa9   : > { %634 = vrot.lane.b32.xlu1 %v996_v8, %s937_s30 }
  0xac   : > { %v318_v57 = vpop.permute.xlu0 %317 }
  0xad   : > { %v1145_v58 = vmul.f32 %v318_v57, %v308_v53  ;;  %v1147_v59 = vmul.f32 %v318_v57, %v309_v54  ;;  %v1149_v60 = vmul.f32 %v318_v57, %v310_v55  ;;  %v1151_v61 = vmul.f32 %v318_v57, %v311_v56  ;;  %698 = vrot.lane.b32.xlu1 %v998_v9, %s938_s5 }
  0xb0   : > { %v283_v62 = vpop.permute.xlu0 %282 }
  0xb1   : > { %v289_v63 = vsel %vm286_vm1, %v275_v38, %v283_v62  ;;  %v293_v0 = vsel %vm286_vm1, %v283_v62, %v275_v38  ;;  %700 = vrot.lane.b32.xlu1 %v996_v8, %s938_s5 }
  0xb2   : > { %v312_v1 = vmul.f32 %v301_v51, %v293_v0  ;;  %v313_v10 = vmul.f32 %v305_v52, %v289_v63 }
  0xb3   : > { %v1168_v14 = vpop.permute.xlu1 %383 }
  0xb4   : > { %v1164_v12 = vmul.f32 %v318_v57, %v312_v1  ;;  %v1166_v13 = vmul.f32 %v318_v57, %v313_v10  ;;  %v339_v15 = vpop.permute.xlu0 %338 }
  0xb8   : > { %v347_v18 = vpop.permute.xlu0 %346  ;;  %v1177_v22 = vpop.permute.xlu1 %449 }
  0xb9   : > { %v354_v19 = vsel %vm352_vm2, %v339_v15, %v347_v18  ;;  %v358_v20 = vsel %vm352_vm2, %v347_v18, %v339_v15 }
  0xba   : > { %v376_v23 = vmul.f32 %v367_v16, %v358_v20  ;;  %v377_v24 = vmul.f32 %v371_v17, %v354_v19 }
  0xbc   : > { %v1180_v25 = vmul.f32 %v1168_v14, %v376_v23  ;;  %v1183_v26 = vmul.f32 %v1168_v14, %v377_v24  ;;  %v285_v31 = vpop.permute.xlu0 %284  ;;  %v337_v38 = vpop.permute.xlu1 %336 }
  0xbd   : > { %v290_v32 = vsel %vm286_vm1, %v277_v43, %v285_v31  ;;  %v294_v37 = vsel %vm286_vm1, %v285_v31, %v277_v43  ;;  %v872_v43 = vld [vmem:[%s1579_s1 + $0x3] ss:$8 sm:$0x3] }
  0xbe   : > { %v314_v39 = vmul.f32 %v301_v51, %v294_v37  ;;  %v315_v40 = vmul.f32 %v305_v52, %v290_v32  ;;  %v1210_v56 = vrot.slane %v872_v43, %v1135_v49 }
  0xc0   : > { %v1189_v41 = vmul.f32 %v318_v57, %v314_v39  ;;  %v1191_v42 = vmul.f32 %v318_v57, %v315_v40  ;;  %v349_v44 = vpop.permute.xlu0 %348  ;;  %v345_v45 = vpop.permute.xlu1 %344  ;;  %v1213_v57 = vrot.slane %v872_v43, %v1137_v50 }
  0xc1   : > { %v353_v46 = vsel %vm352_vm2, %v337_v38, %v345_v45  ;;  %v357_v47 = vsel %vm352_vm2, %v345_v45, %v337_v38 }
  0xc2   : > { %v374_v48 = vmul.f32 %v367_v16, %v357_v47  ;;  %v375_v53 = vmul.f32 %v371_v17, %v353_v46 }
  0xc4   : > { %v405_v51 = vpop.permute.xlu0 %404  ;;  %v1201_v52 = vmul.f32 %v1168_v14, %v374_v48  ;;  %v1204_v54 = vmul.f32 %v1168_v14, %v375_v53  ;;  %v1206_v55 = vpop.permute.xlu1 %469 }
  0xc8   : > { %v413_v62 = vpop.permute.xlu0 %412  ;;  %v341_v1 = vpop.permute.xlu1 %340 }
  0xc9   : > { %v420_v63 = vsel %vm418_vm3, %v405_v51, %v413_v62  ;;  %v424_v0 = vsel %vm418_vm3, %v413_v62, %v405_v51  ;;  %v355_v15 = vsel %vm352_vm2, %v341_v1, %v349_v44  ;;  %v359_v18 = vsel %vm352_vm2, %v349_v44, %v341_v1 }
  0xca   : > { %v442_v10 = vmul.f32 %v1210_v56, %v424_v0  ;;  %v443_v11 = vmul.f32 %v1213_v57, %v420_v63  ;;  %v378_v19 = vmul.f32 %v367_v16, %v359_v18  ;;  %v379_v20 = vmul.f32 %v371_v17, %v355_v15 }
  0xcc   : > { %v1226_v23 = vmul.f32 %v1177_v22, %v442_v10  ;;  %v1229_v24 = vmul.f32 %v1177_v22, %v443_v11  ;;  %v343_v31 = vpop.permute.xlu0 %342  ;;  %v1232_v32 = vmul.f32 %v1168_v14, %v378_v19  ;;  %v1235_v37 = vmul.f32 %v1168_v14, %v379_v20  ;;  %v403_v38 = vpop.permute.xlu1 %402 }
  0xd0   : > { %v407_v39 = vpop.permute.xlu0 %406  ;;  %v411_v40 = vpop.permute.xlu1 %410 }
  0xd4   : > { %v1237_v45 = vpop.permute.xlu0 %601  ;;  %v1239_v44 = vpop.permute.xlu1 %535 }
  0xd5   : > { %1595 = vst [vmem:[#allocation4_spill] sm:$0xff] %v1237_v45 }
  0xd8   : > { %v1241_v46 = vpop.permute.xlu0 %488  ;;  %v351_v47 = vpop.permute.xlu1 %350 }
  0xd9   : > { %1596 = vst [vmem:[#allocation5_spill] sm:$0xff] %v1241_v46  ;;  %v356_v48 = vsel %vm352_vm2, %v343_v31, %v351_v47  ;;  %v360_v53 = vsel %vm352_vm2, %v351_v47, %v343_v31  ;;  %v237_v31 = vld [vmem:[%s1579_s1] ss:$8 sm:$0x3] }
  0xda   : > { %v380_v43 = vmul.f32 %v367_v16, %v360_v53  ;;  %v381_v51 = vmul.f32 %v371_v17, %v356_v48 }
  0xdc   : > { %v1247_v62 = vpop.permute.xlu0 %496  ;;  %v1250_v63 = vmul.f32 %v1168_v14, %v380_v43  ;;  %v1253_v0 = vmul.f32 %v1168_v14, %v381_v51  ;;  %v415_v1 = vpop.permute.xlu1 %414  ;;  %v242_v51 = vrot.slane %v237_v31, %v1135_v49 }
  0xdd   : > { %v421_v10 = vsel %vm418_vm3, %v407_v39, %v415_v1  ;;  %v425_v11 = vsel %vm418_vm3, %v415_v1, %v407_v39  ;;  %v246_v1 = vrot.slane %v237_v31, %v1137_v50 }
  0xde   : > { %v444_v15 = vmul.f32 %v1210_v56, %v425_v11  ;;  %v445_v16 = vmul.f32 %v1213_v57, %v421_v10  ;;  %v873_v10 = vld [vmem:[%s1579_s1 + $0x5] ss:$8 sm:$0x3] }
  0xdf   : > { %v1299_v31 = vrot.slane %v873_v10, %v1135_v49  ;;  %v250_v45 = vmul.f32 %v246_v1, %v1087_v29 }
  0xe0   : > { %v1261_v17 = vpop.permute.xlu0 %667  ;;  %v1264_v18 = vmul.f32 %v1177_v22, %v444_v15  ;;  %v1267_v19 = vmul.f32 %v1177_v22, %v445_v16  ;;  %v409_v14 = vpop.permute.xlu1 %408 }
  0xe1   : > { %1597 = vst [vmem:[#allocation6_spill] sm:$0xff] %v1261_v17  ;;  %v249_v17 = vmul.f32 %v242_v51, %v1091_v30 }
  0xe4   : > { %v1269_v20 = vpop.permute.xlu0 %554  ;;  %v417_v39 = vpop.permute.xlu1 %416 }
  0xe5   : > { %1598 = vst [vmem:[#allocation7_spill] sm:$0xff] %v1269_v20  ;;  %v422_v47 = vsel %vm418_vm3, %v409_v14, %v417_v39  ;;  %v426_v48 = vsel %vm418_vm3, %v417_v39, %v409_v14  ;;  %v419_v39 = vsel %vm418_vm3, %v403_v38, %v411_v40 }
  0xe6   : > { %v446_v53 = vmul.f32 %v1210_v56, %v426_v48  ;;  %v447_v43 = vmul.f32 %v1213_v57, %v422_v47  ;;  %v423_v47 = vsel %vm418_vm3, %v411_v40, %v403_v38  ;;  %v1302_v48 = vrot.slane %v873_v10, %v1137_v50 }
  0xe7   : > { %v255_v38 = vmul.f32 %v242_v51, %v1101_v34  ;;  %v256_v40 = vmul.f32 %v246_v1, %v1097_v33  ;;  %v441_v49 = vmul.f32 %v1213_v57, %v419_v39  ;;  %v253_v50 = vmul.f32 %v242_v51, %v1109_v36 }
  0xe8   : > { %v1285_v11 = vpop.permute.xlu0 %562  ;;  %v1288_v15 = vmul.f32 %v1177_v22, %v446_v53  ;;  %v1291_v16 = vmul.f32 %v1177_v22, %v447_v43  ;;  %v491_v14 = vpop.permute.xlu1 %490  ;;  %v251_v53 = vmul.f32 %v242_v51, %v1083_v28  ;;  %v252_v43 = vmul.f32 %v246_v1, %v1079_v27 }
  0xe9   : > { %1599 = vst [vmem:[#allocation8_spill] sm:$0xff] %v1285_v11  ;;  %v440_v11 = vmul.f32 %v1210_v56, %v423_v47  ;;  %v254_v28 = vmul.f32 %v246_v1, %v1105_v35  ;;  %v476_v33 = vmul.f32 %v1206_v55, %v978_v2  ;;  %v477_v56 = vmul.f32 %v1206_v55, %v998_v9 }
  0xea   : > { %v474_v36 = vmul.f32 %v1206_v55, %v986_v5  ;;  %v475_v35 = vmul.f32 %v1206_v55, %v990_v6  ;;  %v472_v57 = vmul.f32 %v1206_v55, %v980_v3  ;;  %v473_v51 = vmul.f32 %v1206_v55, %v992_v7 }
  0xeb   : > { %v452_v1 = vmul.f32 %v1177_v22, %v440_v11 }
  0xec   : > { %v1308_v20 = vpop.permute.xlu0 %733  ;;  %v499_v10 = vpop.permute.xlu1 %498 }
  0xed   : > { %1600 = vst [vmem:[#allocation9_spill] sm:$0xff] %v1308_v20  ;;  %v506_v27 = vsel %vm504_vm4, %v491_v14, %v499_v10  ;;  %v510_v29 = vsel %vm504_vm4, %v499_v10, %v491_v14  ;;  %v453_v14 = vmul.f32 %v1177_v22, %v441_v49 }
  0xee   : > { %v528_v30 = vmul.f32 %v1299_v31, %v506_v27  ;;  %v529_v34 = vmul.f32 %v1302_v48, %v510_v29 }
  0xf0   : > { %v540_v2 = vmul.f32 %v1239_v44, %v528_v30  ;;  %v541_v9 = vmul.f32 %v1239_v44, %v529_v34  ;;  %v493_v39 = vpop.permute.xlu1 %492 }
  0xf1   : > { %v260_v47 = vpop.permute.xlu0 %259 }
  0xf2   : > { %v262_v5 = vmul.f32 %v260_v47, %v249_v17  ;;  %v263_v10 = vmul.f32 %v260_v47, %v250_v45  ;;  %v266_v27 = vmul.f32 %v260_v47, %v253_v50  ;;  %v267_v6 = vmul.f32 %v260_v47, %v254_v28 }
  0xf3   : > { %v264_v29 = vmul.f32 %v260_v47, %v251_v53  ;;  %v265_v20 = vmul.f32 %v260_v47, %v252_v43  ;;  %v268_v3 = vmul.f32 %v260_v47, %v255_v38  ;;  %v269_v46 = vmul.f32 %v260_v47, %v256_v40 }
  0xf4   : > { %v332_v7 = vadd.f32 %v1164_v12, %v266_v27  ;;  %v333_v11 = vadd.f32 %v1166_v13, %v267_v6  ;;  %v328_v49 = vadd.f32 %v1145_v58, %v262_v5  ;;  %v329_v22 = vadd.f32 %v1147_v59, %v263_v10  ;;  %v501_v30 = vpop.permute.xlu1 %500 }
  0xf5   : > { %v1342_v34 = vpop.permute.xlu0 %558  ;;  %v330_v17 = vadd.f32 %v1149_v60, %v264_v29  ;;  %v331_v50 = vadd.f32 %v1151_v61, %v265_v20  ;;  %v334_v45 = vadd.f32 %v1189_v41, %v268_v3  ;;  %v335_v53 = vadd.f32 %v1191_v42, %v269_v46 }
  0xf6   : > { %v398_v43 = vadd.f32 %v1232_v32, %v332_v7  ;;  %v399_v12 = vadd.f32 %v1235_v37, %v333_v11  ;;  %v507_v58 = vsel %vm504_vm4, %v493_v39, %v501_v30  ;;  %v511_v59 = vsel %vm504_vm4, %v501_v30, %v493_v39  ;;  %v1603_v11 = vld [vmem:[#allocation3_spill] sm:$0xff] }
  0xf7   : > { %v530_v13 = vmul.f32 %v1299_v31, %v507_v58  ;;  %v531_v60 = vmul.f32 %v1302_v48, %v511_v59  ;;  %v396_v61 = vadd.f32 %v1180_v25, %v330_v17  ;;  %v397_v41 = vadd.f32 %v1183_v26, %v331_v50  ;;  %v1605_v30 = vld [vmem:[#allocation7_spill] sm:$0xff] }
  0xf8   : > { %v464_v42 = vadd.f32 %v1264_v18, %v398_v43  ;;  %v465_v32 = vadd.f32 %v1267_v19, %v399_v12  ;;  %v394_v37 = vadd.f32 %v1201_v52, %v328_v49  ;;  %v395_v46 = vadd.f32 %v1204_v54, %v329_v22  ;;  %v1364_v40 = vpop.permute.xlu1 %556  ;;  %v1604_v22 = vld [vmem:[#allocation8_spill] sm:$0xff] }
  0xf9   : > { %v542_v20 = vmul.f32 %v1239_v44, %v530_v13  ;;  %v543_v38 = vmul.f32 %v1239_v44, %v531_v60  ;;  %v621_v28 = vpop.permute.xlu0 %620  ;;  %v462_v39 = vadd.f32 %v1226_v23, %v396_v61  ;;  %v463_v25 = vadd.f32 %v1229_v24, %v397_v41 }
  0xfa   : > { %v484_v26 = vadd.f32 %v476_v33, %v464_v42  ;;  %v485_v47 = vadd.f32 %v477_v56, %v465_v32  ;;  %v460_v18 = vadd.f32 %v452_v1, %v394_v37  ;;  %v461_v5 = vadd.f32 %v453_v14, %v395_v46  ;;  %v876_v42 = vld [vmem:[%s1579_s1 + $0x10] ss:$8 sm:$0x3] }
  0xfb   : > { %v482_v19 = vadd.f32 %v474_v36, %v462_v39  ;;  %v483_v10 = vadd.f32 %v475_v35, %v463_v25  ;;  %v400_v52 = vadd.f32 %v1250_v63, %v334_v45  ;;  %v401_v54 = vadd.f32 %v1253_v0, %v335_v53  ;;  %v1601_v35 = vld [vmem:[#allocation5_spill] sm:$0xff] }
  0xfc   : > { %v1370_v27 = vadd.f32 %v542_v20, %v484_v26  ;;  %v1372_v6 = vadd.f32 %v543_v38, %v485_v47  ;;  %v480_v29 = vadd.f32 %v472_v57, %v460_v18  ;;  %v481_v3 = vadd.f32 %v473_v51, %v461_v5  ;;  %v1374_v7 = vpop.permute.xlu1 %564 }
  0xfd   : > { %v1376_v23 = vadd.f32 %v540_v2, %v482_v19  ;;  %v1378_v24 = vadd.f32 %v541_v9, %v483_v10  ;;  %v629_v33 = vpop.permute.xlu0 %628  ;;  %v466_v56 = vadd.f32 %v1288_v15, %v400_v52  ;;  %v467_v36 = vadd.f32 %v1291_v16, %v401_v54  ;;  %v874_v15 = vld [vmem:[%s1579_s1 + $0x6] ss:$8 sm:$0x3]  ;;  %v1606_v52 = vld [vmem:[#allocation4_spill] sm:$0xff] }
  0xfe   : > { %v478_v63 = vmul.f32 %v1206_v55, %v984_v4  ;;  %v479_v0 = vmul.f32 %v1206_v55, %v996_v8  ;;  %v505_v57 = vsel %vm504_vm4, %v1601_v35, %v1247_v62  ;;  %v509_v51 = vsel %vm504_vm4, %v1247_v62, %v1601_v35  ;;  %v875_v8 = vld [vmem:[%s1579_s1 + $0x7] ss:$8 sm:$0x3] }
  0xff   : > { %v526_v55 = vmul.f32 %v1299_v31, %v505_v57  ;;  %v527_v62 = vmul.f32 %v1302_v48, %v509_v51  ;;  %v1602_v2 = vld [vmem:[#allocation2_spill] sm:$0xff]  ;;  %v1410_v49 = vrot.slane %v874_v15, %v1603_v11  ;;  %v571_v17 = vsel %vm570_vm5, %v1605_v30, %v1604_v22 }
 0x100   : > { %v495_v16 = vpop.permute.xlu1 %494  ;;  %v486_v4 = vadd.f32 %v478_v63, %v466_v56  ;;  %v487_v14 = vadd.f32 %v479_v0, %v467_v36  ;;  %v1407_v9 = vrot.slane %v874_v15, %v1602_v2  ;;  %v575_v50 = vsel %vm570_vm5, %v1604_v22, %v1605_v30 }
 0x101   : > { %v1397_v1 = vpop.permute.xlu0 %560  ;;  %v1421_v45 = vrot.slane %v875_v8, %v1602_v2  ;;  %v1424_v53 = vrot.slane %v875_v8, %v1603_v11  ;;  %v637_v58 = vsel %vm636_vm6, %v621_v28, %v629_v33  ;;  %v641_v59 = vsel %vm636_vm6, %v629_v33, %v621_v28  ;;  %v1607_v33 = vld [vmem:[#allocation6_spill] sm:$0xff] }
 0x102   : > { %v538_v32 = vmul.f32 %v1239_v44, %v526_v55  ;;  %v539_v37 = vmul.f32 %v1239_v44, %v527_v62  ;;  %v592_v46 = vmul.f32 %v1407_v9, %v571_v17  ;;  %v593_v20 = vmul.f32 %v1410_v49, %v575_v50 }
 0x103   : > { %v658_v38 = vmul.f32 %v1421_v45, %v637_v58  ;;  %v659_v28 = vmul.f32 %v1424_v53, %v641_v59  ;;  %v1451_v26 = vrot.slane %v876_v42, %v1602_v2  ;;  %v1454_v47 = vrot.slane %v876_v42, %v1603_v11 }
 0x104   : > { %v503_v43 = vpop.permute.xlu1 %502  ;;  %v546_v18 = vadd.f32 %v538_v32, %v480_v29  ;;  %v547_v5 = vadd.f32 %v539_v37, %v481_v3  ;;  %v604_v54 = vmul.f32 %v1606_v52, %v592_v46  ;;  %v576_v58 = vsel %vm570_vm5, %v1374_v7, %v1364_v40 }
 0x105   : > { %v1426_v12 = vpop.permute.xlu0 %624  ;;  %v508_v13 = vsel %vm504_vm4, %v495_v16, %v503_v43  ;;  %v512_v60 = vsel %vm504_vm4, %v503_v43, %v495_v16  ;;  %v670_v56 = vmul.f32 %v1607_v33, %v658_v38  ;;  %v671_v36 = vmul.f32 %v1607_v33, %v659_v28 }
 0x106   : > { %v532_v61 = vmul.f32 %v1299_v31, %v508_v13  ;;  %v533_v41 = vmul.f32 %v1302_v48, %v512_v60  ;;  %v612_v3 = vadd.f32 %v604_v54, %v546_v18  ;;  %v572_v43 = vsel %vm570_vm5, %v1364_v40, %v1374_v7 }
 0x107   : > { %v595_v46 = vmul.f32 %v1410_v49, %v576_v58 }
 0x108   : > { %v544_v31 = vmul.f32 %v1239_v44, %v532_v61  ;;  %v545_v48 = vmul.f32 %v1239_v44, %v533_v41  ;;  %v567_v39 = vpop.permute.xlu1 %566  ;;  %v605_v44 = vmul.f32 %v1606_v52, %v593_v20  ;;  %v678_v16 = vadd.f32 %v670_v56, %v612_v3 }
 0x109   : > { %v687_v25 = vpop.permute.xlu0 %686  ;;  %v594_v41 = vmul.f32 %v1407_v9, %v572_v43  ;;  %v607_v28 = vmul.f32 %v1606_v52, %v595_v46  ;;  %v573_v56 = vsel %vm570_vm5, %v1342_v34, %v567_v39 }
 0x10a   : > { %v1456_v19 = vadd.f32 %v544_v31, %v486_v4  ;;  %v1458_v10 = vadd.f32 %v545_v48, %v487_v14  ;;  %v613_v57 = vadd.f32 %v605_v44, %v547_v5  ;;  %v1608_v14 = vld [vmem:[#allocation9_spill] sm:$0xff] }
 0x10b   : > { %v606_v38 = vmul.f32 %v1606_v52, %v594_v41  ;;  %v615_v44 = vadd.f32 %v607_v28, %v1378_v24 }
 0x10c   : > { %v623_v63 = vpop.permute.xlu1 %622  ;;  %v679_v4 = vadd.f32 %v671_v36, %v613_v57 }
 0x10d   : > { %v695_v0 = vpop.permute.xlu0 %694  ;;  %v614_v18 = vadd.f32 %v606_v38, %v1376_v23  ;;  %v577_v23 = vsel %vm570_vm5, %v567_v39, %v1342_v34 }
 0x10e   : > { %v703_v35 = vsel %vm702_vm7, %v687_v25, %v695_v0  ;;  %v707_v29 = vsel %vm702_vm7, %v695_v0, %v687_v25  ;;  %v597_v39 = vmul.f32 %v1410_v49, %v577_v23 }
 0x10f   : > { %v724_v51 = vmul.f32 %v1451_v26, %v703_v35  ;;  %v725_v15 = vmul.f32 %v1454_v47, %v707_v29 }
 0x110   : > { %v631_v62 = vpop.permute.xlu1 %630 }
 0x111   : > { %v736_v8 = vmul.f32 %v1608_v14, %v724_v51  ;;  %v737_v55 = vmul.f32 %v1608_v14, %v725_v15  ;;  %v1472_v22 = vpop.permute.xlu0 %755  ;;  %v638_v42 = vsel %vm636_vm6, %v623_v63, %v631_v62  ;;  %v642_v32 = vsel %vm636_vm6, %v631_v62, %v623_v63 }
 0x112   : > { %v660_v20 = vmul.f32 %v1421_v45, %v638_v42  ;;  %v661_v40 = vmul.f32 %v1424_v53, %v642_v32  ;;  %v596_v51 = vmul.f32 %v1407_v9, %v573_v56 }
 0x113   : > { %v744_v2 = vadd.f32 %v736_v8, %v678_v16  ;;  %v745_v11 = vadd.f32 %v737_v55, %v679_v4 }
 0x114   : > { %v569_v30 = vpop.permute.xlu1 %568  ;;  %v672_v31 = vmul.f32 %v1607_v33, %v660_v20  ;;  %v673_v48 = vmul.f32 %v1607_v33, %v661_v40  ;;  %v608_v43 = vmul.f32 %v1606_v52, %v596_v51 }
 0x115   : > { %v758_v17 = vadd.f32 %v1472_v22, %v744_v2  ;;  %v759_v50 = vadd.f32 %v1472_v22, %v745_v11  ;;  %v574_v0 = vsel %vm570_vm5, %v1397_v1, %v569_v30  ;;  %v578_v8 = vsel %vm570_vm5, %v569_v30, %v1397_v1 }
 0x116   : > { %v680_v35 = vadd.f32 %v672_v31, %v614_v18  ;;  %v681_v29 = vadd.f32 %v673_v48, %v615_v44  ;;  %v598_v55 = vmul.f32 %v1407_v9, %v574_v0 }
 0x117   : > { %v766_v59 = vadd.f32 %v759_v50, %v758_v17  ;;  %v783_v13 = vmul.f32 %v758_v17, %v758_v17  ;;  %v784_v60 = vmul.f32 %v759_v50, %v759_v50 }
 0x118   : > { %v633_v61 = vpop.permute.xlu1 %632  ;;  %v610_v41 = vmul.f32 %v1606_v52, %v598_v55 }
 0x119   : > { %767 = vadd.xlane.f32.xlu0 %v766_v59  ;;  %v791_v37 = vadd.f32 %v784_v60, %v783_v13  ;;  %v639_v15 = vsel %vm636_vm6, %v1426_v12, %v633_v61  ;;  %v643_v34 = vsel %vm636_vm6, %v633_v61, %v1426_v12  ;;  %v691_v12 = vpop.permute.xlu0 %690  ;;  %v609_v59 = vmul.f32 %v1606_v52, %v597_v39 }
 0x11a   : > { %v662_v62 = vmul.f32 %v1421_v45, %v639_v15  ;;  %v663_v2 = vmul.f32 %v1424_v53, %v643_v34  ;;  %v599_v13 = vmul.f32 %v1410_v49, %v578_v8 }
 0x11c   : > { %v689_v7 = vpop.permute.xlu1 %688  ;;  %v674_v42 = vmul.f32 %v1607_v33, %v662_v62  ;;  %v675_v32 = vmul.f32 %v1607_v33, %v663_v2  ;;  %v611_v48 = vmul.f32 %v1606_v52, %v599_v13 }
 0x11d   : > { %792 = vadd.xlane.f32.xlu0 %v791_v37  ;;  %v693_v31 = vpop.permute.xlu0 %692 }
 0x120   : > { %v697_v25 = vpop.permute.xlu1 %696 }
 0x121   : > { %v704_v5 = vsel %vm702_vm7, %v689_v7, %v697_v25  ;;  %v708_v54 = vsel %vm702_vm7, %v697_v25, %v689_v7  ;;  %v617_v7 = vadd.f32 %v609_v59, %v1372_v6 }
 0x122   : > { %v726_v36 = vmul.f32 %v1451_v26, %v704_v5  ;;  %v727_v63 = vmul.f32 %v1454_v47, %v708_v54 }
 0x123   : > { %v683_v18 = vadd.f32 %v675_v32, %v617_v7 }
 0x124   : > { %v738_v24 = vmul.f32 %v1608_v14, %v726_v36  ;;  %v739_v3 = vmul.f32 %v1608_v14, %v727_v63  ;;  %v627_v57 = vpop.permute.xlu1 %626 }
 0x126   : > { %v746_v16 = vadd.f32 %v738_v24, %v680_v35  ;;  %v747_v4 = vadd.f32 %v739_v3, %v681_v29  ;;  %v619_v35 = vadd.f32 %v611_v48, %v1458_v10 }
 0x128   : > { %v635_v11 = vpop.permute.xlu1 %634  ;;  %v760_v17 = vadd.f32 %v1472_v22, %v746_v16  ;;  %v761_v50 = vadd.f32 %v1472_v22, %v747_v4 }
 0x129   : > { %v640_v58 = vsel %vm636_vm6, %v627_v57, %v635_v11  ;;  %v644_v1 = vsel %vm636_vm6, %v635_v11, %v627_v57 }
 0x12a   : > { %v769_v9 = vadd.f32 %v761_v50, %v760_v17  ;;  %v785_v30 = vmul.f32 %v760_v17, %v760_v17  ;;  %v664_v60 = vmul.f32 %v1421_v45, %v640_v58  ;;  %v786_v61 = vmul.f32 %v761_v50, %v761_v50 }
 0x12b   : > { %v665_v46 = vmul.f32 %v1424_v53, %v644_v1  ;;  %v616_v45 = vadd.f32 %v608_v43, %v1370_v27  ;;  %v618_v27 = vadd.f32 %v610_v41, %v1456_v19 }
 0x12c   : > { %v699_v37 = vpop.permute.xlu1 %698  ;;  %770 = vadd.xlane.f32.xlu1 %v769_v9  ;;  %v794_v49 = vadd.f32 %v786_v61, %v785_v30  ;;  %v676_v53 = vmul.f32 %v1607_v33, %v664_v60 }
 0x12d   : > { %v705_v20 = vsel %vm702_vm7, %v691_v12, %v699_v37  ;;  %v709_v40 = vsel %vm702_vm7, %v699_v37, %v691_v12  ;;  %v682_v25 = vadd.f32 %v674_v42, %v616_v45  ;;  %v677_v6 = vmul.f32 %v1607_v33, %v665_v46 }
 0x12e   : > { %v728_v38 = vmul.f32 %v1451_v26, %v705_v20  ;;  %v729_v28 = vmul.f32 %v1454_v47, %v709_v40  ;;  %795 = vadd.xlane.f32.xlu0 %v794_v49  ;;  %v684_v29 = vadd.f32 %v676_v53, %v618_v27 }
 0x12f   : > { %v685_v57 = vadd.f32 %v677_v6, %v619_v35 }
 0x130   : > { %v740_v5 = vmul.f32 %v1608_v14, %v728_v38  ;;  %v741_v54 = vmul.f32 %v1608_v14, %v729_v28  ;;  %v701_v44 = vpop.permute.xlu1 %700 }
 0x131   : > { %v706_v56 = vsel %vm702_vm7, %v693_v31, %v701_v44  ;;  %v710_v52 = vsel %vm702_vm7, %v701_v44, %v693_v31 }
 0x132   : > { %v730_v36 = vmul.f32 %v1451_v26, %v706_v56  ;;  %v731_v63 = vmul.f32 %v1454_v47, %v710_v52  ;;  %v748_v23 = vadd.f32 %v740_v5, %v682_v25  ;;  %v749_v0 = vadd.f32 %v741_v54, %v683_v18 }
 0x134   : > { %v742_v24 = vmul.f32 %v1608_v14, %v730_v36  ;;  %v743_v19 = vmul.f32 %v1608_v14, %v731_v63  ;;  %v762_v33 = vadd.f32 %v1472_v22, %v748_v23  ;;  %v763_v3 = vadd.f32 %v1472_v22, %v749_v0 }
 0x136   : > { %v772_v21 = vadd.f32 %v763_v3, %v762_v33  ;;  %v787_v51 = vmul.f32 %v762_v33, %v762_v33  ;;  %v788_v15 = vmul.f32 %v763_v3, %v763_v3  ;;  %v750_v26 = vadd.f32 %v742_v24, %v684_v29 }
 0x137   : > { %v751_v47 = vadd.f32 %v743_v19, %v685_v57 }
 0x138   : > { %773 = vadd.xlane.f32.xlu1 %v772_v21  ;;  %v797_v34 = vadd.f32 %v788_v15, %v787_v51  ;;  %v764_v10 = vadd.f32 %v1472_v22, %v750_v26 }
 0x139   : > { %v765_v39 = vadd.f32 %v1472_v22, %v751_v47 }
 0x13a   : > { %798 = vadd.xlane.f32.xlu0 %v797_v34  ;;  %v789_v14 = vmul.f32 %v764_v10, %v764_v10 }
 0x13b   : > { %v775_v16 = vadd.f32 %v765_v39, %v764_v10  ;;  %v790_v4 = vmul.f32 %v765_v39, %v765_v39 }
 0x13d   : > { %776 = vadd.xlane.f32.xlu1 %v775_v16  ;;  %v800_v8 = vadd.f32 %v790_v4, %v789_v14 }
 0x13f   : > { %801 = vadd.xlane.f32.xlu0 %v800_v8 }
 0x1a6   : > { %v768_v55 = vpop.xlane.xlu0 %767 }
 0x1aa   : > { %v793_v62 = vpop.xlane.xlu0 %792 }
 0x1b9   : > { %v771_v2 = vpop.xlane.xlu1 %770 }
 0x1ba   : > { %v778_v50 = vadd.f32 %v771_v2, %v768_v55 }
 0x1bb   : > { %v796_v11 = vpop.xlane.xlu0 %795 }
 0x1bc   : > { %v803_v43 = vadd.f32 %v796_v11, %v793_v62 }
 0x1c5   : > { %v774_v17 = vpop.xlane.xlu1 %773 }
 0x1c6   : > { %v779_v58 = vadd.f32 %v778_v50, %v774_v17 }
 0x1c7   : > { %v799_v12 = vpop.xlane.xlu0 %798 }
 0x1c8   : > { %v804_v59 = vadd.f32 %v803_v43, %v799_v12 }
 0x1ca   : > { %v777_v22 = vpop.xlane.xlu1 %776 }
 0x1cb   : > { %v780_v1 = vadd.f32 %v779_v58, %v777_v22 }
 0x1cc   : > { %v802_v9 = vpop.xlane.xlu0 %801 }
 0x1cd   : > { %782 = vst.msk [vmem:[%s200_s29] sm:$0xff] %vm781_vm8, %v780_v1  ;;  %v805_v30 = vadd.f32 %v804_v59, %v802_v9 }
 0x1cf   : > { %807 = vst.msk [vmem:[%s200_s29] sm:$0xff] %vm806_vm9, %v805_v30 }
 0x1d0 PF: > { %s14_s15 = sadd.s32 1, %s920_s15  }
 0x1d1   : > { %p11_p5 = scmp.ge.s32.totalorder %s14_s15, 4  }
 0x1d3   :  { %13 = sbr.rel (!%p11_p5) target bundleno = 1 (0x1), region = 73 }

// kernel: dilated_ir_block.5
= control target key start
LH: loop header
LB: loop body
LE: loop exit
PB: predicated region body
PF: predicated region fallthrough
CT: control target
= control target key end

     0   :  { %s1394_s21 = smov 0   ;;  %s2123_s0 = inlined_call_operand.vmem [shape: f32[8,8,256], index: 0, kind: input, shape index: {}]   ;;  %s2124_s1 = inlined_call_operand.vmem [shape: f32[9,256], index: 1, kind: input, shape index: {}]   ;;  %s2125_s2 = inlined_call_operand.vmem [shape: f32[8,9], index: 2, kind: input, shape index: {}]   ;;  %s2126_s3 = inlined_call_operand.vmem [shape: f32[8,1], index: 3, kind: input, shape index: {}]   ;;  %s2127_s4 = inlined_call_operand.vmem [shape: f32[16,8], index: 4, kind: input, shape index: {}]   ;;  %s2128_s5 = inlined_call_operand.vmem [shape: f32[16,1], index: 5, kind: input, shape index: {}]   ;;  %s2129_s6 = inlined_call_operand.vmem [shape: f32[8,16,256], index: 6, kind: output, shape index: {}]  }
   0x1 LB: > { %s1255_s22 = sadd.s32 4294967295, %s1339_s21   ;;  %p1259_p0 = scmp.ge.s32.totalorder %s1339_s21, 1  ;;  %s1339_s21 = sphi %s1394_s21, %s16_s21  }
   0x2   : > { %p214_p1 = scmp.lt.s32.totalorder %s1339_s21, 3 }
   0x4   : > { %p215_p2 = pnand %p1259_p0, %p214_p1 }
   0x6   : > { %218 = sbr.rel (%p215_p2) target bundleno = 538 (0x21a), region = 44 }
   0xd   : > { %v1405_v0 = vld [vmem:[%s2125_s2] sm:$0xff]  ;;  %s1260_s25 = sshll.u32 %s1255_s22, 2  ;;  %v1341_v1 = vmov 2   ;;  %v1342_v2 = vmov 1   ;;  %v1343_v3 = vmov 3   ;;  %v1344_v4 = vmov 0  }
   0xe   : > { %1324 = vset.pattern.permute.xlu1 %v1341_v1  ;;  %1323 = vset.pattern.permute.xlu0 %v1342_v2  ;;  %p247_p3 = scmp.lt.s32.totalorder %s1260_s25, 7  ;;  %s1345_s30 = smov 32   ;;  %v1347_v8 = vmov 4   ;;  %v1350_v10 = vmov 5   ;;  %v1351_v11 = vmov 6   ;;  %v1352_v13 = vmov 7  }
   0xf   : > { %442 = vperm.xlu1 %1324, %v1405_v0   ;;  %376 = vperm.xlu0 %1323, %v1405_v0   ;;  %s1346_s7 = smov 34   ;;  %s1348_s8 = smov 30   ;;  %v1354_v15 = vmov 8   ;;  %v811_v18 = vld [vmem:[%s2126_s3] sm:$0xff]  ;;  %v285_v21 = vlaneseq  ;;  %v2130_v29 = vmov 0.0   ;;  %v836_v62 = vld [vmem:[%s2128_s5 + $0x8] sm:$0xff] }
  0x10   : > { %s2161_s25 = smov (!%p247_p3, %s1260_s25), 7  ;;  %s1349_s9 = smov 2   ;;  %v835_v25 = vld [vmem:[%s2128_s5] sm:$0xff]  ;;  %918 = vmatprep.mubr.f32.mxu0 %v2130_v29  ;;  %1003 = vmatprep.mubr.f32.mxu1 %v2130_v29  ;;  %vm847_vm8 = vcmask 64512  }
  0x11   : > { %s1295_s26 = sshll.u32 %s2161_s25, 4  ;;  %s1353_s10 = smov 126   ;;  %v1563_v22 = vand.u32 127, %v285_v21  ;;  %v299_v1 = vshrl.u32 %v285_v21, 7 }
  0x12   : > { %s1415_s29 = scalar_lea.vmem %s2123_s0, %s1295_s26  ;;  %s1355_s11 = smov 98  }
  0x13   : > { %1325 = vset.pattern.permute.xlu0 %v1343_v3  ;;  %1332 = vset.pattern.permute.xlu1 %v1344_v4  ;;  %v1418_v5 = vld [vmem:[%s1415_s29] sm:$0xff]  ;;  %v1425_v6 = vld [vmem:[%s1415_s29 + $0x8] sm:$0xff]  ;;  %v1431_v7 = vld [vmem:[%s1415_s29 + $0x10] sm:$0xff]  ;;  %s1356_s12 = smov 96   ;;  %s1357_s13 = smov 94   ;;  %vm287_vm0 = vcmp.lt.s32.totalorder %v1563_v22, 34 }
  0x14   : > { %329 = vrot.lane.b32.xlu0 %v1418_v5, %s1345_s30  ;;  %269 = vrot.lane.b32.xlu1 %v1418_v5, %s1346_s7  ;;  %v1442_v9 = vld [vmem:[%s1415_s29 + $0x18] sm:$0xff]  ;;  %v1458_v12 = vld [vmem:[%s1415_s29 + $0x20] sm:$0xff]  ;;  %vm345_vm1 = vcmp.lt.s32.totalorder %v1563_v22, 32  ;;  %vm411_vm2 = vcmp.lt.s32.totalorder %v1563_v22, 30  ;;  %vm477_vm3 = vcmp.lt.s32.totalorder %v1563_v22, 2  ;;  %vm563_vm4 = vcmp.lt.s32.totalorder %v1563_v22, 126 }
  0x15   : > { %2141 = vst [vmem:[#allocation2_spill] sm:$0xff] %v1458_v12  ;;  %v1472_v14 = vld [vmem:[%s1415_s29 + $0x30] sm:$0xff]  ;;  %v1483_v16 = vld [vmem:[%s1415_s29 + $0x28] sm:$0xff]  ;;  %v1499_v17 = vld [vmem:[%s1415_s29 + $0x38] sm:$0xff]  ;;  %vm629_vm5 = vcmp.lt.s32.totalorder %v1563_v22, 98  ;;  %vm695_vm6 = vcmp.lt.s32.totalorder %v1563_v22, 96 }
  0x16   : > { %2142 = vst [vmem:[#allocation3_spill] sm:$0xff] %v1472_v14  ;;  %2143 = vst [vmem:[#allocation4_spill] sm:$0xff] %v1483_v16  ;;  %v1266_v3 = vld [vmem:[%s2124_s1 + $0x1] ss:$8 sm:$0x3]  ;;  %vm761_vm7 = vcmp.lt.s32.totalorder %v1563_v22, 94 }
  0x17   : > { %2144 = vst [vmem:[#allocation5_spill] sm:$0xff] %v1499_v17  ;;  %s1296_s18 = sshll.u32 %s2161_s25, 5 }
  0x18   : > { %508 = vperm.xlu0 %1325, %v1405_v0   ;;  %277 = vrot.lane.b32.xlu1 %v1425_v6, %s1346_s7  ;;  %s2102_s22 = scalar_lea.vmem %s2129_s6, %s1296_s18 }
  0x1c   : > { %331 = vrot.lane.b32.xlu0 %v1431_v7, %s1345_s30  ;;  %337 = vrot.lane.b32.xlu1 %v1425_v6, %s1345_s30 }
  0x1d   : > { %1326 = vset.pattern.permute.xlu0 %v1347_v8  ;;  %v1656_v8 = vsub.s32 0, %v299_v1 }
  0x20   : > { %395 = vrot.lane.b32.xlu0 %v1418_v5, %s1348_s8  ;;  %271 = vrot.lane.b32.xlu1 %v1431_v7, %s1346_s7 }
  0x24   : > { %528 = vperm.xlu0 %1326, %v1405_v0   ;;  %279 = vrot.lane.b32.xlu1 %v1442_v9, %s1346_s7 }
  0x28   : > { %461 = vrot.lane.b32.xlu0 %v1418_v5, %s1349_s9  ;;  %339 = vrot.lane.b32.xlu1 %v1442_v9, %s1345_s30 }
  0x29   : > { %1327 = vset.pattern.permute.xlu0 %v1350_v10  ;;  %v1658_v10 = vsub.s32 1, %v299_v1 }
  0x2b   : > { %v1671_v21 = vrot.slane %v1266_v3, %v1658_v10 }
  0x2c   : > { %594 = vperm.xlu0 %1327, %v1405_v0   ;;  %403 = vrot.lane.b32.xlu1 %v1425_v6, %s1348_s8 }
  0x30   : > { %1328 = vset.pattern.permute.xlu0 %v1351_v11  ;;  %397 = vrot.lane.b32.xlu1 %v1431_v7, %s1348_s8 }
  0x31   : > { %660 = vperm.xlu0 %1328, %v1405_v0  }
  0x34   : > { %405 = vrot.lane.b32.xlu1 %v1442_v9, %s1348_s8 }
  0x35   : > { %333 = vrot.lane.b32.xlu0 %v1458_v12, %s1345_s30 }
  0x36   : > { %1329 = vset.pattern.permute.xlu0 %v1352_v13 }
  0x38   : > { %469 = vrot.lane.b32.xlu1 %v1425_v6, %s1349_s9 }
  0x39   : > { %547 = vrot.lane.b32.xlu0 %v1418_v5, %s1353_s10 }
  0x3c   : > { %463 = vrot.lane.b32.xlu1 %v1431_v7, %s1349_s9 }
  0x3d   : > { %726 = vperm.xlu0 %1329, %v1405_v0  }
  0x40   : > { %471 = vrot.lane.b32.xlu1 %v1442_v9, %s1349_s9 }
  0x41   : > { %335 = vrot.lane.b32.xlu0 %v1472_v14, %s1345_s30 }
  0x42   : > { %1330 = vset.pattern.permute.xlu0 %v1354_v15  ;;  %v296_v15 = vld [vmem:[%s2124_s1] ss:$8 sm:$0x3] }
  0x44   : > { %273 = vrot.lane.b32.xlu1 %v1458_v12, %s1346_s7 }
  0x45   : > { %549 = vrot.lane.b32.xlu0 %v1431_v7, %s1353_s10 }
  0x48   : > { %281 = vrot.lane.b32.xlu1 %v1483_v16, %s1346_s7 }
  0x49   : > { %399 = vrot.lane.b32.xlu0 %v1458_v12, %s1348_s8 }
  0x4c   : > { %341 = vrot.lane.b32.xlu1 %v1483_v16, %s1345_s30 }
  0x4d   : > { %613 = vrot.lane.b32.xlu0 %v1418_v5, %s1355_s11 }
  0x50   : > { %555 = vrot.lane.b32.xlu1 %v1425_v6, %s1353_s10 }
  0x51   : > { %792 = vperm.xlu0 %1330, %v1405_v0  }
  0x54   : > { %275 = vrot.lane.b32.xlu1 %v1472_v14, %s1346_s7 }
  0x55   : > { %1331 = vset.pattern.permute.xlu0 %v1344_v4 }
  0x56   : > { %318 = vperm.xlu0 %1331, %v1405_v0  }
  0x58   : > { %283 = vrot.lane.b32.xlu1 %v1499_v17, %s1346_s7 }
  0x5a   : > { %615 = vrot.lane.b32.xlu0 %v1431_v7, %s1355_s11 }
  0x5c   : > { %343 = vrot.lane.b32.xlu1 %v1499_v17, %s1345_s30 }
  0x5e   : > { %465 = vrot.lane.b32.xlu0 %v1458_v12, %s1349_s9 }
  0x60   : > { %557 = vrot.lane.b32.xlu1 %v1442_v9, %s1353_s10 }
  0x62   : > { %679 = vrot.lane.b32.xlu0 %v1418_v5, %s1356_s12 }
  0x64   : > { %407 = vrot.lane.b32.xlu1 %v1483_v16, %s1348_s8 }
  0x66   : > { %467 = vrot.lane.b32.xlu0 %v1472_v14, %s1349_s9 }
  0x68   : > { %621 = vrot.lane.b32.xlu1 %v1425_v6, %s1355_s11 }
  0x6a   : > { %681 = vrot.lane.b32.xlu0 %v1431_v7, %s1356_s12 }
  0x6c   : > { %401 = vrot.lane.b32.xlu1 %v1472_v14, %s1348_s8 }
  0x6e   : > { %745 = vrot.lane.b32.xlu0 %v1418_v5, %s1357_s13 }
  0x70   : > { %409 = vrot.lane.b32.xlu1 %v1499_v17, %s1348_s8 }
  0x72   : > { %814 = vperm.xlu0 %1331, %v811_v18   ;;  %v1668_v18 = vrot.slane %v1266_v3, %v1656_v8 }
  0x74   : > { %623 = vrot.lane.b32.xlu1 %v1442_v9, %s1355_s11 }
  0x76   : > { %551 = vrot.lane.b32.xlu0 %v1458_v12, %s1353_s10 }
  0x78   : > { %473 = vrot.lane.b32.xlu1 %v1483_v16, %s1349_s9 }
  0x7a   : > { %553 = vrot.lane.b32.xlu0 %v1472_v14, %s1353_s10 }
  0x7c   : > { %687 = vrot.lane.b32.xlu1 %v1425_v6, %s1356_s12 }
  0x7e   : > { %617 = vrot.lane.b32.xlu0 %v1458_v12, %s1355_s11 }
  0x80   : > { %475 = vrot.lane.b32.xlu1 %v1499_v17, %s1349_s9 }
  0x82   : > { %619 = vrot.lane.b32.xlu0 %v1472_v14, %s1355_s11 }
  0x84   : > { %689 = vrot.lane.b32.xlu1 %v1442_v9, %s1356_s12 }
  0x86   : > { %683 = vrot.lane.b32.xlu0 %v1458_v12, %s1356_s12 }
  0x88   : > { %753 = vrot.lane.b32.xlu1 %v1425_v6, %s1357_s13 }
  0x8a   : > { %685 = vrot.lane.b32.xlu0 %v1472_v14, %s1356_s12 }
  0x8c   : > { %747 = vrot.lane.b32.xlu1 %v1431_v7, %s1357_s13 }
  0x8e   : > { %v1557_v19 = vpop.permute.xlu1 %442  ;;  %v1559_v20 = vpop.permute.xlu0 %376  ;;  %749 = vrot.lane.b32.xlu0 %v1458_v12, %s1357_s13 }
  0x90   : > { %755 = vrot.lane.b32.xlu1 %v1442_v9, %s1357_s13 }
  0x92   : > { %v270_v23 = vpop.permute.xlu1 %269  ;;  %v330_v24 = vpop.permute.xlu0 %329  ;;  %751 = vrot.lane.b32.xlu0 %v1472_v14, %s1357_s13 }
  0x94   : > { %559 = vrot.lane.b32.xlu1 %v1483_v16, %s1353_s10 }
  0x96   : > { %v278_v26 = vpop.permute.xlu1 %277  ;;  %839 = vperm.xlu0 %1331, %v835_v25  }
  0x97   : > { %v1577_v27 = vsel %vm287_vm0, %v270_v23, %v278_v26  ;;  %v1581_v28 = vsel %vm287_vm0, %v278_v26, %v270_v23  ;;  %v1584_v30 = vpop.permute.xlu0 %508  ;;  %v1267_v23 = vld [vmem:[%s2124_s1 + $0x2] ss:$8 sm:$0x3]  ;;  %v301_v26 = vrot.slane %v296_v15, %v1656_v8 }
  0x98   : > { %561 = vrot.lane.b32.xlu1 %v1499_v17, %s1353_s10 }
  0x9a   : > { %v338_v31 = vpop.permute.xlu1 %337 }
  0x9b   : > { %v1592_v32 = vsel %vm345_vm1, %v330_v24, %v338_v31  ;;  %v350_v33 = vsel %vm345_vm1, %v338_v31, %v330_v24  ;;  %v332_v34 = vpop.permute.xlu0 %331  ;;  %v305_v31 = vrot.slane %v296_v15, %v1658_v10 }
  0x9c   : > { %625 = vrot.lane.b32.xlu1 %v1483_v16, %s1355_s11 }
  0x9e   : > { %v272_v35 = vpop.permute.xlu1 %271 }
  0x9f   : > { %v396_v36 = vpop.permute.xlu0 %395 }
  0xa0   : > { %627 = vrot.lane.b32.xlu1 %v1499_v17, %s1355_s11 }
  0xa2   : > { %v280_v37 = vpop.permute.xlu1 %279 }
  0xa3   : > { %v1602_v38 = vsel %vm287_vm0, %v272_v35, %v280_v37  ;;  %v1606_v39 = vsel %vm287_vm0, %v280_v37, %v272_v35  ;;  %v1608_v40 = vpop.permute.xlu0 %528  ;;  %v1688_v37 = vrot.slane %v1267_v23, %v1656_v8 }
  0xa4   : > { %691 = vrot.lane.b32.xlu1 %v1483_v16, %s1356_s12 }
  0xa6   : > { %v340_v41 = vpop.permute.xlu1 %339 }
  0xa7   : > { %v347_v42 = vsel %vm345_vm1, %v332_v34, %v340_v41  ;;  %v351_v43 = vsel %vm345_vm1, %v340_v41, %v332_v34  ;;  %v1616_v44 = vpop.permute.xlu0 %461  ;;  %v1268_v34 = vld [vmem:[%s2124_s1 + $0x3] ss:$8 sm:$0x3]  ;;  %v1691_v41 = vrot.slane %v1267_v23, %v1658_v10 }
  0xa8   : > { %693 = vrot.lane.b32.xlu1 %v1499_v17, %s1356_s12  ;;  %v369_v1 = vmul.f32 %v1668_v18, %v351_v43 }
  0xaa   : > { %v404_v45 = vpop.permute.xlu1 %403 }
  0xab   : > { %v412_v46 = vsel %vm411_vm2, %v396_v36, %v404_v45  ;;  %v416_v47 = vsel %vm411_vm2, %v404_v45, %v396_v36  ;;  %v1625_v48 = vpop.permute.xlu0 %594  ;;  %v367_v45 = vmul.f32 %v1668_v18, %v350_v33  ;;  %v370_v33 = vmul.f32 %v1671_v21, %v347_v42 }
  0xac   : > { %2145 = vst [vmem:[#allocation6_spill] sm:$0xff] %v1625_v48  ;;  %757 = vrot.lane.b32.xlu1 %v1483_v16, %s1357_s13  ;;  %v434_v3 = vmul.f32 %v1691_v41, %v412_v46 }
  0xad   : > { %v379_v23 = vmul.f32 %v1559_v20, %v367_v45  ;;  %v534_v45 = vmul.f32 %v1608_v40, %v1442_v9 }
  0xae   : > { %v398_v49 = vpop.permute.xlu1 %397  ;;  %v446_v29 = vmul.f32 %v1557_v19, %v434_v3 }
  0xb0   : > { %v1629_v50 = vpop.permute.xlu0 %660  ;;  %759 = vrot.lane.b32.xlu1 %v1499_v17, %s1357_s13 }
  0xb1   : > { %2146 = vst [vmem:[#allocation7_spill] sm:$0xff] %v1629_v50 }
  0xb2   : > { %v406_v51 = vpop.permute.xlu1 %405 }
  0xb3   : > { %v413_v52 = vsel %vm411_vm2, %v398_v49, %v406_v51  ;;  %v417_v53 = vsel %vm411_vm2, %v406_v51, %v398_v49  ;;  %v368_v49 = vmul.f32 %v1671_v21, %v1592_v32  ;;  %v433_v32 = vmul.f32 %v1688_v37, %v416_v47 }
  0xb4   : > { %v334_v54 = vpop.permute.xlu0 %333  ;;  %844 = vperm.xlu1 %1332, %v836_v62   ;;  %v308_v62 = vmul.f32 %v301_v26, %v1581_v28  ;;  %v436_v15 = vmul.f32 %v1691_v41, %v413_v52  ;;  %v310_v28 = vmul.f32 %v301_v26, %v1606_v39  ;;  %v382_v39 = vmul.f32 %v1559_v20, %v370_v33 }
  0xb6   : > { %v470_v55 = vpop.permute.xlu1 %469 }
  0xb7   : > { %v478_v42 = vsel %vm477_vm3, %v1616_v44, %v470_v55  ;;  %v482_v43 = vsel %vm477_vm3, %v470_v55, %v1616_v44  ;;  %v448_v55 = vmul.f32 %v1557_v19, %v436_v15 }
  0xb8   : > { %v1637_v56 = vpop.permute.xlu0 %547 }
  0xba   : > { %v464_v57 = vpop.permute.xlu1 %463 }
  0xbc   : > { %v1639_v58 = vpop.permute.xlu0 %726 }
  0xbd   : > { %2147 = vst [vmem:[#allocation8_spill] sm:$0xff] %v1639_v58 }
  0xbe   : > { %v472_v59 = vpop.permute.xlu1 %471 }
  0xbf   : > { %v479_v60 = vsel %vm477_vm3, %v464_v57, %v472_v59  ;;  %v483_v61 = vsel %vm477_vm3, %v472_v59, %v464_v57  ;;  %v1699_v57 = vrot.slane %v1268_v34, %v1656_v8  ;;  %v1702_v59 = vrot.slane %v1268_v34, %v1658_v10 }
  0xc0   : > { %v1649_v63 = vpop.permute.xlu0 %335 }
  0xc1   : > { %v502_v33 = vmul.f32 %v1702_v59, %v479_v60 }
  0xc2   : > { %v274_v0 = vpop.permute.xlu1 %273 }
  0xc3   : > { %v514_v17 = vmul.f32 %v1584_v30, %v502_v33 }
  0xc4   : > { %v1651_v2 = vpop.permute.xlu0 %549 }
  0xc5   : > { %2148 = vst [vmem:[#allocation9_spill] sm:$0xff] %v1651_v2 }
  0xc6   : > { %v282_v4 = vpop.permute.xlu1 %281 }
  0xc7   : > { %v290_v11 = vsel %vm287_vm0, %v274_v0, %v282_v4  ;;  %v294_v13 = vsel %vm287_vm0, %v282_v4, %v274_v0  ;;  %v309_v0 = vmul.f32 %v305_v31, %v1577_v27  ;;  %v435_v4 = vmul.f32 %v1688_v37, %v417_v53 }
  0xc8   : > { %v1676_v24 = vpop.permute.xlu0 %399  ;;  %v311_v27 = vmul.f32 %v305_v31, %v1602_v38  ;;  %v381_v53 = vmul.f32 %v1559_v20, %v369_v1  ;;  %v533_v38 = vmul.f32 %v1608_v40, %v1431_v7  ;;  %v501_v1 = vmul.f32 %v1699_v57, %v483_v61 }
  0xc9   : > { %v447_v44 = vmul.f32 %v1557_v19, %v435_v4  ;;  %v312_v7 = vmul.f32 %v301_v26, %v294_v13 }
  0xca   : > { %v342_v25 = vpop.permute.xlu1 %341 }
  0xcb   : > { %v348_v35 = vsel %vm345_vm1, %v334_v54, %v342_v25  ;;  %v352_v36 = vsel %vm345_vm1, %v342_v25, %v334_v54  ;;  %v380_v25 = vmul.f32 %v1559_v20, %v368_v49  ;;  %v445_v49 = vmul.f32 %v1557_v19, %v433_v32 }
  0xcc   : > { %v1696_v51 = vpop.permute.xlu0 %613  ;;  %v371_v46 = vmul.f32 %v1668_v18, %v352_v36  ;;  %v372_v47 = vmul.f32 %v1671_v21, %v348_v35  ;;  %v499_v35 = vmul.f32 %v1699_v57, %v482_v43  ;;  %v500_v36 = vmul.f32 %v1702_v59, %v478_v42 }
  0xce   : > { %v1704_v54 = vpop.permute.xlu1 %555  ;;  %v383_v9 = vmul.f32 %v1559_v20, %v371_v46  ;;  %v384_v32 = vmul.f32 %v1559_v20, %v372_v47  ;;  %v513_v47 = vmul.f32 %v1584_v30, %v501_v1 }
  0xd0   : > { %v1718_v34 = vpop.permute.xlu0 %792 }
  0xd1   : > { %2149 = vst [vmem:[#allocation10_spill] sm:$0xff] %v1718_v34  ;;  %v313_v34 = vmul.f32 %v305_v31, %v290_v11 }
  0xd2   : > { %v276_v52 = vpop.permute.xlu1 %275 }
  0xd5   : > { %v319_v58 = vpop.permute.xlu0 %318 }
  0xd6   : > { %v284_v3 = vpop.permute.xlu1 %283  ;;  %v323_v43 = vmul.f32 %v319_v58, %v310_v28  ;;  %v324_v42 = vmul.f32 %v319_v58, %v311_v27  ;;  %v325_v2 = vmul.f32 %v319_v58, %v312_v7  ;;  %v326_v60 = vmul.f32 %v319_v58, %v313_v34 }
  0xd7   : > { %v291_v4 = vsel %vm287_vm0, %v276_v52, %v284_v3  ;;  %v295_v15 = vsel %vm287_vm0, %v284_v3, %v276_v52  ;;  %v321_v48 = vmul.f32 %v319_v58, %v308_v62  ;;  %v322_v46 = vmul.f32 %v319_v58, %v309_v0 }
  0xd8   : > { %v314_v50 = vmul.f32 %v301_v26, %v295_v15  ;;  %v315_v61 = vmul.f32 %v305_v31, %v291_v4  ;;  %v389_v13 = vadd.f32 %v381_v53, %v323_v43  ;;  %v390_v11 = vadd.f32 %v382_v39, %v324_v42  ;;  %v1269_v15 = vld [vmem:[%s2124_s1 + $0x5] ss:$8 sm:$0x3]  ;;  %v1270_v43 = vld [vmem:[%s2124_s1 + $0x6] ss:$8 sm:$0x3] }
  0xd9   : > { %v1750_v14 = vpop.permute.xlu0 %615  ;;  %v1752_v12 = vadd.f32 %v383_v9, %v325_v2  ;;  %v1754_v52 = vadd.f32 %v384_v32, %v326_v60  ;;  %v387_v34 = vadd.f32 %v379_v23, %v321_v48  ;;  %v388_v53 = vadd.f32 %v380_v25, %v322_v46 }
  0xda   : > { %v344_v16 = vpop.permute.xlu1 %343  ;;  %v455_v62 = vadd.f32 %v447_v44, %v389_v13  ;;  %v456_v0 = vadd.f32 %v448_v55, %v390_v11  ;;  %v327_v2 = vmul.f32 %v319_v58, %v314_v50  ;;  %v328_v39 = vmul.f32 %v319_v58, %v315_v61 }
  0xdb   : > { %v349_v26 = vsel %vm345_vm1, %v1649_v63, %v344_v16  ;;  %v353_v31 = vsel %vm345_vm1, %v344_v16, %v1649_v63  ;;  %v453_v3 = vadd.f32 %v445_v49, %v387_v34  ;;  %v454_v16 = vadd.f32 %v446_v29, %v388_v53 }
  0xdc   : > { %v373_v28 = vmul.f32 %v1668_v18, %v353_v31  ;;  %v374_v27 = vmul.f32 %v1671_v21, %v349_v26  ;;  %v521_v1 = vadd.f32 %v513_v47, %v455_v62  ;;  %v522_v33 = vadd.f32 %v514_v17, %v456_v0  ;;  %v1272_v26 = vld [vmem:[%s2124_s1 + $0x10] ss:$8 sm:$0x3] }
  0xdd   : > { %v511_v63 = vmul.f32 %v1584_v30, %v499_v35  ;;  %v512_v18 = vmul.f32 %v1584_v30, %v500_v36  ;;  %v466_v17 = vpop.permute.xlu0 %465  ;;  %v532_v29 = vmul.f32 %v1608_v40, %v1425_v6  ;;  %v1813_v11 = vrot.slane %v1269_v15, %v1656_v8 }
  0xde   : > { %v385_v7 = vmul.f32 %v1559_v20, %v373_v28  ;;  %v386_v9 = vmul.f32 %v1559_v20, %v374_v27  ;;  %v1766_v32 = vpop.permute.xlu1 %557  ;;  %v1770_v44 = vadd.f32 %v533_v38, %v521_v1  ;;  %v1772_v48 = vadd.f32 %v534_v45, %v522_v33 }
  0xdf   : > { %v519_v21 = vadd.f32 %v511_v63, %v453_v3  ;;  %v531_v20 = vmul.f32 %v1608_v40, %v1418_v5  ;;  %v520_v23 = vadd.f32 %v512_v18, %v454_v16  ;;  %v1816_v46 = vrot.slane %v1269_v15, %v1658_v10 }
  0xe0   : > { %v1774_v50 = vadd.f32 %v385_v7, %v327_v2  ;;  %v1776_v58 = vadd.f32 %v386_v9, %v328_v39  ;;  %v1820_v47 = vrot.slane %v1270_v43, %v1656_v8  ;;  %v1826_v31 = vrot.slane %v1270_v43, %v1658_v10 }
  0xe1   : > { %v1782_v49 = vadd.f32 %v531_v20, %v519_v21  ;;  %v1784_v38 = vadd.f32 %v532_v29, %v520_v23  ;;  %v1786_v45 = vpop.permute.xlu0 %679  ;;  %v1846_v33 = vrot.slane %v1272_v26, %v1656_v8  ;;  %v1849_v7 = vrot.slane %v1272_v26, %v1658_v10 }
  0xe2   : > { %v408_v25 = vpop.permute.xlu1 %407  ;;  %v564_v9 = vsel %vm563_vm4, %v1637_v56, %v1704_v54  ;;  %v568_v3 = vsel %vm563_vm4, %v1704_v54, %v1637_v56 }
  0xe3   : > { %v414_v5 = vsel %vm411_vm2, %v1676_v24, %v408_v25  ;;  %v418_v6 = vsel %vm411_vm2, %v408_v25, %v1676_v24  ;;  %v1271_v24 = vld [vmem:[%s2124_s1 + $0x7] ss:$8 sm:$0x3]  ;;  %v585_v25 = vmul.f32 %v1813_v11, %v564_v9 }
  0xe4   : > { %v437_v42 = vmul.f32 %v1688_v37, %v418_v6  ;;  %v438_v61 = vmul.f32 %v1691_v41, %v414_v5  ;;  %v1830_v62 = vrot.slane %v1271_v24, %v1656_v8  ;;  %v1833_v0 = vrot.slane %v1271_v24, %v1658_v10  ;;  %v2153_v6 = vld [vmem:[#allocation5_spill] sm:$0xff] }
  0xe5   : > { %v1788_v36 = vpop.permute.xlu0 %467  ;;  %v538_v15 = vmul.f32 %v1608_v40, %v2153_v6 }
  0xe6   : > { %v622_v55 = vpop.permute.xlu1 %621  ;;  %v449_v28 = vmul.f32 %v1557_v19, %v437_v42  ;;  %v450_v27 = vmul.f32 %v1557_v19, %v438_v61 }
  0xe7   : > { %v630_v10 = vsel %vm629_vm5, %v1696_v51, %v622_v55  ;;  %v634_v18 = vsel %vm629_vm5, %v622_v55, %v1696_v51  ;;  %v2151_v55 = vld [vmem:[#allocation4_spill] sm:$0xff] }
  0xe8   : > { %v457_v56 = vadd.f32 %v449_v28, %v1752_v12  ;;  %v458_v54 = vadd.f32 %v450_v27, %v1754_v52  ;;  %v2152_v12 = vld [vmem:[#allocation3_spill] sm:$0xff]  ;;  %v651_v43 = vmul.f32 %v1820_v47, %v630_v10  ;;  %v652_v42 = vmul.f32 %v1826_v31, %v634_v18 }
  0xe9   : > { %v1804_v60 = vpop.permute.xlu0 %681  ;;  %v537_v52 = vmul.f32 %v1608_v40, %v2152_v12  ;;  %v2156_v18 = vld [vmem:[#allocation7_spill] sm:$0xff] }
  0xea   : > { %v402_v35 = vpop.permute.xlu1 %401 }
  0xed   : > { %v1859_v16 = vpop.permute.xlu0 %745 }
  0xee   : > { %v410_v4 = vpop.permute.xlu1 %409 }
  0xef   : > { %v415_v34 = vsel %vm411_vm2, %v402_v35, %v410_v4  ;;  %v419_v53 = vsel %vm411_vm2, %v410_v4, %v402_v35  ;;  %v586_v35 = vmul.f32 %v1816_v46, %v568_v3  ;;  %v2150_v4 = vld [vmem:[#allocation2_spill] sm:$0xff]  ;;  %v2155_v3 = vld [vmem:[#allocation9_spill] sm:$0xff] }
  0xf0   : > { %v440_v21 = vmul.f32 %v1691_v41, %v415_v34  ;;  %v535_v51 = vmul.f32 %v1608_v40, %v2150_v4 }
  0xf1   : > { %v1890_v26 = vpop.permute.xlu0 %814 }
  0xf2   : > { %v1806_v13 = vpop.permute.xlu1 %623  ;;  %v452_v24 = vmul.f32 %v1557_v19, %v440_v21  ;;  %v664_v21 = vmul.f32 %v2156_v18, %v652_v42 }
  0xf6   : > { %v474_v2 = vpop.permute.xlu1 %473 }
  0xf7   : > { %v480_v39 = vsel %vm477_vm3, %v466_v17, %v474_v2  ;;  %v484_v1 = vsel %vm477_vm3, %v474_v2, %v466_v17  ;;  %v439_v17 = vmul.f32 %v1688_v37, %v419_v53  ;;  %v536_v37 = vmul.f32 %v1608_v40, %v2151_v55  ;;  %v2154_v2 = vld [vmem:[#allocation6_spill] sm:$0xff]  ;;  %v2157_v55 = vld [vmem:[#allocation8_spill] sm:$0xff] }
  0xf8   : > { %v503_v63 = vmul.f32 %v1699_v57, %v484_v1  ;;  %v504_v8 = vmul.f32 %v1702_v59, %v480_v39  ;;  %v597_v39 = vmul.f32 %v2154_v2, %v585_v25  ;;  %v598_v1 = vmul.f32 %v2154_v2, %v586_v35 }
  0xf9   : > { %v451_v61 = vmul.f32 %v1557_v19, %v439_v17  ;;  %v663_v17 = vmul.f32 %v2156_v18, %v651_v43  ;;  %v635_v25 = vsel %vm629_vm5, %v1806_v13, %v1750_v14 }
  0xfa   : > { %v515_v20 = vmul.f32 %v1584_v30, %v503_v63  ;;  %v516_v23 = vmul.f32 %v1584_v30, %v504_v8  ;;  %v688_v29 = vpop.permute.xlu1 %687  ;;  %v569_v63 = vsel %vm563_vm4, %v1766_v32, %v2155_v3 }
  0xfb   : > { %v696_v28 = vsel %vm695_vm6, %v1786_v45, %v688_v29  ;;  %v700_v27 = vsel %vm695_vm6, %v688_v29, %v1786_v45  ;;  %v565_v45 = vsel %vm563_vm4, %v2155_v3, %v1766_v32  ;;  %v588_v35 = vmul.f32 %v1816_v46, %v569_v63 }
  0xfc   : > { %v523_v41 = vadd.f32 %v515_v20, %v457_v56  ;;  %v524_v5 = vadd.f32 %v516_v23, %v458_v54  ;;  %v718_v56 = vmul.f32 %v1833_v0, %v700_v27  ;;  %v459_v54 = vadd.f32 %v451_v61, %v1774_v50 }
  0xfd   : > { %v460_v20 = vadd.f32 %v452_v24, %v1776_v58  ;;  %v606_v50 = vadd.f32 %v598_v1, %v1784_v38  ;;  %v587_v58 = vmul.f32 %v1813_v11, %v565_v45  ;;  %v600_v27 = vmul.f32 %v2154_v2, %v588_v35 }
  0xfe   : > { %v476_v34 = vpop.permute.xlu1 %475  ;;  %v1898_v40 = vadd.f32 %v535_v51, %v523_v41  ;;  %v1900_v53 = vadd.f32 %v536_v37, %v524_v5  ;;  %v730_v41 = vmul.f32 %v2157_v55, %v718_v56 }
  0xff   : > { %v481_v19 = vsel %vm477_vm3, %v1788_v36, %v476_v34  ;;  %v485_v9 = vsel %vm477_vm3, %v476_v34, %v1788_v36  ;;  %v717_v36 = vmul.f32 %v1830_v62, %v696_v28  ;;  %v672_v5 = vadd.f32 %v664_v21, %v606_v50 }
 0x100   : > { %v505_v8 = vmul.f32 %v1699_v57, %v485_v9  ;;  %v506_v10 = vmul.f32 %v1702_v59, %v481_v19  ;;  %v605_v57 = vadd.f32 %v597_v39, %v1782_v49  ;;  %v631_v59 = vsel %vm629_vm5, %v1750_v14, %v1806_v13  ;;  %v2158_v9 = vld [vmem:[#allocation10_spill] sm:$0xff] }
 0x101   : > { %v729_v37 = vmul.f32 %v2157_v55, %v717_v36  ;;  %v653_v12 = vmul.f32 %v1820_v47, %v631_v59  ;;  %v654_v14 = vmul.f32 %v1826_v31, %v635_v25  ;;  %v599_v28 = vmul.f32 %v2154_v2, %v587_v58 }
 0x102   : > { %v517_v23 = vmul.f32 %v1584_v30, %v505_v8  ;;  %v518_v32 = vmul.f32 %v1584_v30, %v506_v10  ;;  %v690_v29 = vpop.permute.xlu1 %689  ;;  %v1940_v30 = vpop.permute.xlu0 %551  ;;  %v671_v51 = vadd.f32 %v663_v17, %v605_v57  ;;  %v738_v34 = vadd.f32 %v730_v41, %v672_v5 }
 0x103   : > { %v697_v43 = vsel %vm695_vm6, %v1804_v60, %v690_v29  ;;  %v701_v42 = vsel %vm695_vm6, %v690_v29, %v1804_v60  ;;  %v665_v63 = vmul.f32 %v2156_v18, %v653_v12  ;;  %v666_v8 = vmul.f32 %v2156_v18, %v654_v14 }
 0x104   : > { %v525_v4 = vadd.f32 %v517_v23, %v459_v54  ;;  %v526_v49 = vadd.f32 %v518_v32, %v460_v20  ;;  %v737_v39 = vadd.f32 %v729_v37, %v671_v51  ;;  %v719_v60 = vmul.f32 %v1830_v62, %v697_v43  ;;  %v1999_v43 = vld [vmem:[%s2127_s4 + $0x8] sm:$0xff] }
 0x105   : > { %v720_v19 = vmul.f32 %v1833_v0, %v701_v42  ;;  %v607_v21 = vadd.f32 %v599_v28, %v1770_v44  ;;  %v608_v36 = vadd.f32 %v600_v27, %v1772_v48 }
 0x106   : > { %v754_v13 = vpop.permute.xlu1 %753  ;;  %v1946_v38 = vadd.f32 %v537_v52, %v525_v4  ;;  %v1948_v6 = vadd.f32 %v538_v15, %v526_v49  ;;  %v1966_v1 = vpop.permute.xlu0 %553  ;;  %v731_v56 = vmul.f32 %v2157_v55, %v719_v60  ;;  %v1989_v4 = vld [vmem:[%s2127_s4] sm:$0xff] }
 0x107   : > { %v762_v61 = vsel %vm761_vm7, %v1859_v16, %v754_v13  ;;  %v766_v24 = vsel %vm761_vm7, %v754_v13, %v1859_v16  ;;  %v732_v54 = vmul.f32 %v2157_v55, %v720_v19  ;;  %v673_v29 = vadd.f32 %v665_v63, %v607_v21 }
 0x108   : > { %v783_v52 = vmul.f32 %v1846_v33, %v762_v61  ;;  %v784_v15 = vmul.f32 %v1849_v7, %v766_v24  ;;  %v674_v25 = vadd.f32 %v666_v8, %v608_v36  ;;  %v2159_v13 = vmov 0.0  }
 0x109   : > { %v739_v5 = vadd.f32 %v731_v56, %v673_v29 }
 0x10a   : > { %v795_v3 = vmul.f32 %v2158_v9, %v783_v52  ;;  %v748_v45 = vpop.permute.xlu1 %747  ;;  %v796_v16 = vmul.f32 %v2158_v9, %v784_v15  ;;  %v618_v44 = vpop.permute.xlu0 %617  ;;  %v740_v37 = vadd.f32 %v732_v54, %v674_v25 }
 0x10c   : > { %v804_v10 = vadd.f32 %v796_v16, %v738_v34  ;;  %v803_v17 = vadd.f32 %v795_v3, %v737_v39 }
 0x10e   : > { %v756_v20 = vpop.permute.xlu1 %755  ;;  %v818_v23 = vadd.f32 %v1890_v26, %v804_v10  ;;  %v817_v32 = vadd.f32 %v1890_v26, %v803_v17  ;;  %v620_v42 = vpop.permute.xlu0 %619 }
 0x10f   : > { %v763_v57 = vsel %vm761_vm7, %v748_v45, %v756_v20  ;;  %v767_v59 = vsel %vm761_vm7, %v756_v20, %v748_v45 }
 0x110   : > { %v785_v48 = vmul.f32 %v1846_v33, %v763_v57  ;;  %v786_v50 = vmul.f32 %v1849_v7, %v767_v59  ;;  %v826_v58 = vmax.f32 %v818_v23, 0.0  ;;  %v825_v35 = vmax.f32 %v817_v32, 0.0 }
 0x112   : > { %v797_v49 = vmul.f32 %v2158_v9, %v785_v48  ;;  %854 = vmatprep.subr.mxu0 %v826_v58  ;;  %v560_v51 = vpop.permute.xlu1 %559  ;;  %v798_v41 = vmul.f32 %v2158_v9, %v786_v50  ;;  %v684_v34 = vpop.permute.xlu0 %683 }
 0x113   : > { %855 = vmatpush1.msra.mxu0 %v825_v35  ;;  %v566_v60 = vsel %vm563_vm4, %v1940_v30, %v560_v51  ;;  %v570_v19 = vsel %vm563_vm4, %v560_v51, %v1940_v30 }
 0x114   : > { %1273 = vmatmul.mubr.msk.f32.vlgmr.msra.gmra.mrb[0].mxu0 %vm847_vm8, %v1989_v4  ;;  %v806_v12 = vadd.f32 %v798_v41, %v740_v37  ;;  %v805_v14 = vadd.f32 %v797_v49, %v739_v5  ;;  %v589_v63 = vmul.f32 %v1813_v11, %v566_v60  ;;  %v590_v8 = vmul.f32 %v1816_v46, %v570_v19 }
 0x115   : > { %924 = vmatprep.mubr.f32.mxu0 %v2159_v13 }
 0x116   : > { %v562_v61 = vpop.permute.xlu1 %561  ;;  %v820_v24 = vadd.f32 %v1890_v26, %v806_v12  ;;  %v819_v52 = vadd.f32 %v1890_v26, %v805_v14  ;;  %v686_v16 = vpop.permute.xlu0 %685  ;;  %v601_v29 = vmul.f32 %v2154_v2, %v589_v63  ;;  %v602_v57 = vmul.f32 %v2154_v2, %v590_v8 }
 0x117   : > { %v567_v10 = vsel %vm563_vm4, %v1966_v1, %v562_v61  ;;  %v571_v30 = vsel %vm563_vm4, %v562_v61, %v1966_v1 }
 0x118   : > { %1274 = vmatmul.mubr.msk.f32.gmra.mrb[2].mxu0 %vm847_vm8, %v1999_v43  ;;  %v828_v15 = vmax.f32 %v820_v24, 0.0  ;;  %v827_v28 = vmax.f32 %v819_v52, 0.0  ;;  %v591_v1 = vmul.f32 %v1813_v11, %v567_v10  ;;  %v592_v32 = vmul.f32 %v1816_v46, %v571_v30 }
 0x119   : > { %1089 = vmatprep.mubr.f32.mxu0 %v2159_v13  ;;  %v610_v5 = vadd.f32 %v602_v57, %v1900_v53 }
 0x11a   : > { %v626_v27 = vpop.permute.xlu1 %625  ;;  %939 = vmatprep.subr.mxu1 %v828_v15  ;;  %v750_v46 = vpop.permute.xlu0 %749  ;;  %v603_v51 = vmul.f32 %v2154_v2, %v591_v1  ;;  %v604_v37 = vmul.f32 %v2154_v2, %v592_v32 }
 0x11b   : > { %940 = vmatpush1.msra.mxu1 %v827_v28  ;;  %v632_v3 = vsel %vm629_vm5, %v618_v44, %v626_v27  ;;  %v636_v45 = vsel %vm629_vm5, %v626_v27, %v618_v44 }
 0x11c   : > { %1275 = vmatmul.mubr.msk.f32.vlgmr.msra.gmra.mrb[0].mxu1 %vm847_vm8, %v1989_v4  ;;  %v655_v56 = vmul.f32 %v1820_v47, %v632_v3  ;;  %v656_v54 = vmul.f32 %v1826_v31, %v636_v45  ;;  %v611_v15 = vadd.f32 %v603_v51, %v1946_v38  ;;  %v612_v28 = vadd.f32 %v604_v37, %v1948_v6 }
 0x11d   : > { %1009 = vmatprep.mubr.f32.mxu1 %v2159_v13 }
 0x11e   : > { %v628_v39 = vpop.permute.xlu1 %627  ;;  %v667_v35 = vmul.f32 %v2156_v18, %v655_v56  ;;  %v668_v49 = vmul.f32 %v2156_v18, %v656_v54 }
 0x11f   : > { %v633_v20 = vsel %vm629_vm5, %v620_v42, %v628_v39  ;;  %v637_v23 = vsel %vm629_vm5, %v628_v39, %v620_v42 }
 0x120   : > { %1276 = vmatmul.mubr.msk.f32.gmra.mrb[2].mxu1 %vm847_vm8, %v1999_v43  ;;  %v657_v48 = vmul.f32 %v1820_v47, %v633_v20  ;;  %v658_v50 = vmul.f32 %v1826_v31, %v637_v23  ;;  %v609_v31 = vadd.f32 %v601_v29, %v1898_v40  ;;  %v676_v52 = vadd.f32 %v668_v49, %v610_v5 }
 0x121   : > { %1175 = vmatprep.mubr.f32.mxu1 %v2159_v13 }
 0x122   : > { %v692_v17 = vpop.permute.xlu1 %691  ;;  %v669_v61 = vmul.f32 %v2156_v18, %v657_v48  ;;  %v670_v24 = vmul.f32 %v2156_v18, %v658_v50 }
 0x123   : > { %v698_v21 = vsel %vm695_vm6, %v684_v34, %v692_v17  ;;  %v702_v36 = vsel %vm695_vm6, %v692_v17, %v684_v34  ;;  %v752_v34 = vpop.permute.xlu0 %751 }
 0x124   : > { %v721_v59 = vmul.f32 %v1830_v62, %v698_v21  ;;  %v722_v25 = vmul.f32 %v1833_v0, %v702_v36  ;;  %v678_v63 = vadd.f32 %v670_v24, %v612_v28 }
 0x126   : > { %v694_v44 = vpop.permute.xlu1 %693  ;;  %v733_v12 = vmul.f32 %v2157_v55, %v721_v59  ;;  %v734_v14 = vmul.f32 %v2157_v55, %v722_v25 }
 0x127   : > { %v699_v58 = vsel %vm695_vm6, %v686_v16, %v694_v44  ;;  %v703_v11 = vsel %vm695_vm6, %v694_v44, %v686_v16  ;;  %v677_v16 = vadd.f32 %v669_v61, %v611_v15 }
 0x128   : > { %v723_v41 = vmul.f32 %v1830_v62, %v699_v58  ;;  %v724_v47 = vmul.f32 %v1833_v0, %v703_v11  ;;  %v675_v0 = vadd.f32 %v667_v35, %v609_v31  ;;  %v742_v60 = vadd.f32 %v734_v14, %v676_v52 }
 0x12a   : > { %v758_v42 = vpop.permute.xlu1 %757  ;;  %v735_v27 = vmul.f32 %v2157_v55, %v723_v41  ;;  %v736_v18 = vmul.f32 %v2157_v55, %v724_v47  ;;  %v741_v39 = vadd.f32 %v733_v12, %v675_v0 }
 0x12b   : > { %v764_v2 = vsel %vm761_vm7, %v750_v46, %v758_v42  ;;  %v768_v62 = vsel %vm761_vm7, %v758_v42, %v750_v46 }
 0x12c   : > { %v787_v40 = vmul.f32 %v1846_v33, %v764_v2  ;;  %v788_v53 = vmul.f32 %v1849_v7, %v768_v62  ;;  %v743_v17 = vadd.f32 %v735_v27, %v677_v16  ;;  %v744_v21 = vadd.f32 %v736_v18, %v678_v63 }
 0x12e   : > { %v799_v19 = vmul.f32 %v2158_v9, %v787_v40  ;;  %v800_v3 = vmul.f32 %v2158_v9, %v788_v53  ;;  %v760_v45 = vpop.permute.xlu1 %759 }
 0x12f   : > { %v765_v8 = vsel %vm761_vm7, %v752_v34, %v760_v45  ;;  %v769_v38 = vsel %vm761_vm7, %v760_v45, %v752_v34 }
 0x130   : > { %v807_v6 = vadd.f32 %v799_v19, %v741_v39  ;;  %v789_v10 = vmul.f32 %v1846_v33, %v765_v8  ;;  %v790_v55 = vmul.f32 %v1849_v7, %v769_v38  ;;  %v808_v30 = vadd.f32 %v800_v3, %v742_v60 }
 0x132   : > { %v801_v36 = vmul.f32 %v2158_v9, %v789_v10  ;;  %v802_v56 = vmul.f32 %v2158_v9, %v790_v55  ;;  %v822_v54 = vadd.f32 %v1890_v26, %v808_v30  ;;  %v821_v20 = vadd.f32 %v1890_v26, %v807_v6 }
 0x133   : > { %v845_v44 = vpop.permute.xlu1 %844 }
 0x134   : > { %v809_v23 = vadd.f32 %v801_v36, %v743_v17  ;;  %v830_v1 = vmax.f32 %v822_v54, 0.0  ;;  %v829_v22 = vmax.f32 %v821_v20, 0.0  ;;  %v810_v32 = vadd.f32 %v802_v56, %v744_v21 }
 0x136   : > { %1025 = vmatprep.subr.mxu0 %v830_v1  ;;  %v824_v33 = vadd.f32 %v1890_v26, %v810_v32  ;;  %v823_v7 = vadd.f32 %v1890_v26, %v809_v23  ;;  %v840_v26 = vpop.permute.xlu0 %839 }
 0x137   : > { %1026 = vmatpush1.msra.mxu0 %v829_v22 }
 0x138   : > { %1281 = vmatmul.mubr.msk.f32.vlgmr.msra.gmra.mrb[4].mxu0 %vm847_vm8, %v1989_v4  ;;  %v832_v29 = vmax.f32 %v824_v33, 0.0  ;;  %v831_v9 = vmax.f32 %v823_v7, 0.0 }
 0x139   : > { %1095 = vmatprep.mubr.f32.mxu0 %v2159_v13 }
 0x13a   : > { %1111 = vmatprep.subr.mxu1 %v832_v29 }
 0x13b   : > { %1112 = vmatpush1.msra.mxu1 %v831_v9 }
 0x13c   : > { %1287 = vmatmul.mubr.msk.f32.vlgmr.msra.gmra.mrb[4].mxu1 %vm847_vm8, %v1989_v4  ;;  %1282 = vmatmul.mubr.msk.f32.gmra.mrb[6].mxu0 %vm847_vm8, %v1999_v43 }
 0x13d   : > { %1181 = vmatprep.mubr.f32.mxu1 %v2159_v13 }
 0x140   : > { %1288 = vmatmul.mubr.msk.f32.gmra.mrb[6].mxu1 %vm847_vm8, %v1999_v43 }
 0x1e7   : > { %v920_v57 = vpop.f32.mrb[0].mxu0 }
 0x1e8   : > { %v921_v59 = vadd.f32 %v920_v57, %v840_v26  ;;  %v922_v25 = vpop.f32.mrb[1].mxu0 }
 0x1e9   : > { %v923_v4 = vadd.f32 %v922_v25, %v840_v26 }
 0x1ea   : > { %v931_v13 = vmax.f32 %v921_v59, 0.0 }
 0x1eb   : > { %v932_v48 = vmax.f32 %v923_v4, 0.0  ;;  %v926_v50 = vpop.f32.mrb[2].mxu0 }
 0x1ec   : > { %935 = vst [vmem:[%s2102_s22] sm:$0xff] %v931_v13  ;;  %v928_v43 = vpop.f32.mrb[3].mxu0  ;;  %v927_v58 = vadd.f32 %v926_v50, %v845_v44 }
 0x1ed   : > { %936 = vst [vmem:[%s2102_s22 + $0x8] sm:$0xff] %v932_v48  ;;  %v929_v11 = vadd.f32 %v928_v43, %v845_v44 }
 0x1ee   : > { %v933_v46 = vmax.f32 %v927_v58, 0.0 }
 0x1ef   : > { %v934_v35 = vmax.f32 %v929_v11, 0.0  ;;  %v1005_v49 = vpop.f32.mrb[0].mxu1 }
 0x1f0   : > { %937 = vst [vmem:[%s2102_s22 + $0x10] sm:$0xff] %v933_v46  ;;  %v1006_v51 = vadd.f32 %v1005_v49, %v840_v26  ;;  %v1007_v37 = vpop.f32.mrb[1].mxu1 }
 0x1f1   : > { %938 = vst [vmem:[%s2102_s22 + $0x18] sm:$0xff] %v934_v35  ;;  %v1008_v41 = vadd.f32 %v1007_v37, %v840_v26 }
 0x1f2   : > { %v1016_v47 = vmax.f32 %v1006_v51, 0.0 }
 0x1f3   : > { %v1017_v31 = vmax.f32 %v1008_v41, 0.0  ;;  %v1011_v5 = vpop.f32.mrb[2].mxu1 }
 0x1f4   : > { %1277 = vst [vmem:[%s2102_s22 + $0x20] sm:$0xff] %v1016_v47  ;;  %v1013_v12 = vpop.f32.mrb[3].mxu1  ;;  %v1012_v14 = vadd.f32 %v1011_v5, %v845_v44 }
 0x1f5   : > { %1278 = vst [vmem:[%s2102_s22 + $0x28] sm:$0xff] %v1017_v31  ;;  %v1014_v42 = vadd.f32 %v1013_v12, %v845_v44 }
 0x1f6   : > { %v1018_v61 = vmax.f32 %v1012_v14, 0.0 }
 0x1f7   : > { %v1019_v24 = vmax.f32 %v1014_v42, 0.0 }
 0x1f8   : > { %1279 = vst [vmem:[%s2102_s22 + $0x30] sm:$0xff] %v1018_v61 }
 0x1f9   : > { %1280 = vst [vmem:[%s2102_s22 + $0x38] sm:$0xff] %v1019_v24 }
 0x20b   : > { %v1091_v2 = vpop.f32.mrb[4].mxu0 }
 0x20c   : > { %v1092_v62 = vadd.f32 %v1091_v2, %v840_v26  ;;  %v1093_v0 = vpop.f32.mrb[5].mxu0 }
 0x20d   : > { %v1094_v52 = vadd.f32 %v1093_v0, %v840_v26 }
 0x20e   : > { %v1102_v40 = vmax.f32 %v1092_v62, 0.0 }
 0x20f   : > { %v1103_v53 = vmax.f32 %v1094_v52, 0.0  ;;  %v1177_v15 = vpop.f32.mrb[4].mxu1  ;;  %v1097_v28 = vpop.f32.mrb[6].mxu0 }
 0x210   : > { %1283 = vst [vmem:[%s2102_s22 + $0x40] sm:$0xff] %v1102_v40  ;;  %v1178_v27 = vadd.f32 %v1177_v15, %v840_v26  ;;  %v1179_v18 = vpop.f32.mrb[5].mxu1  ;;  %v1098_v34 = vadd.f32 %v1097_v28, %v845_v44  ;;  %v1099_v39 = vpop.f32.mrb[7].mxu0 }
 0x211   : > { %1284 = vst [vmem:[%s2102_s22 + $0x48] sm:$0xff] %v1103_v53  ;;  %v1180_v60 = vadd.f32 %v1179_v18, %v840_v26  ;;  %v1100_v19 = vadd.f32 %v1099_v39, %v845_v44 }
 0x212   : > { %v1188_v3 = vmax.f32 %v1178_v27, 0.0  ;;  %v1104_v45 = vmax.f32 %v1098_v34, 0.0 }
 0x213   : > { %v1189_v16 = vmax.f32 %v1180_v60, 0.0  ;;  %v1105_v63 = vmax.f32 %v1100_v19, 0.0  ;;  %v1183_v8 = vpop.f32.mrb[6].mxu1 }
 0x214   : > { %1289 = vst [vmem:[%s2102_s22 + $0x60] sm:$0xff] %v1188_v3  ;;  %1285 = vst [vmem:[%s2102_s22 + $0x50] sm:$0xff] %v1104_v45  ;;  %v1184_v38 = vadd.f32 %v1183_v8, %v845_v44  ;;  %v1185_v6 = vpop.f32.mrb[7].mxu1 }
 0x215   : > { %1290 = vst [vmem:[%s2102_s22 + $0x68] sm:$0xff] %v1189_v16  ;;  %1286 = vst [vmem:[%s2102_s22 + $0x58] sm:$0xff] %v1105_v63  ;;  %v1186_v10 = vadd.f32 %v1185_v6, %v845_v44 }
 0x216   : > { %v1190_v55 = vmax.f32 %v1184_v38, 0.0 }
 0x217   : > { %v1191_v30 = vmax.f32 %v1186_v10, 0.0 }
 0x218   : > { %1291 = vst [vmem:[%s2102_s22 + $0x70] sm:$0xff] %v1190_v55 }
 0x219   : > { %1292 = vst [vmem:[%s2102_s22 + $0x78] sm:$0xff] %v1191_v30 }
 0x21a PF: > { %s16_s21 = sadd.s32 1, %s1339_s21  }
 0x21b   : > { %p13_p4 = scmp.ge.s32.totalorder %s16_s21, 4  }
 0x21d   :  { %15 = sbr.rel (!%p13_p4) target bundleno = 1 (0x1), region = 84 }

// kernel: dilated_ir_block.4
= control target key start
LH: loop header
LB: loop body
LE: loop exit
PB: predicated region body
PF: predicated region fallthrough
CT: control target
= control target key end

     0   :  { %s1426_s21 = smov 0   ;;  %s2128_s0 = inlined_call_operand.vmem [shape: f32[8,8,256], index: 0, kind: input, shape index: {}]   ;;  %s2129_s1 = inlined_call_operand.vmem [shape: f32[9,256], index: 1, kind: input, shape index: {}]   ;;  %s2130_s2 = inlined_call_operand.vmem [shape: f32[8,9], index: 2, kind: input, shape index: {}]   ;;  %s2131_s3 = inlined_call_operand.vmem [shape: f32[8,1], index: 3, kind: input, shape index: {}]   ;;  %s2132_s4 = inlined_call_operand.vmem [shape: f32[16,8], index: 4, kind: input, shape index: {}]   ;;  %s2133_s5 = inlined_call_operand.vmem [shape: f32[16,1], index: 5, kind: input, shape index: {}]   ;;  %s2134_s6 = inlined_call_operand.vmem [shape: f32[2,16,2], index: 6, kind: output, shape index: {}]  }
   0x1 LB: > { %s1432_s22 = sadd.s32 4294967295, %s1371_s21   ;;  %p1304_p0 = scmp.ge.s32.totalorder %s1371_s21, 1  ;;  %s1371_s21 = sphi %s1426_s21, %s16_s21  }
   0x2   : > { %p214_p1 = scmp.lt.s32.totalorder %s1371_s21, 3 }
   0x4   : > { %p215_p2 = pnand %p1304_p0, %p214_p1 }
   0x6   : > { %218 = sbr.rel (%p215_p2) target bundleno = 690 (0x2b2), region = 44 }
   0xd   : > { %v1439_v0 = vld [vmem:[%s2130_s2] sm:$0xff]  ;;  %s1305_s25 = sshll.u32 %s1432_s22, 2  ;;  %v1373_v1 = vmov 2   ;;  %v1374_v2 = vmov 1   ;;  %v1375_v3 = vmov 3   ;;  %v1376_v4 = vmov 0  }
   0xe   : > { %1356 = vset.pattern.permute.xlu1 %v1373_v1  ;;  %1355 = vset.pattern.permute.xlu0 %v1374_v2  ;;  %p246_p3 = scmp.lt.s32.totalorder %s1305_s25, 7  ;;  %s1377_s30 = smov 32   ;;  %v1379_v8 = vmov 4   ;;  %v1382_v10 = vmov 5   ;;  %v1383_v11 = vmov 6   ;;  %v1384_v13 = vmov 7  }
   0xf   : > { %439 = vperm.xlu1 %1356, %v1439_v0   ;;  %373 = vperm.xlu0 %1355, %v1439_v0   ;;  %s1378_s7 = smov 34   ;;  %s1380_s8 = smov 30   ;;  %v1386_v15 = vmov 8   ;;  %v808_v18 = vld [vmem:[%s2131_s3] sm:$0xff]  ;;  %v282_v21 = vlaneseq  ;;  %v2135_v26 = vmov 0.0   ;;  %v833_v62 = vld [vmem:[%s2133_s5 + $0x8] sm:$0xff] }
  0x10   : > { %s2169_s25 = smov (!%p246_p3, %s1305_s25), 7  ;;  %s1381_s9 = smov 2   ;;  %v832_v25 = vld [vmem:[%s2133_s5] sm:$0xff]  ;;  %915 = vmatprep.mubr.f32.mxu0 %v2135_v26  ;;  %1012 = vmatprep.mubr.f32.mxu1 %v2135_v26  ;;  %vm844_vm8 = vcmask 64512   ;;  %vm1239_vm9 = vcmask 7168   ;;  %vm1242_vm10 = vcmask 15368  }
  0x11   : > { %s1327_s26 = sshll.u32 %s2169_s25, 4  ;;  %s1385_s10 = smov 126   ;;  %v1595_v22 = vand.u32 127, %v282_v21  ;;  %v296_v63 = vshrl.u32 %v282_v21, 7 }
  0x12   : > { %s1447_s29 = scalar_lea.vmem %s2128_s0, %s1327_s26  ;;  %s1387_s11 = smov 98   ;;  %v1310_v2 = vld [vmem:[%s2129_s1 + $0x1] ss:$8 sm:$0x3] }
  0x13   : > { %1357 = vset.pattern.permute.xlu0 %v1375_v3  ;;  %1364 = vset.pattern.permute.xlu1 %v1376_v4  ;;  %v1450_v5 = vld [vmem:[%s1447_s29] sm:$0xff]  ;;  %v1457_v6 = vld [vmem:[%s1447_s29 + $0x8] sm:$0xff]  ;;  %v1463_v7 = vld [vmem:[%s1447_s29 + $0x10] sm:$0xff]  ;;  %s1388_s12 = smov 96   ;;  %s1389_s13 = smov 94   ;;  %vm284_vm0 = vcmp.lt.s32.totalorder %v1595_v22, 34 }
  0x14   : > { %326 = vrot.lane.b32.xlu0 %v1450_v5, %s1377_s30  ;;  %266 = vrot.lane.b32.xlu1 %v1450_v5, %s1378_s7  ;;  %v1474_v9 = vld [vmem:[%s1447_s29 + $0x18] sm:$0xff]  ;;  %v1490_v12 = vld [vmem:[%s1447_s29 + $0x20] sm:$0xff]  ;;  %vm342_vm1 = vcmp.lt.s32.totalorder %v1595_v22, 32  ;;  %vm408_vm2 = vcmp.lt.s32.totalorder %v1595_v22, 30  ;;  %vm474_vm3 = vcmp.lt.s32.totalorder %v1595_v22, 2  ;;  %v1688_v3 = vsub.s32 0, %v296_v63 }
  0x15   : > { %v1504_v14 = vld [vmem:[%s1447_s29 + $0x30] sm:$0xff]  ;;  %v1515_v16 = vld [vmem:[%s1447_s29 + $0x28] sm:$0xff]  ;;  %v1531_v17 = vld [vmem:[%s1447_s29 + $0x38] sm:$0xff]  ;;  %vm560_vm4 = vcmp.lt.s32.totalorder %v1595_v22, 126  ;;  %vm626_vm5 = vcmp.lt.s32.totalorder %v1595_v22, 98  ;;  %vm692_vm6 = vcmp.lt.s32.totalorder %v1595_v22, 96 }
  0x16   : > { %2147 = vst [vmem:[#allocation2_spill] sm:$0xff] %v1504_v14  ;;  %2148 = vst [vmem:[#allocation3_spill] sm:$0xff] %v1531_v17  ;;  %vm758_vm7 = vcmp.lt.s32.totalorder %v1595_v22, 94  ;;  %p252_p4 = scmp.lt.s32.totalorder %s1432_s22, 1 }
  0x18   : > { %505 = vperm.xlu0 %1357, %v1439_v0   ;;  %274 = vrot.lane.b32.xlu1 %v1457_v6, %s1378_s7  ;;  %s2171_s22 = smov (!%p252_p4, %s1432_s22), 1 }
  0x19   : > { %s1328_s18 = sshll.u32 %s2171_s22, 4 }
  0x1a   : > { %s256_s23 = scalar_lea.vmem %s2134_s6, %s1328_s18 }
  0x1c   : > { %328 = vrot.lane.b32.xlu0 %v1463_v7, %s1377_s30  ;;  %334 = vrot.lane.b32.xlu1 %v1457_v6, %s1377_s30 }
  0x1d   : > { %1358 = vset.pattern.permute.xlu0 %v1379_v8 }
  0x20   : > { %392 = vrot.lane.b32.xlu0 %v1450_v5, %s1380_s8  ;;  %268 = vrot.lane.b32.xlu1 %v1463_v7, %s1378_s7 }
  0x24   : > { %525 = vperm.xlu0 %1358, %v1439_v0   ;;  %276 = vrot.lane.b32.xlu1 %v1474_v9, %s1378_s7 }
  0x28   : > { %458 = vrot.lane.b32.xlu0 %v1450_v5, %s1381_s9  ;;  %336 = vrot.lane.b32.xlu1 %v1474_v9, %s1377_s30 }
  0x29   : > { %1359 = vset.pattern.permute.xlu0 %v1382_v10 }
  0x2c   : > { %591 = vperm.xlu0 %1359, %v1439_v0   ;;  %400 = vrot.lane.b32.xlu1 %v1457_v6, %s1380_s8 }
  0x30   : > { %1360 = vset.pattern.permute.xlu0 %v1383_v11  ;;  %394 = vrot.lane.b32.xlu1 %v1463_v7, %s1380_s8  ;;  %v293_v11 = vld [vmem:[%s2129_s1] ss:$8 sm:$0x3] }
  0x31   : > { %657 = vperm.xlu0 %1360, %v1439_v0  }
  0x34   : > { %402 = vrot.lane.b32.xlu1 %v1474_v9, %s1380_s8 }
  0x35   : > { %330 = vrot.lane.b32.xlu0 %v1490_v12, %s1377_s30 }
  0x36   : > { %1361 = vset.pattern.permute.xlu0 %v1384_v13  ;;  %v1698_v13 = vrot.slane %v1310_v2, %v1688_v3 }
  0x38   : > { %466 = vrot.lane.b32.xlu1 %v1457_v6, %s1381_s9 }
  0x39   : > { %544 = vrot.lane.b32.xlu0 %v1450_v5, %s1385_s10 }
  0x3c   : > { %460 = vrot.lane.b32.xlu1 %v1463_v7, %s1381_s9 }
  0x3d   : > { %723 = vperm.xlu0 %1361, %v1439_v0  }
  0x40   : > { %468 = vrot.lane.b32.xlu1 %v1474_v9, %s1381_s9 }
  0x41   : > { %332 = vrot.lane.b32.xlu0 %v1504_v14, %s1377_s30 }
  0x42   : > { %1362 = vset.pattern.permute.xlu0 %v1386_v15 }
  0x44   : > { %270 = vrot.lane.b32.xlu1 %v1490_v12, %s1378_s7 }
  0x45   : > { %396 = vrot.lane.b32.xlu0 %v1490_v12, %s1380_s8 }
  0x48   : > { %278 = vrot.lane.b32.xlu1 %v1515_v16, %s1378_s7 }
  0x49   : > { %546 = vrot.lane.b32.xlu0 %v1463_v7, %s1385_s10 }
  0x4c   : > { %338 = vrot.lane.b32.xlu1 %v1515_v16, %s1377_s30 }
  0x4d   : > { %610 = vrot.lane.b32.xlu0 %v1450_v5, %s1387_s11 }
  0x50   : > { %552 = vrot.lane.b32.xlu1 %v1457_v6, %s1385_s10 }
  0x51   : > { %789 = vperm.xlu0 %1362, %v1439_v0  }
  0x54   : > { %272 = vrot.lane.b32.xlu1 %v1504_v14, %s1378_s7 }
  0x55   : > { %1363 = vset.pattern.permute.xlu0 %v1376_v4  ;;  %v1690_v4 = vsub.s32 1, %v296_v63 }
  0x56   : > { %315 = vperm.xlu0 %1363, %v1439_v0  }
  0x57   : > { %v1701_v15 = vrot.slane %v1310_v2, %v1690_v4 }
  0x58   : > { %280 = vrot.lane.b32.xlu1 %v1531_v17, %s1378_s7 }
  0x5a   : > { %462 = vrot.lane.b32.xlu0 %v1490_v12, %s1381_s9 }
  0x5c   : > { %340 = vrot.lane.b32.xlu1 %v1531_v17, %s1377_s30 }
  0x5e   : > { %612 = vrot.lane.b32.xlu0 %v1463_v7, %s1387_s11 }
  0x60   : > { %404 = vrot.lane.b32.xlu1 %v1515_v16, %s1380_s8 }
  0x62   : > { %676 = vrot.lane.b32.xlu0 %v1450_v5, %s1388_s12 }
  0x64   : > { %554 = vrot.lane.b32.xlu1 %v1474_v9, %s1385_s10 }
  0x66   : > { %464 = vrot.lane.b32.xlu0 %v1504_v14, %s1381_s9 }
  0x68   : > { %618 = vrot.lane.b32.xlu1 %v1457_v6, %s1387_s11 }
  0x6a   : > { %678 = vrot.lane.b32.xlu0 %v1463_v7, %s1388_s12 }
  0x6c   : > { %398 = vrot.lane.b32.xlu1 %v1504_v14, %s1380_s8 }
  0x6e   : > { %742 = vrot.lane.b32.xlu0 %v1450_v5, %s1389_s13 }
  0x70   : > { %406 = vrot.lane.b32.xlu1 %v1531_v17, %s1380_s8 }
  0x72   : > { %811 = vperm.xlu0 %1363, %v808_v18  }
  0x74   : > { %470 = vrot.lane.b32.xlu1 %v1515_v16, %s1381_s9 }
  0x76   : > { %744 = vrot.lane.b32.xlu0 %v1463_v7, %s1389_s13 }
  0x78   : > { %620 = vrot.lane.b32.xlu1 %v1474_v9, %s1387_s11 }
  0x7a   : > { %550 = vrot.lane.b32.xlu0 %v1504_v14, %s1385_s10 }
  0x7c   : > { %684 = vrot.lane.b32.xlu1 %v1457_v6, %s1388_s12 }
  0x7e   : > { %614 = vrot.lane.b32.xlu0 %v1490_v12, %s1387_s11 }
  0x80   : > { %472 = vrot.lane.b32.xlu1 %v1531_v17, %s1381_s9 }
  0x82   : > { %616 = vrot.lane.b32.xlu0 %v1504_v14, %s1387_s11 }
  0x84   : > { %686 = vrot.lane.b32.xlu1 %v1474_v9, %s1388_s12 }
  0x86   : > { %680 = vrot.lane.b32.xlu0 %v1490_v12, %s1388_s12 }
  0x88   : > { %750 = vrot.lane.b32.xlu1 %v1457_v6, %s1389_s13 }
  0x8a   : > { %682 = vrot.lane.b32.xlu0 %v1504_v14, %s1388_s12 }
  0x8c   : > { %548 = vrot.lane.b32.xlu1 %v1490_v12, %s1385_s10 }
  0x8e   : > { %v1589_v19 = vpop.permute.xlu1 %439  ;;  %v1591_v20 = vpop.permute.xlu0 %373  ;;  %746 = vrot.lane.b32.xlu0 %v1490_v12, %s1389_s13 }
  0x90   : > { %556 = vrot.lane.b32.xlu1 %v1515_v16, %s1385_s10 }
  0x92   : > { %v267_v23 = vpop.permute.xlu1 %266  ;;  %v327_v24 = vpop.permute.xlu0 %326  ;;  %748 = vrot.lane.b32.xlu0 %v1504_v14, %s1389_s13 }
  0x94   : > { %752 = vrot.lane.b32.xlu1 %v1474_v9, %s1389_s13 }
  0x96   : > { %v275_v27 = vpop.permute.xlu1 %274  ;;  %836 = vperm.xlu0 %1363, %v832_v25   ;;  %v298_v25 = vrot.slane %v293_v11, %v1688_v3 }
  0x97   : > { %v1611_v28 = vsel %vm284_vm0, %v267_v23, %v275_v27  ;;  %v1615_v29 = vsel %vm284_vm0, %v275_v27, %v267_v23  ;;  %v1617_v30 = vpop.permute.xlu0 %505  ;;  %v1311_v23 = vld [vmem:[%s2129_s1 + $0x2] ss:$8 sm:$0x3]  ;;  %v302_v27 = vrot.slane %v293_v11, %v1690_v4 }
  0x98   : > { %558 = vrot.lane.b32.xlu1 %v1531_v17, %s1385_s10 }
  0x9a   : > { %v335_v31 = vpop.permute.xlu1 %334 }
  0x9b   : > { %v343_v32 = vsel %vm342_vm1, %v327_v24, %v335_v31  ;;  %v347_v33 = vsel %vm342_vm1, %v335_v31, %v327_v24  ;;  %v329_v34 = vpop.permute.xlu0 %328  ;;  %v1312_v31 = vld [vmem:[%s2129_s1 + $0x3] ss:$8 sm:$0x3] }
  0x9c   : > { %622 = vrot.lane.b32.xlu1 %v1515_v16, %s1387_s11 }
  0x9e   : > { %v269_v35 = vpop.permute.xlu1 %268 }
  0x9f   : > { %v393_v36 = vpop.permute.xlu0 %392 }
  0xa0   : > { %624 = vrot.lane.b32.xlu1 %v1531_v17, %s1387_s11 }
  0xa2   : > { %v277_v37 = vpop.permute.xlu1 %276 }
  0xa3   : > { %v1632_v38 = vsel %vm284_vm0, %v269_v35, %v277_v37  ;;  %v1636_v39 = vsel %vm284_vm0, %v277_v37, %v269_v35  ;;  %v1638_v40 = vpop.permute.xlu0 %525  ;;  %v364_v35 = vmul.f32 %v1698_v13, %v347_v33 }
  0xa4   : > { %688 = vrot.lane.b32.xlu1 %v1515_v16, %s1388_s12 }
  0xa6   : > { %v337_v41 = vpop.permute.xlu1 %336 }
  0xa7   : > { %v1644_v42 = vsel %vm342_vm1, %v329_v34, %v337_v41  ;;  %v348_v43 = vsel %vm342_vm1, %v337_v41, %v329_v34  ;;  %v459_v44 = vpop.permute.xlu0 %458 }
  0xa8   : > { %690 = vrot.lane.b32.xlu1 %v1531_v17, %s1388_s12  ;;  %v367_v11 = vmul.f32 %v1701_v15, %v1644_v42 }
  0xaa   : > { %v401_v45 = vpop.permute.xlu1 %400 }
  0xab   : > { %v409_v46 = vsel %vm408_vm2, %v393_v36, %v401_v45  ;;  %v413_v47 = vsel %vm408_vm2, %v401_v45, %v393_v36  ;;  %v1655_v48 = vpop.permute.xlu0 %591  ;;  %v365_v36 = vmul.f32 %v1701_v15, %v343_v32  ;;  %v1724_v45 = vrot.slane %v1311_v23, %v1688_v3 }
  0xac   : > { %2149 = vst [vmem:[#allocation4_spill] sm:$0xff] %v1655_v48  ;;  %754 = vrot.lane.b32.xlu1 %v1515_v16, %s1389_s13  ;;  %v305_v32 = vmul.f32 %v298_v25, %v1615_v29 }
  0xad   : > { %v377_v2 = vmul.f32 %v1591_v20, %v365_v36  ;;  %v430_v29 = vmul.f32 %v1724_v45, %v413_v47 }
  0xae   : > { %v395_v49 = vpop.permute.xlu1 %394 }
  0xb0   : > { %v1659_v50 = vpop.permute.xlu0 %657  ;;  %756 = vrot.lane.b32.xlu1 %v1531_v17, %s1389_s13 }
  0xb1   : > { %2150 = vst [vmem:[#allocation5_spill] sm:$0xff] %v1659_v50 }
  0xb2   : > { %v403_v51 = vpop.permute.xlu1 %402 }
  0xb3   : > { %v410_v52 = vsel %vm408_vm2, %v395_v49, %v403_v51  ;;  %v414_v53 = vsel %vm408_vm2, %v403_v51, %v395_v49  ;;  %v1727_v49 = vrot.slane %v1311_v23, %v1690_v4  ;;  %v1730_v51 = vrot.slane %v1312_v31, %v1688_v3 }
  0xb4   : > { %v331_v54 = vpop.permute.xlu0 %330  ;;  %841 = vperm.xlu1 %1364, %v833_v62   ;;  %v432_v23 = vmul.f32 %v1724_v45, %v414_v53  ;;  %v528_v53 = vmul.f32 %v1638_v40, %v1450_v5 }
  0xb6   : > { %v467_v55 = vpop.permute.xlu1 %466 }
  0xb7   : > { %v479_v62 = vsel %vm474_vm3, %v467_v55, %v459_v44 }
  0xb8   : > { %v1667_v56 = vpop.permute.xlu0 %544 }
  0xb9   : > { %2151 = vst [vmem:[#allocation6_spill] sm:$0xff] %v1667_v56 }
  0xba   : > { %v461_v57 = vpop.permute.xlu1 %460 }
  0xbc   : > { %v1669_v58 = vpop.permute.xlu0 %723 }
  0xbd   : > { %2152 = vst [vmem:[#allocation7_spill] sm:$0xff] %v1669_v58 }
  0xbe   : > { %v469_v59 = vpop.permute.xlu1 %468 }
  0xbf   : > { %v1674_v60 = vsel %vm474_vm3, %v461_v57, %v469_v59  ;;  %v1678_v61 = vsel %vm474_vm3, %v469_v59, %v461_v57  ;;  %v1733_v57 = vrot.slane %v1312_v31, %v1690_v4  ;;  %v306_v59 = vmul.f32 %v302_v27, %v1611_v28 }
  0xc0   : > { %v1683_v0 = vpop.permute.xlu0 %332  ;;  %v431_v28 = vmul.f32 %v1727_v49, %v409_v46  ;;  %v433_v31 = vmul.f32 %v1727_v49, %v410_v52  ;;  %v1764_v46 = vmul.f32 %v1638_v40, %v1463_v7  ;;  %v379_v52 = vmul.f32 %v1591_v20, %v367_v11 }
  0xc1   : > { %v444_v7 = vmul.f32 %v1589_v19, %v432_v23  ;;  %v498_v5 = vmul.f32 %v1730_v51, %v1678_v61 }
  0xc2   : > { %v271_v1 = vpop.permute.xlu1 %270 }
  0xc4   : > { %v1692_v8 = vpop.permute.xlu0 %396 }
  0xc6   : > { %v279_v10 = vpop.permute.xlu1 %278 }
  0xc7   : > { %v287_v18 = vsel %vm284_vm0, %v271_v1, %v279_v10  ;;  %v291_v21 = vsel %vm284_vm0, %v279_v10, %v271_v1  ;;  %v376_v1 = vmul.f32 %v1591_v20, %v364_v35  ;;  %v366_v10 = vmul.f32 %v1698_v13, %v348_v43 }
  0xc8   : > { %v1710_v24 = vpop.permute.xlu0 %546  ;;  %v309_v26 = vmul.f32 %v298_v25, %v291_v21  ;;  %v310_v11 = vmul.f32 %v302_v27, %v287_v18 }
  0xc9   : > { %2153 = vst [vmem:[#allocation8_spill] sm:$0xff] %v1710_v24 }
  0xca   : > { %v339_v34 = vpop.permute.xlu1 %338 }
  0xcb   : > { %v345_v37 = vsel %vm342_vm1, %v331_v54, %v339_v34  ;;  %v349_v41 = vsel %vm342_vm1, %v339_v34, %v331_v54  ;;  %v475_v54 = vsel %vm474_vm3, %v459_v44, %v467_v55  ;;  %v307_v44 = vmul.f32 %v298_v25, %v1636_v39 }
  0xcc   : > { %v1735_v33 = vpop.permute.xlu0 %610  ;;  %v308_v55 = vmul.f32 %v302_v27, %v1632_v38  ;;  %v496_v34 = vmul.f32 %v1730_v51, %v479_v62  ;;  %v497_v35 = vmul.f32 %v1733_v57, %v475_v54  ;;  %v368_v42 = vmul.f32 %v1698_v13, %v349_v41 }
  0xcd   : > { %2154 = vst [vmem:[#allocation9_spill] sm:$0xff] %v1735_v33  ;;  %v369_v47 = vmul.f32 %v1701_v15, %v345_v37  ;;  %v1768_v39 = vmul.f32 %v1638_v40, %v1474_v9  ;;  %v378_v38 = vmul.f32 %v1591_v20, %v366_v10  ;;  %v529_v41 = vmul.f32 %v1638_v40, %v1457_v6 }
  0xce   : > { %v1743_v63 = vpop.permute.xlu1 %552  ;;  %v442_v37 = vmul.f32 %v1589_v19, %v430_v29  ;;  %v443_v54 = vmul.f32 %v1589_v19, %v431_v28  ;;  %v445_v62 = vmul.f32 %v1589_v19, %v433_v31  ;;  %v508_v9 = vmul.f32 %v1617_v30, %v496_v34 }
  0xcf   : > { %2155 = vst [vmem:[#allocation10_spill] sm:$0xff] %v1743_v63  ;;  %v509_v10 = vmul.f32 %v1617_v30, %v497_v35  ;;  %v499_v6 = vmul.f32 %v1733_v57, %v1674_v60  ;;  %v380_v29 = vmul.f32 %v1591_v20, %v368_v42  ;;  %v381_v28 = vmul.f32 %v1591_v20, %v369_v47 }
  0xd0   : > { %v1758_v43 = vpop.permute.xlu0 %789  ;;  %v510_v47 = vmul.f32 %v1617_v30, %v498_v5 }
  0xd1   : > { %2156 = vst [vmem:[#allocation11_spill] sm:$0xff] %v1758_v43  ;;  %v511_v14 = vmul.f32 %v1617_v30, %v499_v6 }
  0xd2   : > { %v273_v36 = vpop.permute.xlu1 %272 }
  0xd5   : > { %v316_v43 = vpop.permute.xlu0 %315 }
  0xd6   : > { %v281_v23 = vpop.permute.xlu1 %280  ;;  %v322_v21 = vmul.f32 %v316_v43, %v309_v26  ;;  %v323_v18 = vmul.f32 %v316_v43, %v310_v11  ;;  %v320_v61 = vmul.f32 %v316_v43, %v307_v44  ;;  %v321_v24 = vmul.f32 %v316_v43, %v308_v55 }
  0xd7   : > { %v288_v31 = vsel %vm284_vm0, %v273_v36, %v281_v23  ;;  %v292_v34 = vsel %vm284_vm0, %v281_v23, %v273_v36  ;;  %v318_v17 = vmul.f32 %v316_v43, %v305_v32  ;;  %v319_v42 = vmul.f32 %v316_v43, %v306_v59 }
  0xd8   : > { %v311_v35 = vmul.f32 %v298_v25, %v292_v34  ;;  %v312_v58 = vmul.f32 %v302_v27, %v288_v31  ;;  %v388_v50 = vadd.f32 %v380_v29, %v322_v21  ;;  %v389_v60 = vadd.f32 %v381_v28, %v323_v18 }
  0xd9   : > { %v463_v48 = vpop.permute.xlu0 %462  ;;  %v386_v56 = vadd.f32 %v378_v38, %v320_v61  ;;  %v387_v63 = vadd.f32 %v379_v52, %v321_v24  ;;  %v384_v27 = vadd.f32 %v376_v1, %v318_v17  ;;  %v385_v44 = vadd.f32 %v377_v2, %v319_v42 }
  0xda   : > { %v341_v33 = vpop.permute.xlu1 %340  ;;  %v324_v11 = vmul.f32 %v316_v43, %v311_v35  ;;  %v325_v5 = vmul.f32 %v316_v43, %v312_v58 }
  0xdb   : > { %v346_v26 = vsel %vm342_vm1, %v1683_v0, %v341_v33  ;;  %v350_v25 = vsel %vm342_vm1, %v341_v33, %v1683_v0  ;;  %v452_v55 = vadd.f32 %v444_v7, %v386_v56  ;;  %v453_v36 = vadd.f32 %v445_v62, %v387_v63 }
  0xdc   : > { %v370_v32 = vmul.f32 %v1698_v13, %v350_v25  ;;  %v371_v59 = vmul.f32 %v1701_v15, %v346_v26  ;;  %v450_v38 = vadd.f32 %v442_v37, %v384_v27  ;;  %v451_v24 = vadd.f32 %v443_v54, %v385_v44 }
  0xdd   : > { %v518_v28 = vadd.f32 %v510_v47, %v452_v55  ;;  %v519_v23 = vadd.f32 %v511_v14, %v453_v36  ;;  %v1814_v33 = vpop.permute.xlu0 %612  ;;  %v532_v44 = vmul.f32 %v1638_v40, %v1490_v12  ;;  %v1314_v55 = vld [vmem:[%s2129_s1 + $0x6] ss:$8 sm:$0x3] }
  0xde   : > { %v382_v52 = vmul.f32 %v1591_v20, %v370_v32  ;;  %v383_v6 = vmul.f32 %v1591_v20, %v371_v59  ;;  %v405_v29 = vpop.permute.xlu1 %404  ;;  %v516_v0 = vadd.f32 %v508_v9, %v450_v38  ;;  %v517_v13 = vadd.f32 %v509_v10, %v451_v24 }
  0xdf   : > { %v411_v17 = vsel %vm408_vm2, %v1692_v8, %v405_v29  ;;  %v415_v56 = vsel %vm408_vm2, %v405_v29, %v1692_v8  ;;  %v1819_v63 = vadd.f32 %v1764_v46, %v518_v28  ;;  %v1822_v1 = vadd.f32 %v1768_v39, %v519_v23 }
  0xe0   : > { %v1810_v58 = vadd.f32 %v382_v52, %v324_v11  ;;  %v1812_v15 = vadd.f32 %v383_v6, %v325_v5  ;;  %v434_v20 = vmul.f32 %v1724_v45, %v415_v56  ;;  %v435_v14 = vmul.f32 %v1727_v49, %v411_v17  ;;  %v1315_v5 = vld [vmem:[%s2129_s1 + $0x7] ss:$8 sm:$0x3]  ;;  %v2159_v17 = vld [vmem:[#allocation9_spill] sm:$0xff] }
  0xe1   : > { %v1824_v2 = vadd.f32 %v528_v53, %v516_v0  ;;  %v1826_v8 = vadd.f32 %v529_v41, %v517_v13  ;;  %v677_v9 = vpop.permute.xlu0 %676  ;;  %v533_v32 = vmul.f32 %v1638_v40, %v1515_v16  ;;  %v2157_v52 = vld [vmem:[#allocation10_spill] sm:$0xff]  ;;  %v1886_v29 = vrot.slane %v1314_v55, %v1688_v3 }
  0xe2   : > { %v446_v43 = vmul.f32 %v1589_v19, %v434_v20  ;;  %v447_v37 = vmul.f32 %v1589_v19, %v435_v14  ;;  %v1830_v54 = vpop.permute.xlu1 %554  ;;  %v2158_v6 = vld [vmem:[#allocation6_spill] sm:$0xff]  ;;  %v1889_v28 = vrot.slane %v1314_v55, %v1690_v4  ;;  %v1893_v23 = vrot.slane %v1315_v5, %v1688_v3 }
  0xe4   : > { %v454_v7 = vadd.f32 %v446_v43, %v388_v50  ;;  %v455_v62 = vadd.f32 %v447_v37, %v389_v60  ;;  %v1313_v50 = vld [vmem:[%s2129_s1 + $0x5] ss:$8 sm:$0x3] }
  0xe5   : > { %v465_v46 = vpop.permute.xlu0 %464  ;;  %v1859_v59 = vrot.slane %v1313_v50, %v1688_v3  ;;  %v1870_v12 = vrot.slane %v1313_v50, %v1690_v4 }
  0xe6   : > { %v619_v10 = vpop.permute.xlu1 %618 }
  0xe7   : > { %v627_v56 = vsel %vm626_vm5, %v2159_v17, %v619_v10  ;;  %v631_v0 = vsel %vm626_vm5, %v619_v10, %v2159_v17  ;;  %v1316_v10 = vld [vmem:[%s2129_s1 + $0x10] ss:$8 sm:$0x3] }
  0xe9   : > { %v1832_v21 = vpop.permute.xlu0 %678 }
  0xea   : > { %v399_v31 = vpop.permute.xlu1 %398 }
  0xee   : > { %v407_v34 = vpop.permute.xlu1 %406 }
  0xef   : > { %v412_v61 = vsel %vm408_vm2, %v399_v31, %v407_v34  ;;  %v416_v60 = vsel %vm408_vm2, %v407_v34, %v399_v31 }
  0xf0   : > { %v436_v36 = vmul.f32 %v1724_v45, %v416_v60  ;;  %v437_v11 = vmul.f32 %v1727_v49, %v412_v61  ;;  %v561_v45 = vsel %vm560_vm4, %v2158_v6, %v2157_v52  ;;  %v565_v49 = vsel %vm560_vm4, %v2157_v52, %v2158_v6 }
  0xf1   : > { %v582_v14 = vmul.f32 %v1859_v59, %v561_v45  ;;  %v583_v43 = vmul.f32 %v1870_v12, %v565_v49  ;;  %v1932_v60 = vrot.slane %v1316_v10, %v1690_v4  ;;  %v2165_v49 = vld [vmem:[#allocation7_spill] sm:$0xff] }
  0xf2   : > { %v471_v39 = vpop.permute.xlu1 %470  ;;  %v448_v13 = vmul.f32 %v1589_v19, %v436_v36  ;;  %v449_v20 = vmul.f32 %v1589_v19, %v437_v11 }
  0xf3   : > { %v477_v53 = vsel %vm474_vm3, %v463_v48, %v471_v39  ;;  %v481_v41 = vsel %vm474_vm3, %v471_v39, %v463_v48  ;;  %v1852_v48 = vpop.permute.xlu0 %742 }
  0xf4   : > { %v500_v18 = vmul.f32 %v1730_v51, %v481_v41  ;;  %v501_v35 = vmul.f32 %v1733_v57, %v477_v53  ;;  %v648_v53 = vmul.f32 %v1886_v29, %v627_v56  ;;  %v649_v41 = vmul.f32 %v1889_v28, %v631_v0 }
  0xf5   : > { %v456_v50 = vadd.f32 %v448_v13, %v1810_v58  ;;  %v457_v61 = vadd.f32 %v449_v20, %v1812_v15  ;;  %v2161_v15 = vld [vmem:[#allocation2_spill] sm:$0xff] }
  0xf6   : > { %v512_v42 = vmul.f32 %v1617_v30, %v500_v18  ;;  %v513_v47 = vmul.f32 %v1617_v30, %v501_v35  ;;  %v1849_v26 = vpop.permute.xlu1 %620 }
  0xf7   : > { %v1905_v37 = vpop.permute.xlu0 %811 }
  0xf8   : > { %v520_v25 = vadd.f32 %v512_v42, %v454_v7  ;;  %v521_v27 = vadd.f32 %v513_v47, %v455_v62  ;;  %v1908_v7 = vrot.slane %v1315_v5, %v1690_v4 }
  0xfa   : > { %v685_v16 = vpop.permute.xlu1 %684  ;;  %v1873_v38 = vadd.f32 %v532_v44, %v520_v25  ;;  %v1875_v24 = vadd.f32 %v533_v32, %v521_v27  ;;  %v2162_v44 = vld [vmem:[#allocation3_spill] sm:$0xff]  ;;  %v2163_v32 = vld [vmem:[#allocation5_spill] sm:$0xff] }
  0xfb   : > { %v693_v31 = vsel %vm692_vm6, %v677_v9, %v685_v16  ;;  %v697_v19 = vsel %vm692_vm6, %v685_v16, %v677_v9  ;;  %v1929_v9 = vrot.slane %v1316_v10, %v1688_v3  ;;  %v534_v3 = vmul.f32 %v1638_v40, %v2161_v15  ;;  %v745_v11 = vpop.permute.xlu0 %744 }
  0xfc   : > { %v715_v42 = vmul.f32 %v1908_v7, %v697_v19  ;;  %v535_v4 = vmul.f32 %v1638_v40, %v2162_v44  ;;  %v660_v55 = vmul.f32 %v2163_v32, %v648_v53  ;;  %v661_v36 = vmul.f32 %v2163_v32, %v649_v41 }
  0xfd   : > { %v628_v19 = vsel %vm626_vm5, %v1814_v33, %v1849_v26 }
  0xfe   : > { %v473_v62 = vpop.permute.xlu1 %472  ;;  %v727_v56 = vmul.f32 %v2165_v49, %v715_v42  ;;  %v650_v42 = vmul.f32 %v1886_v29, %v628_v19 }
  0xff   : > { %v478_v34 = vsel %vm474_vm3, %v465_v46, %v473_v62  ;;  %v482_v39 = vsel %vm474_vm3, %v473_v62, %v465_v46  ;;  %v714_v46 = vmul.f32 %v1893_v23, %v693_v31 }
 0x100   : > { %v502_v18 = vmul.f32 %v1730_v51, %v482_v39  ;;  %v503_v35 = vmul.f32 %v1733_v57, %v478_v34  ;;  %v2160_v57 = vld [vmem:[#allocation4_spill] sm:$0xff]  ;;  %v1980_v34 = vpop.permute.xlu0 %550  ;;  %v2166_v39 = vld [vmem:[#allocation11_spill] sm:$0xff] }
 0x101   : > { %v594_v27 = vmul.f32 %v2160_v57, %v582_v14  ;;  %v595_v58 = vmul.f32 %v2160_v57, %v583_v43  ;;  %v726_v17 = vmul.f32 %v2165_v49, %v714_v46 }
 0x102   : > { %v514_v47 = vmul.f32 %v1617_v30, %v502_v18  ;;  %v515_v51 = vmul.f32 %v1617_v30, %v503_v35  ;;  %v687_v25 = vpop.permute.xlu1 %686  ;;  %v2164_v30 = vld [vmem:[#allocation8_spill] sm:$0xff] }
 0x103   : > { %v562_v52 = vsel %vm560_vm4, %v2164_v30, %v1830_v54  ;;  %v566_v6 = vsel %vm560_vm4, %v1830_v54, %v2164_v30  ;;  %v602_v45 = vadd.f32 %v594_v27, %v1824_v2  ;;  %v603_v40 = vadd.f32 %v595_v58, %v1826_v8 }
 0x104   : > { %v522_v5 = vadd.f32 %v514_v47, %v456_v50  ;;  %v523_v16 = vadd.f32 %v515_v51, %v457_v61  ;;  %v584_v10 = vmul.f32 %v1859_v59, %v562_v52  ;;  %v585_v31 = vmul.f32 %v1870_v12, %v566_v6 }
 0x105   : > { %v668_v2 = vadd.f32 %v660_v55, %v602_v45  ;;  %v669_v62 = vadd.f32 %v661_v36, %v603_v40  ;;  %v694_v61 = vsel %vm692_vm6, %v1832_v21, %v687_v25  ;;  %v698_v46 = vsel %vm692_vm6, %v687_v25, %v1832_v21  ;;  %v615_v55 = vpop.permute.xlu0 %614 }
 0x106   : > { %v751_v0 = vpop.permute.xlu1 %750  ;;  %v1958_v13 = vadd.f32 %v534_v3, %v522_v5  ;;  %v1960_v20 = vadd.f32 %v535_v4, %v523_v16  ;;  %v596_v51 = vmul.f32 %v2160_v57, %v584_v10  ;;  %v597_v27 = vmul.f32 %v2160_v57, %v585_v31  ;;  %v2003_v16 = vld [vmem:[%s2132_s4] sm:$0xff]  ;;  %v2023_v31 = vld [vmem:[%s2132_s4 + $0x8] sm:$0xff] }
 0x107   : > { %v759_v14 = vsel %vm758_vm7, %v1852_v48, %v751_v0  ;;  %v763_v54 = vsel %vm758_vm7, %v751_v0, %v1852_v48  ;;  %v632_v48 = vsel %vm626_vm5, %v1849_v26, %v1814_v33  ;;  %v735_v18 = vadd.f32 %v727_v56, %v669_v62 }
 0x108   : > { %v780_v8 = vmul.f32 %v1929_v9, %v759_v14  ;;  %v781_v43 = vmul.f32 %v1932_v60, %v763_v54  ;;  %v734_v50 = vadd.f32 %v726_v17, %v668_v2  ;;  %v651_v33 = vmul.f32 %v1889_v28, %v632_v48 }
 0x109   : > { %v716_v58 = vmul.f32 %v1893_v23, %v694_v61  ;;  %v717_v15 = vmul.f32 %v1908_v7, %v698_v46  ;;  %v662_v21 = vmul.f32 %v2163_v32, %v650_v42  ;;  %v604_v30 = vadd.f32 %v596_v51, %v1819_v63  ;;  %v617_v2 = vpop.permute.xlu0 %616 }
 0x10a   : > { %v792_v53 = vmul.f32 %v2166_v39, %v780_v8  ;;  %v549_v41 = vpop.permute.xlu1 %548  ;;  %v793_v35 = vmul.f32 %v2166_v39, %v781_v43  ;;  %v663_v25 = vmul.f32 %v2163_v32, %v651_v33  ;;  %v605_v52 = vadd.f32 %v597_v27, %v1822_v1 }
 0x10b   : > { %v728_v6 = vmul.f32 %v2165_v49, %v716_v58  ;;  %v729_v45 = vmul.f32 %v2165_v49, %v717_v15  ;;  %v670_v0 = vadd.f32 %v662_v21, %v604_v30  ;;  %v2167_v54 = vmov 0.0  }
 0x10c   : > { %v801_v26 = vadd.f32 %v793_v35, %v735_v18  ;;  %v800_v47 = vadd.f32 %v792_v53, %v734_v50  ;;  %v671_v1 = vadd.f32 %v663_v25, %v605_v52 }
 0x10d   : > { %v681_v50 = vpop.permute.xlu0 %680 }
 0x10e   : > { %v557_v3 = vpop.permute.xlu1 %556  ;;  %v815_v44 = vadd.f32 %v1905_v37, %v801_v26  ;;  %v814_v4 = vadd.f32 %v1905_v37, %v800_v47  ;;  %v737_v62 = vadd.f32 %v729_v45, %v671_v1 }
 0x10f   : > { %v563_v33 = vsel %vm560_vm4, %v549_v41, %v557_v3  ;;  %v567_v26 = vsel %vm560_vm4, %v557_v3, %v549_v41 }
 0x110   : > { %v823_v36 = vmax.f32 %v815_v44, 0.0  ;;  %v822_v5 = vmax.f32 %v814_v4, 0.0  ;;  %v586_v58 = vmul.f32 %v1859_v59, %v563_v33  ;;  %v587_v15 = vmul.f32 %v1870_v12, %v567_v26 }
 0x111   : > { %v683_v27 = vpop.permute.xlu0 %682 }
 0x112   : > { %851 = vmatprep.subr.mxu0 %v823_v36  ;;  %v753_v40 = vpop.permute.xlu1 %752  ;;  %v598_v52 = vmul.f32 %v2160_v57, %v586_v58 }
 0x113   : > { %v760_v17 = vsel %vm758_vm7, %v745_v11, %v753_v40  ;;  %v764_v56 = vsel %vm758_vm7, %v753_v40, %v745_v11  ;;  %852 = vmatpush1.msra.mxu0 %v822_v5  ;;  %v736_v11 = vadd.f32 %v728_v6, %v670_v0  ;;  %v599_v6 = vmul.f32 %v2160_v57, %v587_v15 }
 0x114   : > { %v782_v14 = vmul.f32 %v1929_v9, %v760_v17  ;;  %v783_v63 = vmul.f32 %v1932_v60, %v764_v56  ;;  %1317 = vmatmul.mubr.msk.f32.vlgmr.msra.gmra.mrb[0].mxu0 %vm844_vm8, %v2003_v16 }
 0x115   : > { %921 = vmatprep.mubr.f32.mxu0 %v2167_v54 }
 0x116   : > { %v794_v8 = vmul.f32 %v2166_v39, %v782_v14  ;;  %v559_v43 = vpop.permute.xlu1 %558  ;;  %v795_v10 = vmul.f32 %v2166_v39, %v783_v63  ;;  %v747_v14 = vpop.permute.xlu0 %746 }
 0x117   : > { %v564_v41 = vsel %vm560_vm4, %v1980_v34, %v559_v43  ;;  %v568_v3 = vsel %vm560_vm4, %v559_v43, %v1980_v34 }
 0x118   : > { %v803_v19 = vadd.f32 %v795_v10, %v737_v62  ;;  %v802_v48 = vadd.f32 %v794_v8, %v736_v11  ;;  %1318 = vmatmul.mubr.msk.f32.gmra.mrb[2].mxu0 %vm844_vm8, %v2023_v31  ;;  %v588_v34 = vmul.f32 %v1859_v59, %v564_v41  ;;  %v589_v30 = vmul.f32 %v1870_v12, %v568_v3 }
 0x119   : > { %1109 = vmatprep.mubr.f32.mxu0 %v2167_v54  ;;  %v607_v62 = vadd.f32 %v599_v6, %v1875_v24 }
 0x11a   : > { %v623_v53 = vpop.permute.xlu1 %622  ;;  %v817_v18 = vadd.f32 %v1905_v37, %v803_v19  ;;  %v816_v35 = vadd.f32 %v1905_v37, %v802_v48  ;;  %v601_v8 = vmul.f32 %v2160_v57, %v589_v30 }
 0x11b   : > { %v629_v47 = vsel %vm626_vm5, %v615_v55, %v623_v53  ;;  %v633_v51 = vsel %vm626_vm5, %v623_v53, %v615_v55 }
 0x11c   : > { %v825_v61 = vmax.f32 %v817_v18, 0.0  ;;  %v824_v46 = vmax.f32 %v816_v35, 0.0  ;;  %v652_v25 = vmul.f32 %v1886_v29, %v629_v47  ;;  %v653_v55 = vmul.f32 %v1889_v28, %v633_v51 }
 0x11e   : > { %v625_v42 = vpop.permute.xlu1 %624  ;;  %948 = vmatprep.subr.mxu1 %v825_v61  ;;  %v664_v63 = vmul.f32 %v2163_v32, %v652_v25  ;;  %v665_v1 = vmul.f32 %v2163_v32, %v653_v55 }
 0x11f   : > { %949 = vmatpush1.msra.mxu1 %v824_v46  ;;  %v630_v36 = vsel %vm626_vm5, %v617_v2, %v625_v42  ;;  %v634_v5 = vsel %vm626_vm5, %v625_v42, %v617_v2  ;;  %v600_v2 = vmul.f32 %v2160_v57, %v588_v34  ;;  %v749_v46 = vpop.permute.xlu0 %748 }
 0x120   : > { %1319 = vmatmul.mubr.msk.f32.vlgmr.msra.gmra.mrb[0].mxu1 %vm844_vm8, %v2003_v16  ;;  %v654_v56 = vmul.f32 %v1886_v29, %v630_v36  ;;  %v655_v59 = vmul.f32 %v1889_v28, %v634_v5  ;;  %v606_v28 = vadd.f32 %v598_v52, %v1873_v38  ;;  %v673_v18 = vadd.f32 %v665_v1, %v607_v62 }
 0x121   : > { %1018 = vmatprep.mubr.f32.mxu1 %v2167_v54  ;;  %v608_v35 = vadd.f32 %v600_v2, %v1958_v13 }
 0x122   : > { %v689_v44 = vpop.permute.xlu1 %688  ;;  %v666_v48 = vmul.f32 %v2163_v32, %v654_v56  ;;  %v667_v53 = vmul.f32 %v2163_v32, %v655_v59 }
 0x123   : > { %v695_v4 = vsel %vm692_vm6, %v681_v50, %v689_v44  ;;  %v699_v21 = vsel %vm692_vm6, %v689_v44, %v681_v50  ;;  %v609_v50 = vadd.f32 %v601_v8, %v1960_v20 }
 0x124   : > { %1320 = vmatmul.mubr.msk.f32.gmra.mrb[2].mxu1 %vm844_vm8, %v2023_v31  ;;  %v718_v45 = vmul.f32 %v1893_v23, %v695_v4  ;;  %v719_v40 = vmul.f32 %v1908_v7, %v699_v21 }
 0x125   : > { %1206 = vmatprep.mubr.f32.mxu1 %v2167_v54  ;;  %v675_v58 = vadd.f32 %v667_v53, %v609_v50 }
 0x126   : > { %v691_v17 = vpop.permute.xlu1 %690  ;;  %v730_v10 = vmul.f32 %v2165_v49, %v718_v45  ;;  %v731_v11 = vmul.f32 %v2165_v49, %v719_v40 }
 0x127   : > { %v696_v12 = vsel %vm692_vm6, %v683_v27, %v691_v17  ;;  %v700_v0 = vsel %vm692_vm6, %v691_v17, %v683_v27  ;;  %v674_v27 = vadd.f32 %v666_v48, %v608_v35 }
 0x128   : > { %v720_v43 = vmul.f32 %v1893_v23, %v696_v12  ;;  %v721_v29 = vmul.f32 %v1908_v7, %v700_v0  ;;  %v672_v7 = vadd.f32 %v664_v63, %v606_v28  ;;  %v739_v33 = vadd.f32 %v731_v11, %v673_v18 }
 0x12a   : > { %v755_v19 = vpop.permute.xlu1 %754  ;;  %v732_v61 = vmul.f32 %v2165_v49, %v720_v43  ;;  %v733_v32 = vmul.f32 %v2165_v49, %v721_v29  ;;  %v738_v42 = vadd.f32 %v730_v10, %v672_v7 }
 0x12b   : > { %v761_v57 = vsel %vm758_vm7, %v747_v14, %v755_v19  ;;  %v765_v23 = vsel %vm758_vm7, %v755_v19, %v747_v14 }
 0x12c   : > { %v784_v38 = vmul.f32 %v1929_v9, %v761_v57  ;;  %v785_v24 = vmul.f32 %v1932_v60, %v765_v23  ;;  %v740_v44 = vadd.f32 %v732_v61, %v674_v27  ;;  %v741_v4 = vadd.f32 %v733_v32, %v675_v58 }
 0x12e   : > { %v796_v26 = vmul.f32 %v2166_v39, %v784_v38  ;;  %v797_v47 = vmul.f32 %v2166_v39, %v785_v24  ;;  %v757_v51 = vpop.permute.xlu1 %756 }
 0x12f   : > { %v762_v15 = vsel %vm758_vm7, %v749_v46, %v757_v51  ;;  %v766_v13 = vsel %vm758_vm7, %v757_v51, %v749_v46 }
 0x130   : > { %v804_v20 = vadd.f32 %v796_v26, %v738_v42  ;;  %v786_v41 = vmul.f32 %v1929_v9, %v762_v15  ;;  %v787_v49 = vmul.f32 %v1932_v60, %v766_v13  ;;  %v805_v3 = vadd.f32 %v797_v47, %v739_v33 }
 0x132   : > { %v798_v21 = vmul.f32 %v2166_v39, %v786_v41  ;;  %v799_v25 = vmul.f32 %v2166_v39, %v787_v49  ;;  %v819_v55 = vadd.f32 %v1905_v37, %v805_v3  ;;  %v818_v36 = vadd.f32 %v1905_v37, %v804_v20 }
 0x133   : > { %v842_v0 = vpop.permute.xlu1 %841 }
 0x134   : > { %v806_v5 = vadd.f32 %v798_v21, %v740_v44  ;;  %v827_v34 = vmax.f32 %v819_v55, 0.0  ;;  %v826_v22 = vmax.f32 %v818_v36, 0.0  ;;  %v807_v30 = vadd.f32 %v799_v25, %v741_v4 }
 0x136   : > { %1045 = vmatprep.subr.mxu0 %v827_v34  ;;  %v821_v9 = vadd.f32 %v1905_v37, %v807_v30  ;;  %v820_v60 = vadd.f32 %v1905_v37, %v806_v5  ;;  %v837_v37 = vpop.permute.xlu0 %836 }
 0x137   : > { %1046 = vmatpush1.msra.mxu0 %v826_v22 }
 0x138   : > { %1321 = vmatmul.mubr.msk.f32.vlgmr.msra.gmra.mrb[4].mxu0 %vm844_vm8, %v2003_v16  ;;  %v829_v52 = vmax.f32 %v821_v9, 0.0  ;;  %v828_v6 = vmax.f32 %v820_v60, 0.0 }
 0x139   : > { %1115 = vmatprep.mubr.f32.mxu0 %v2167_v54 }
 0x13a   : > { %1142 = vmatprep.subr.mxu1 %v829_v52 }
 0x13b   : > { %1143 = vmatpush1.msra.mxu1 %v828_v6 }
 0x13c   : > { %1322 = vmatmul.mubr.msk.f32.gmra.mrb[6].mxu0 %vm844_vm8, %v2023_v31  ;;  %1323 = vmatmul.mubr.msk.f32.vlgmr.msra.gmra.mrb[4].mxu1 %vm844_vm8, %v2003_v16 }
 0x13d   : > { %1212 = vmatprep.mubr.f32.mxu1 %v2167_v54 }
 0x140   : > { %1324 = vmatmul.mubr.msk.f32.gmra.mrb[6].mxu1 %vm844_vm8, %v2023_v31 }
 0x1e7   : > { %v917_v39 = vpop.f32.mrb[0].mxu0 }
 0x1e8   : > { %v918_v45 = vadd.f32 %v917_v39, %v837_v37  ;;  %v919_v40 = vpop.f32.mrb[1].mxu0 }
 0x1e9   : > { %v920_v17 = vadd.f32 %v919_v40, %v837_v37 }
 0x1ea   : > { %v936_v56 = vmul.f32 %v918_v45, %v918_v45 }
 0x1eb   : > { %v937_v59 = vmul.f32 %v920_v17, %v920_v17  ;;  %v928_v12 = vadd.f32 %v920_v17, %v918_v45  ;;  %v923_v14 = vpop.f32.mrb[2].mxu0 }
 0x1ec   : > { %v924_v63 = vadd.f32 %v923_v14, %v842_v0  ;;  %v925_v1 = vpop.f32.mrb[3].mxu0 }
 0x1ed   : > { %929 = vadd.xlane.f32.xlu0 %v928_v12  ;;  %v940_v2 = vadd.f32 %v937_v59, %v936_v56  ;;  %v926_v16 = vadd.f32 %v925_v1, %v842_v0 }
 0x1ee   : > { %v938_v8 = vmul.f32 %v924_v63, %v924_v63 }
 0x1ef   : > { %941 = vadd.xlane.f32.xlu1 %v940_v2  ;;  %v939_v54 = vmul.f32 %v926_v16, %v926_v16  ;;  %v931_v43 = vadd.f32 %v926_v16, %v924_v63 }
 0x1f1   : > { %v943_v31 = vadd.f32 %v939_v54, %v938_v8 }
 0x1f3   : > { %v1014_v29 = vpop.f32.mrb[0].mxu1 }
 0x1f4   : > { %v1015_v28 = vadd.f32 %v1014_v29, %v837_v37  ;;  %v1016_v62 = vpop.f32.mrb[1].mxu1 }
 0x1f5   : > { %v1017_v10 = vadd.f32 %v1016_v62, %v837_v37 }
 0x1f6   : > { %v1033_v11 = vmul.f32 %v1015_v28, %v1015_v28 }
 0x1f7   : > { %v1034_v19 = vmul.f32 %v1017_v10, %v1017_v10  ;;  %v1025_v48 = vadd.f32 %v1017_v10, %v1015_v28  ;;  %v1020_v53 = vpop.f32.mrb[2].mxu1 }
 0x1f8   : > { %v1022_v57 = vpop.f32.mrb[3].mxu1  ;;  %v1021_v23 = vadd.f32 %v1020_v53, %v842_v0 }
 0x1f9   : > { %1026 = vadd.xlane.f32.xlu0 %v1025_v48  ;;  %v1037_v7 = vadd.f32 %v1034_v19, %v1033_v11  ;;  %v1023_v18 = vadd.f32 %v1022_v57, %v842_v0 }
 0x1fa   : > { %v1035_v38 = vmul.f32 %v1021_v23, %v1021_v23 }
 0x1fb   : > { %1038 = vadd.xlane.f32.xlu1 %v1037_v7  ;;  %v1028_v24 = vadd.f32 %v1023_v18, %v1021_v23  ;;  %v1036_v35 = vmul.f32 %v1023_v18, %v1023_v18 }
 0x1fd   : > { %1029 = vadd.xlane.f32.xlu0 %v1028_v24  ;;  %v1040_v50 = vadd.f32 %v1036_v35, %v1035_v38 }
 0x1ff   : > { %932 = vadd.xlane.f32.xlu1 %v931_v43 }
 0x201   : > { %944 = vadd.xlane.f32.xlu0 %v943_v31 }
 0x205   : > { %1041 = vadd.xlane.f32.xlu0 %v1040_v50 }
 0x20b   : > { %v1111_v61 = vpop.f32.mrb[4].mxu0 }
 0x20c   : > { %v1112_v32 = vadd.f32 %v1111_v61, %v837_v37  ;;  %v1113_v46 = vpop.f32.mrb[5].mxu0 }
 0x20d   : > { %v1114_v42 = vadd.f32 %v1113_v46, %v837_v37 }
 0x20e   : > { %v1130_v33 = vmul.f32 %v1112_v32, %v1112_v32 }
 0x20f   : > { %v1131_v26 = vmul.f32 %v1114_v42, %v1114_v42  ;;  %v1117_v47 = vpop.f32.mrb[6].mxu0  ;;  %v1208_v51 = vpop.f32.mrb[4].mxu1  ;;  %v1122_v27 = vadd.f32 %v1114_v42, %v1112_v32 }
 0x210   : > { %v1118_v58 = vadd.f32 %v1117_v47, %v842_v0  ;;  %v1209_v15 = vadd.f32 %v1208_v51, %v837_v37  ;;  %v1119_v13 = vpop.f32.mrb[7].mxu0  ;;  %v1210_v20 = vpop.f32.mrb[5].mxu1 }
 0x211   : > { %v1120_v41 = vadd.f32 %v1119_v13, %v842_v0  ;;  %v1211_v49 = vadd.f32 %v1210_v20, %v837_v37  ;;  %1123 = vadd.xlane.f32.xlu1 %v1122_v27  ;;  %v1134_v3 = vadd.f32 %v1131_v26, %v1130_v33 }
 0x212   : > { %v1132_v44 = vmul.f32 %v1118_v58, %v1118_v58  ;;  %v1227_v4 = vmul.f32 %v1209_v15, %v1209_v15 }
 0x213   : > { %v1133_v21 = vmul.f32 %v1120_v41, %v1120_v41  ;;  %v1228_v25 = vmul.f32 %v1211_v49, %v1211_v49  ;;  %v1214_v55 = vpop.f32.mrb[6].mxu1  ;;  %v1125_v36 = vadd.f32 %v1120_v41, %v1118_v58  ;;  %v1219_v5 = vadd.f32 %v1211_v49, %v1209_v15 }
 0x214   : > { %v1215_v34 = vadd.f32 %v1214_v55, %v842_v0  ;;  %v1216_v22 = vpop.f32.mrb[7].mxu1 }
 0x215   : > { %v1217_v30 = vadd.f32 %v1216_v22, %v842_v0  ;;  %1126 = vadd.xlane.f32.xlu0 %v1125_v36  ;;  %1220 = vadd.xlane.f32.xlu1 %v1219_v5  ;;  %v1137_v9 = vadd.f32 %v1133_v21, %v1132_v44  ;;  %v1231_v60 = vadd.f32 %v1228_v25, %v1227_v4 }
 0x216   : > { %v1229_v52 = vmul.f32 %v1215_v34, %v1215_v34 }
 0x217   : > { %v1230_v6 = vmul.f32 %v1217_v30, %v1217_v30  ;;  %v1222_v37 = vadd.f32 %v1217_v30, %v1215_v34 }
 0x219   : > { %1223 = vadd.xlane.f32.xlu0 %v1222_v37  ;;  %1135 = vadd.xlane.f32.xlu1 %v1134_v3  ;;  %v1234_v39 = vadd.f32 %v1230_v6, %v1229_v52 }
 0x21d   : > { %1138 = vadd.xlane.f32.xlu0 %v1137_v9  ;;  %1232 = vadd.xlane.f32.xlu1 %v1231_v60 }
 0x221   : > { %1235 = vadd.xlane.f32.xlu0 %v1234_v39 }
 0x27a   : > { %v930_v45 = vpop.xlane.xlu0 %929 }
 0x27c   : > { %v942_v17 = vpop.xlane.xlu1 %941 }
 0x286   : > { %v1027_v40 = vpop.xlane.xlu0 %1026 }
 0x287   : > { %v1031_v1 = vadd.f32 %v1027_v40, %v930_v45 }
 0x288   : > { %v1039_v59 = vpop.xlane.xlu1 %1038 }
 0x289   : > { %v1043_v62 = vadd.f32 %v1039_v59, %v942_v17 }
 0x28a   : > { %v1030_v56 = vpop.xlane.xlu0 %1029 }
 0x28c   : > { %v933_v0 = vpop.xlane.xlu1 %932 }
 0x28d   : > { %v1032_v54 = vadd.f32 %v1030_v56, %v933_v0 }
 0x28e   : > { %v945_v12 = vpop.xlane.xlu0 %944 }
 0x292   : > { %v1042_v14 = vpop.xlane.xlu0 %1041 }
 0x293   : > { %v1044_v53 = vadd.f32 %v1042_v14, %v945_v12 }
 0x29e   : > { %v1124_v63 = vpop.xlane.xlu1 %1123 }
 0x29f   : > { %v1128_v2 = vadd.f32 %v1124_v63, %v1031_v1 }
 0x2a2   : > { %v1127_v16 = vpop.xlane.xlu0 %1126  ;;  %v1221_v8 = vpop.xlane.xlu1 %1220 }
 0x2a3   : > { %v1225_v43 = vadd.f32 %v1221_v8, %v1128_v2  ;;  %v1129_v31 = vadd.f32 %v1127_v16, %v1032_v54 }
 0x2a5   : > { %1240 = vst.msk [vmem:[%s256_s23] sm:$0xff] %vm1239_vm9, %v1225_v43 }
 0x2a6   : > { %v1224_v29 = vpop.xlane.xlu0 %1223  ;;  %v1136_v28 = vpop.xlane.xlu1 %1135 }
 0x2a7   : > { %v1226_v10 = vadd.f32 %v1224_v29, %v1129_v31  ;;  %v1140_v11 = vadd.f32 %v1136_v28, %v1043_v62 }
 0x2a9   : > { %1241 = vst.msk [vmem:[%s256_s23 + $0x8] sm:$0xff] %vm1239_vm9, %v1226_v10 }
 0x2aa   : > { %v1139_v19 = vpop.xlane.xlu0 %1138  ;;  %v1233_v48 = vpop.xlane.xlu1 %1232 }
 0x2ab   : > { %v1237_v57 = vadd.f32 %v1233_v48, %v1140_v11  ;;  %v1141_v23 = vadd.f32 %v1139_v19, %v1044_v53 }
 0x2ad   : > { %1243 = vst.msk [vmem:[%s256_s23] sm:$0xff] %vm1242_vm10, %v1237_v57 }
 0x2ae   : > { %v1236_v7 = vpop.xlane.xlu0 %1235 }
 0x2af   : > { %v1238_v18 = vadd.f32 %v1236_v7, %v1141_v23 }
 0x2b1   : > { %1244 = vst.msk [vmem:[%s256_s23 + $0x8] sm:$0xff] %vm1242_vm10, %v1238_v18 }
 0x2b2 PF: > { %s16_s21 = sadd.s32 1, %s1371_s21  }
 0x2b3   : > { %p13_p5 = scmp.ge.s32.totalorder %s16_s21, 4  }
 0x2b5   :  { %15 = sbr.rel (!%p13_p5) target bundleno = 1 (0x1), region = 81 }

</bundles_post_ra>
